<compile_context>
chip_gen: v5e
topology: v5e:2x2
jax: 0.10.0
libtpu: 0.0.40
codegen_flags: <defaults>
</compile_context>

<pallas_src>
import functools
import math

import jax
import jax.numpy as jnp
from jax.experimental import pallas as pl
from jax.experimental.pallas import tpu as pltpu

COMPUTE_DTYPE = jnp.bfloat16     # MXU operand dtype (accumulation stays f32)
LANE = 128


def _round_up(x, m):
    return (x + m - 1) // m * m


def _divisors(n):
    return [d for d in range(1, n + 1) if n % d == 0]


def _pick_tile_oh(oh, ow, max_pixels):
    """Largest divisor of `oh` whose pixel tile fits `max_pixels`.

    Prefers pixel counts that are multiples of 16 (bf16 sublane packing),
    then 8; never falls back beyond the VMEM-derived cap.
    """
    fit = [d for d in _divisors(oh) if d * ow <= max_pixels] or [1]
    for align in (16, 8):
        aligned = [d for d in fit if (d * ow) % align == 0]
        if aligned:
            return max(aligned)
    return max(fit)


def _vmem_capacity_bytes():
    """Per-core VMEM capacity; conservative fallback if the query fails."""
    try:
        info = pltpu.get_tpu_info()
        for name in ("vmem_capacity_bytes", "vmem_bytes", "vmem_size_bytes"):
            cap = getattr(info, name, None)
            if cap:
                return int(cap)
    except Exception:
        pass
    return 64 << 20   # v7x per-TensorCore VMEM (smallest current generation)


# ----------------------------- Pallas kernel -------------------------------- #
def _conv_kernel(x_ref, w_ref, b_ref, o_ref, acc_ref, *, QH, QW, C2, TILE_OH, OW):
    # x_ref  : (1, H2, W2, C2)          bf16 phase-decomposed image (per-batch resident)
    # w_ref  : (QH*QW, C2, OC_pad)      bf16 per-tap weight slabs
    # b_ref  : (1, OC_pad)              f32  bias (zeros if unused)
    # o_ref  : (1, TILE_OH, OW, OC_pad) lane-dense output tile
    # acc_ref: (TILE_OH*OW, OC_pad)     f32  accumulator scratch (per grid step)
    row0 = pl.program_id(1) * TILE_OH
    P = TILE_OH * OW
    # Per-tap matmul accumulation: each tap is a unit-stride shifted window of
    # the resident image contracted against its (C2, OC_pad) weight slab with
    # f32 accumulation in VMEM.  No lane-offset (masked) scratch stores, and
    # the loads of tap j+1 overlap the MXU work of tap j.
    for qh in range(QH):
        for qw in range(QW):
            tap = qh * QW + qw
            lhs = x_ref[0, pl.ds(row0 + qh, TILE_OH), pl.ds(qw, OW), :]
            part = jnp.dot(lhs.reshape(P, C2), w_ref[tap],
                           preferred_element_type=jnp.float32)
            if tap == 0:
                acc_ref[...] = part          # overwrites stale scratch each step
            else:
                acc_ref[...] += part
    y = (acc_ref[...] + b_ref[...]).astype(o_ref.dtype)   # fused bias + cast
    o_ref[0] = y.reshape(TILE_OH, OW, y.shape[-1])         # lane-dense store


# ------------------------------ conv wrapper --------------------------------- #
def conv2d_pallas(x_nchw, weight, bias, *, padding, stride, reflection):
    N, C, H, W = x_nchw.shape
    OC, _, KH, KW = weight.shape
    s = stride
    out_dtype = x_nchw.dtype

    Hp, Wp = H + 2 * padding, W + 2 * padding
    OH = (Hp - KH) // s + 1
    OW = (Wp - KW) // s + 1
    QH, QW = -(-KH // s), -(-KW // s)
    C2 = s * s * C
    T = QH * QW

    # --- pad + NHWC (single constant pad in the zero-padding path) ---------- #
    x_nhwc = jnp.transpose(x_nchw, (0, 2, 3, 1))
    if reflection and padding > 0:
        x_nhwc = jnp.pad(
            x_nhwc, ((0, 0), (padding, padding), (padding, padding), (0, 0)),
            mode="reflect")
        pre_h = pre_w = 0
    else:
        pre_h = pre_w = padding

    # Rows/cols the phase-decomposed image needs so every tap slice is
    # in-bounds: H2 >= OH + QH - 1 (fixes the Hp % s == 0, KH % s != 0 case).
    Hs = max(_round_up(Hp, s), (OH + QH - 1) * s)
    Ws = max(_round_up(Wp, s), (OW + QW - 1) * s)
    cur_h, cur_w = x_nhwc.shape[1], x_nhwc.shape[2]
    x_nhwc = jnp.pad(
        x_nhwc,
        ((0, 0), (pre_h, Hs - cur_h - pre_h), (pre_w, Ws - cur_w - pre_w), (0, 0)))

    # --- space-to-depth: fold the stride into channels (stride-1 kernel) ---- #
    # x2[n, h, w, (rh, rw, c)] = xpad[n, h*s + rh, w*s + rw, c]
    if s == 1:
        x2 = x_nhwc
    else:
        x2 = x_nhwc.reshape(N, Hs // s, s, Ws // s, s, C)
        x2 = jnp.transpose(x2, (0, 1, 3, 2, 4, 5)).reshape(N, Hs // s, Ws // s, C2)
    H2, W2 = x2.shape[1], x2.shape[2]
    x2 = x2.astype(COMPUTE_DTYPE)

    # --- weights -> (T, C2, OC_pad) per-tap slabs, matching (rh, rw, c) order - #
    OC_pad = _round_up(OC, LANE)
    w_t = jnp.transpose(weight, (2, 3, 1, 0))                       # (KH, KW, C, OC)
    w_full = jnp.zeros((QH * s, QW * s, C, OC), weight.dtype).at[:KH, :KW].set(w_t)
    w_tap = jnp.transpose(w_full.reshape(QH, s, QW, s, C, OC),
                          (0, 2, 1, 3, 4, 5)).reshape(T, C2, OC)
    w_tap = jnp.pad(w_tap, ((0, 0), (0, 0), (0, OC_pad - OC))).astype(COMPUTE_DTYPE)
    b_vec = jnp.zeros((OC,), jnp.float32) if bias is None else bias.astype(jnp.float32)
    b_mat = jnp.pad(b_vec, (0, OC_pad - OC)).reshape(1, OC_pad)

    # --- VMEM budget -> tile size + vmem_limit_bytes ------------------------- #
    out_itemsize = jnp.dtype(out_dtype).itemsize
    cap = _vmem_capacity_bytes()
    # P-independent footprint: double-buffered resident image + weights + bias.
    fixed = 2 * H2 * W2 * C2 * 2 + 2 * T * C2 * OC_pad * 2 + 2 * OC_pad * 4
    # Per-output-pixel footprint: 2x output buffers + f32 acc scratch
    # + f32 per-tap matmul temporary + bf16 lhs staging.
    per_pixel = OC_pad * (2 * out_itemsize + 4 + 4) + 2 * C2 * 2
    usable = int(cap * 0.7)
    max_pixels = max(OW, min(1024, (usable - fixed) // per_pixel))
    TILE_OH = _pick_tile_oh(OH, OW, max_pixels)       # divides OH by construction
    P = TILE_OH * OW
    est = fixed + per_pixel * P + (4 << 20)
    vmem_limit = int(min(cap * 0.9, max(est, 32 << 20)))

    # --- tiled, lane-dense, stride-1 VALID conv in Pallas -------------------- #
    kernel = functools.partial(_conv_kernel, QH=QH, QW=QW, C2=C2,
                               TILE_OH=TILE_OH, OW=OW)
    out = pl.pallas_call(
        kernel,
        out_shape=jax.ShapeDtypeStruct((N, OH, OW, OC_pad), out_dtype),
        grid=(N, OH // TILE_OH),
        in_specs=[
            # per-batch image stays resident across the row-tile axis
            pl.BlockSpec((1, H2, W2, C2), lambda n, t: (n, 0, 0, 0)),
            pl.BlockSpec((T, C2, OC_pad), lambda n, t: (0, 0, 0)),
            pl.BlockSpec((1, OC_pad), lambda n, t: (0, 0)),
        ],
        out_specs=pl.BlockSpec((1, TILE_OH, OW, OC_pad), lambda n, t: (n, t, 0, 0)),
        scratch_shapes=[pltpu.VMEM((P, OC_pad), jnp.float32)],
        compiler_params=pltpu.CompilerParams(
            # disjoint output tiles per (n, t): both axes safe to shard (v7x 2 TCs)
            dimension_semantics=("parallel", "parallel"),
            vmem_limit_bytes=vmem_limit),
    )(x2, w_tap, b_mat)

    # Slice off the OC padding and go back to NCHW (kept for PyTorch parity;
    # chain layers in NHWC/OC_pad form to drop these HBM passes).
    y = out[..., :OC]
    return jnp.transpose(y, (0, 3, 1, 2))


# ------------------------------ module wrapper ------------------------------- #
class Conv2D:
    """Pallas/JAX port of the PyTorch Conv2D module (pad -> conv, optional bias)."""

    def __init__(self, in_channels, out_channels, kernel_size, padding, stride,
                 bias=False, reflection=False, key=None):
        self.in_channels = in_channels
        self.out_channels = out_channels
        self.kernel_size = kernel_size
        self.padding = padding
        self.stride = stride
        self.reflection = reflection

        key = jax.random.PRNGKey(0) if key is None else key
        w_key, b_key = jax.random.split(key)
        fan_in = in_channels * kernel_size * kernel_size
        bound = 1.0 / math.sqrt(fan_in)        # torch kaiming_uniform(a=sqrt(5)) bound
        self.weight = jax.random.uniform(
            w_key, (out_channels, in_channels, kernel_size, kernel_size),
            dtype=jnp.float32, minval=-bound, maxval=bound)
        self.bias = (jax.random.uniform(b_key, (out_channels,), dtype=jnp.float32,
                                        minval=-bound, maxval=bound)
                     if bias else None)

    def __call__(self, x_nchw):
        return conv2d_pallas(x_nchw, self.weight, self.bias,
                             padding=self.padding, stride=self.stride,
                             reflection=self.reflection)


# ----------------------------------- demo ------------------------------------ #
def _reference_conv(x, w, b, padding, stride, reflection):
    mode = "reflect" if reflection else "constant"
    xp = jnp.pad(x, ((0, 0), (0, 0), (padding, padding), (padding, padding)), mode=mode)
    y = jax.lax.conv_general_dilated(xp, w, (stride, stride), "VALID",
                                     dimension_numbers=("NCHW", "OIHW", "NCHW"))
    if b is not None:
        y = y + b[None, :, None, None]
    return y


if __name__ == "__main__":
    key = jax.random.PRNGKey(0)
    x_key, m1_key, m2_key = jax.random.split(key, 3)
    x = jax.random.normal(x_key, (2, 4, 16, 16), dtype=jnp.float32)

    # Case 1: zero padding, stride 1, no bias.
    m1 = Conv2D(4, 8, kernel_size=3, padding=1, stride=1, bias=False,
                reflection=False, key=m1_key)
    y1 = m1(x)
    jax.block_until_ready(y1)
    ref1 = _reference_conv(x, m1.weight, m1.bias, 1, 1, False)
    assert y1.shape == (2, 8, 16, 16), y1.shape
    assert jnp.allclose(y1, ref1, atol=2e-2, rtol=2e-2), "case1 mismatch"

    # Case 2: reflection padding, stride 2, fused bias.
    m2 = Conv2D(4, 8, kernel_size=3, padding=1, stride=2, bias=True,
                reflection=True, key=m2_key)
    y2 = m2(x)
    jax.block_until_ready(y2)
    ref2 = _reference_conv(x, m2.weight, m2.bias, 1, 2, True)
    assert y2.shape == (2, 8, 8, 8), y2.shape
    assert jnp.allclose(y2, ref2, atol=2e-2, rtol=2e-2), "case2 mismatch"

    print("KERNEL_OK")
</pallas_src>

<mosaic_0001>
module attributes {stable_mosaic.version = 11 : i64} {
  func.func @_conv_kernel(%arg0: i32, %arg1: i32, %arg2: memref<1x18x18x4xbf16, #tpu.memory_space<vmem>>, %arg3: memref<9x4x128xbf16, #tpu.memory_space<vmem>>, %arg4: memref<1x128xf32, #tpu.memory_space<vmem>>, %arg5: memref<1x16x16x128xf32, #tpu.memory_space<vmem>>, %arg6: memref<256x128xf32, #tpu.memory_space<vmem>>) attributes {dimension_semantics = [#tpu.dimension_semantics<parallel>, #tpu.dimension_semantics<parallel>], iteration_bounds = array<i64: 2, 1>, scalar_prefetch = 0 : i64, scratch_operands = 1 : i64, tpu.core_type = #tpu.core_type<tc>, window_params = [{transform_indices = @transform_0, window_bounds = array<i64: 1, 18, 18, 4>}, {pipeline_mode = #tpu.pipeline_mode<synchronous>, transform_indices = @transform_1, window_bounds = array<i64: 9, 4, 128>}, {pipeline_mode = #tpu.pipeline_mode<synchronous>, transform_indices = @transform_2, window_bounds = array<i64: 1, 128>}, {transform_indices = @transform_3, window_bounds = array<i64: 1, 16, 16, 128>}]} {
    %c16_i32 = arith.constant 16 : i32
    %0 = arith.muli %arg1, %c16_i32 : i32
    %c0_i32 = arith.constant 0 : i32
    %1 = arith.addi %0, %c0_i32 : i32
    %c0 = arith.constant 0 : index
    %2 = arith.index_cast %1 : i32 to index
    %c0_0 = arith.constant 0 : index
    %c0_1 = arith.constant 0 : index
    %3 = vector.load %arg2[%c0, %2, %c0_0, %c0_1] : memref<1x18x18x4xbf16, #tpu.memory_space<vmem>>, vector<1x16x16x4xbf16>
    %4 = vector.shape_cast %3 : vector<1x16x16x4xbf16> to vector<16x16x4xbf16>
    %5 = vector.shape_cast %4 : vector<16x16x4xbf16> to vector<256x4xbf16>
    %c0_2 = arith.constant 0 : index
    %c0_3 = arith.constant 0 : index
    %c0_4 = arith.constant 0 : index
    %6 = vector.load %arg3[%c0_2, %c0_3, %c0_4] : memref<9x4x128xbf16, #tpu.memory_space<vmem>>, vector<1x4x128xbf16>
    %7 = vector.shape_cast %6 : vector<1x4x128xbf16> to vector<4x128xbf16>
    %cst = arith.constant dense<0.000000e+00> : vector<256x128xf32>
    %8 = tpu.matmul %5, %7, %cst {dimension_numbers = #tpu.dot_dimension_numbers<[1], [0], [0], [1], [0, 0, 1, 1], [], []>} : vector<256x4xbf16>, vector<4x128xbf16>, vector<256x128xf32> -> vector<256x128xf32>
    %c0_5 = arith.constant 0 : index
    %c0_6 = arith.constant 0 : index
    %9 = vector.load %arg6[%c0_5, %c0_6] : memref<256x128xf32, #tpu.memory_space<vmem>>, vector<256x128xf32>
    tpu.vector_store %arg6[%c0_5, %c0_6], %8 {strides = array<i32>} : memref<256x128xf32, #tpu.memory_space<vmem>>, vector<256x128xf32>,
    %c0_i32_7 = arith.constant 0 : i32
    %10 = arith.addi %0, %c0_i32_7 : i32
    %c0_8 = arith.constant 0 : index
    %11 = arith.index_cast %10 : i32 to index
    %c1 = arith.constant 1 : index
    %c0_9 = arith.constant 0 : index
    %12 = vector.load %arg2[%c0_8, %11, %c1, %c0_9] : memref<1x18x18x4xbf16, #tpu.memory_space<vmem>>, vector<1x16x16x4xbf16>
    %13 = vector.shape_cast %12 : vector<1x16x16x4xbf16> to vector<16x16x4xbf16>
    %14 = vector.shape_cast %13 : vector<16x16x4xbf16> to vector<256x4xbf16>
    %c1_10 = arith.constant 1 : index
    %c0_11 = arith.constant 0 : index
    %c0_12 = arith.constant 0 : index
    %15 = vector.load %arg3[%c1_10, %c0_11, %c0_12] : memref<9x4x128xbf16, #tpu.memory_space<vmem>>, vector<1x4x128xbf16>
    %16 = vector.shape_cast %15 : vector<1x4x128xbf16> to vector<4x128xbf16>
    %cst_13 = arith.constant dense<0.000000e+00> : vector<256x128xf32>
    %17 = tpu.matmul %14, %16, %cst_13 {dimension_numbers = #tpu.dot_dimension_numbers<[1], [0], [0], [1], [0, 0, 1, 1], [], []>} : vector<256x4xbf16>, vector<4x128xbf16>, vector<256x128xf32> -> vector<256x128xf32>
    %c0_14 = arith.constant 0 : index
    %c0_15 = arith.constant 0 : index
    %18 = vector.load %arg6[%c0_14, %c0_15] : memref<256x128xf32, #tpu.memory_space<vmem>>, vector<256x128xf32>
    %19 = arith.addf %18, %17 : vector<256x128xf32>
    %c0_16 = arith.constant 0 : index
    %c0_17 = arith.constant 0 : index
    %20 = vector.load %arg6[%c0_16, %c0_17] : memref<256x128xf32, #tpu.memory_space<vmem>>, vector<256x128xf32>
    tpu.vector_store %arg6[%c0_16, %c0_17], %19 {strides = array<i32>} : memref<256x128xf32, #tpu.memory_space<vmem>>, vector<256x128xf32>,
    %c0_i32_18 = arith.constant 0 : i32
    %21 = arith.addi %0, %c0_i32_18 : i32
    %c0_19 = arith.constant 0 : index
    %22 = arith.index_cast %21 : i32 to index
    %c2 = arith.constant 2 : index
    %c0_20 = arith.constant 0 : index
    %23 = vector.load %arg2[%c0_19, %22, %c2, %c0_20] : memref<1x18x18x4xbf16, #tpu.memory_space<vmem>>, vector<1x16x16x4xbf16>
    %24 = vector.shape_cast %23 : vector<1x16x16x4xbf16> to vector<16x16x4xbf16>
    %25 = vector.shape_cast %24 : vector<16x16x4xbf16> to vector<256x4xbf16>
    %c2_21 = arith.constant 2 : index
    %c0_22 = arith.constant 0 : index
    %c0_23 = arith.constant 0 : index
    %26 = vector.load %arg3[%c2_21, %c0_22, %c0_23] : memref<9x4x128xbf16, #tpu.memory_space<vmem>>, vector<1x4x128xbf16>
    %27 = vector.shape_cast %26 : vector<1x4x128xbf16> to vector<4x128xbf16>
    %cst_24 = arith.constant dense<0.000000e+00> : vector<256x128xf32>
    %28 = tpu.matmul %25, %27, %cst_24 {dimension_numbers = #tpu.dot_dimension_numbers<[1], [0], [0], [1], [0, 0, 1, 1], [], []>} : vector<256x4xbf16>, vector<4x128xbf16>, vector<256x128xf32> -> vector<256x128xf32>
    %c0_25 = arith.constant 0 : index
    %c0_26 = arith.constant 0 : index
    %29 = vector.load %arg6[%c0_25, %c0_26] : memref<256x128xf32, #tpu.memory_space<vmem>>, vector<256x128xf32>
    %30 = arith.addf %29, %28 : vector<256x128xf32>
    %c0_27 = arith.constant 0 : index
    %c0_28 = arith.constant 0 : index
    %31 = vector.load %arg6[%c0_27, %c0_28] : memref<256x128xf32, #tpu.memory_space<vmem>>, vector<256x128xf32>
    tpu.vector_store %arg6[%c0_27, %c0_28], %30 {strides = array<i32>} : memref<256x128xf32, #tpu.memory_space<vmem>>, vector<256x128xf32>,
    %c1_i32 = arith.constant 1 : i32
    %32 = arith.addi %0, %c1_i32 : i32
    %c0_29 = arith.constant 0 : index
    %33 = arith.index_cast %32 : i32 to index
    %c0_30 = arith.constant 0 : index
    %c0_31 = arith.constant 0 : index
    %34 = vector.load %arg2[%c0_29, %33, %c0_30, %c0_31] : memref<1x18x18x4xbf16, #tpu.memory_space<vmem>>, vector<1x16x16x4xbf16>
    %35 = vector.shape_cast %34 : vector<1x16x16x4xbf16> to vector<16x16x4xbf16>
    %36 = vector.shape_cast %35 : vector<16x16x4xbf16> to vector<256x4xbf16>
    %c3 = arith.constant 3 : index
    %c0_32 = arith.constant 0 : index
    %c0_33 = arith.constant 0 : index
    %37 = vector.load %arg3[%c3, %c0_32, %c0_33] : memref<9x4x128xbf16, #tpu.memory_space<vmem>>, vector<1x4x128xbf16>
    %38 = vector.shape_cast %37 : vector<1x4x128xbf16> to vector<4x128xbf16>
    %cst_34 = arith.constant dense<0.000000e+00> : vector<256x128xf32>
    %39 = tpu.matmul %36, %38, %cst_34 {dimension_numbers = #tpu.dot_dimension_numbers<[1], [0], [0], [1], [0, 0, 1, 1], [], []>} : vector<256x4xbf16>, vector<4x128xbf16>, vector<256x128xf32> -> vector<256x128xf32>
    %c0_35 = arith.constant 0 : index
    %c0_36 = arith.constant 0 : index
    %40 = vector.load %arg6[%c0_35, %c0_36] : memref<256x128xf32, #tpu.memory_space<vmem>>, vector<256x128xf32>
    %41 = arith.addf %40, %39 : vector<256x128xf32>
    %c0_37 = arith.constant 0 : index
    %c0_38 = arith.constant 0 : index
    %42 = vector.load %arg6[%c0_37, %c0_38] : memref<256x128xf32, #tpu.memory_space<vmem>>, vector<256x128xf32>
    tpu.vector_store %arg6[%c0_37, %c0_38], %41 {strides = array<i32>} : memref<256x128xf32, #tpu.memory_space<vmem>>, vector<256x128xf32>,
    %c1_i32_39 = arith.constant 1 : i32
    %43 = arith.addi %0, %c1_i32_39 : i32
    %c0_40 = arith.constant 0 : index
    %44 = arith.index_cast %43 : i32 to index
    %c1_41 = arith.constant 1 : index
    %c0_42 = arith.constant 0 : index
    %45 = vector.load %arg2[%c0_40, %44, %c1_41, %c0_42] : memref<1x18x18x4xbf16, #tpu.memory_space<vmem>>, vector<1x16x16x4xbf16>
    %46 = vector.shape_cast %45 : vector<1x16x16x4xbf16> to vector<16x16x4xbf16>
    %47 = vector.shape_cast %46 : vector<16x16x4xbf16> to vector<256x4xbf16>
    %c4 = arith.constant 4 : index
    %c0_43 = arith.constant 0 : index
    %c0_44 = arith.constant 0 : index
    %48 = vector.load %arg3[%c4, %c0_43, %c0_44] : memref<9x4x128xbf16, #tpu.memory_space<vmem>>, vector<1x4x128xbf16>
    %49 = vector.shape_cast %48 : vector<1x4x128xbf16> to vector<4x128xbf16>
    %cst_45 = arith.constant dense<0.000000e+00> : vector<256x128xf32>
    %50 = tpu.matmul %47, %49, %cst_45 {dimension_numbers = #tpu.dot_dimension_numbers<[1], [0], [0], [1], [0, 0, 1, 1], [], []>} : vector<256x4xbf16>, vector<4x128xbf16>, vector<256x128xf32> -> vector<256x128xf32>
    %c0_46 = arith.constant 0 : index
    %c0_47 = arith.constant 0 : index
    %51 = vector.load %arg6[%c0_46, %c0_47] : memref<256x128xf32, #tpu.memory_space<vmem>>, vector<256x128xf32>
    %52 = arith.addf %51, %50 : vector<256x128xf32>
    %c0_48 = arith.constant 0 : index
    %c0_49 = arith.constant 0 : index
    %53 = vector.load %arg6[%c0_48, %c0_49] : memref<256x128xf32, #tpu.memory_space<vmem>>, vector<256x128xf32>
    tpu.vector_store %arg6[%c0_48, %c0_49], %52 {strides = array<i32>} : memref<256x128xf32, #tpu.memory_space<vmem>>, vector<256x128xf32>,
    %c1_i32_50 = arith.constant 1 : i32
    %54 = arith.addi %0, %c1_i32_50 : i32
    %c0_51 = arith.constant 0 : index
    %55 = arith.index_cast %54 : i32 to index
    %c2_52 = arith.constant 2 : index
    %c0_53 = arith.constant 0 : index
    %56 = vector.load %arg2[%c0_51, %55, %c2_52, %c0_53] : memref<1x18x18x4xbf16, #tpu.memory_space<vmem>>, vector<1x16x16x4xbf16>
    %57 = vector.shape_cast %56 : vector<1x16x16x4xbf16> to vector<16x16x4xbf16>
    %58 = vector.shape_cast %57 : vector<16x16x4xbf16> to vector<256x4xbf16>
    %c5 = arith.constant 5 : index
    %c0_54 = arith.constant 0 : index
    %c0_55 = arith.constant 0 : index
    %59 = vector.load %arg3[%c5, %c0_54, %c0_55] : memref<9x4x128xbf16, #tpu.memory_space<vmem>>, vector<1x4x128xbf16>
    %60 = vector.shape_cast %59 : vector<1x4x128xbf16> to vector<4x128xbf16>
    %cst_56 = arith.constant dense<0.000000e+00> : vector<256x128xf32>
    %61 = tpu.matmul %58, %60, %cst_56 {dimension_numbers = #tpu.dot_dimension_numbers<[1], [0], [0], [1], [0, 0, 1, 1], [], []>} : vector<256x4xbf16>, vector<4x128xbf16>, vector<256x128xf32> -> vector<256x128xf32>
    %c0_57 = arith.constant 0 : index
    %c0_58 = arith.constant 0 : index
    %62 = vector.load %arg6[%c0_57, %c0_58] : memref<256x128xf32, #tpu.memory_space<vmem>>, vector<256x128xf32>
    %63 = arith.addf %62, %61 : vector<256x128xf32>
    %c0_59 = arith.constant 0 : index
    %c0_60 = arith.constant 0 : index
    %64 = vector.load %arg6[%c0_59, %c0_60] : memref<256x128xf32, #tpu.memory_space<vmem>>, vector<256x128xf32>
    tpu.vector_store %arg6[%c0_59, %c0_60], %63 {strides = array<i32>} : memref<256x128xf32, #tpu.memory_space<vmem>>, vector<256x128xf32>,
    %c2_i32 = arith.constant 2 : i32
    %65 = arith.addi %0, %c2_i32 : i32
    %c0_61 = arith.constant 0 : index
    %66 = arith.index_cast %65 : i32 to index
    %c0_62 = arith.constant 0 : index
    %c0_63 = arith.constant 0 : index
    %67 = vector.load %arg2[%c0_61, %66, %c0_62, %c0_63] : memref<1x18x18x4xbf16, #tpu.memory_space<vmem>>, vector<1x16x16x4xbf16>
    %68 = vector.shape_cast %67 : vector<1x16x16x4xbf16> to vector<16x16x4xbf16>
    %69 = vector.shape_cast %68 : vector<16x16x4xbf16> to vector<256x4xbf16>
    %c6 = arith.constant 6 : index
    %c0_64 = arith.constant 0 : index
    %c0_65 = arith.constant 0 : index
    %70 = vector.load %arg3[%c6, %c0_64, %c0_65] : memref<9x4x128xbf16, #tpu.memory_space<vmem>>, vector<1x4x128xbf16>
    %71 = vector.shape_cast %70 : vector<1x4x128xbf16> to vector<4x128xbf16>
    %cst_66 = arith.constant dense<0.000000e+00> : vector<256x128xf32>
    %72 = tpu.matmul %69, %71, %cst_66 {dimension_numbers = #tpu.dot_dimension_numbers<[1], [0], [0], [1], [0, 0, 1, 1], [], []>} : vector<256x4xbf16>, vector<4x128xbf16>, vector<256x128xf32> -> vector<256x128xf32>
    %c0_67 = arith.constant 0 : index
    %c0_68 = arith.constant 0 : index
    %73 = vector.load %arg6[%c0_67, %c0_68] : memref<256x128xf32, #tpu.memory_space<vmem>>, vector<256x128xf32>
    %74 = arith.addf %73, %72 : vector<256x128xf32>
    %c0_69 = arith.constant 0 : index
    %c0_70 = arith.constant 0 : index
    %75 = vector.load %arg6[%c0_69, %c0_70] : memref<256x128xf32, #tpu.memory_space<vmem>>, vector<256x128xf32>
    tpu.vector_store %arg6[%c0_69, %c0_70], %74 {strides = array<i32>} : memref<256x128xf32, #tpu.memory_space<vmem>>, vector<256x128xf32>,
    %c2_i32_71 = arith.constant 2 : i32
    %76 = arith.addi %0, %c2_i32_71 : i32
    %c0_72 = arith.constant 0 : index
    %77 = arith.index_cast %76 : i32 to index
    %c1_73 = arith.constant 1 : index
    %c0_74 = arith.constant 0 : index
    %78 = vector.load %arg2[%c0_72, %77, %c1_73, %c0_74] : memref<1x18x18x4xbf16, #tpu.memory_space<vmem>>, vector<1x16x16x4xbf16>
    %79 = vector.shape_cast %78 : vector<1x16x16x4xbf16> to vector<16x16x4xbf16>
    %80 = vector.shape_cast %79 : vector<16x16x4xbf16> to vector<256x4xbf16>
    %c7 = arith.constant 7 : index
    %c0_75 = arith.constant 0 : index
    %c0_76 = arith.constant 0 : index
    %81 = vector.load %arg3[%c7, %c0_75, %c0_76] : memref<9x4x128xbf16, #tpu.memory_space<vmem>>, vector<1x4x128xbf16>
    %82 = vector.shape_cast %81 : vector<1x4x128xbf16> to vector<4x128xbf16>
    %cst_77 = arith.constant dense<0.000000e+00> : vector<256x128xf32>
    %83 = tpu.matmul %80, %82, %cst_77 {dimension_numbers = #tpu.dot_dimension_numbers<[1], [0], [0], [1], [0, 0, 1, 1], [], []>} : vector<256x4xbf16>, vector<4x128xbf16>, vector<256x128xf32> -> vector<256x128xf32>
    %c0_78 = arith.constant 0 : index
    %c0_79 = arith.constant 0 : index
    %84 = vector.load %arg6[%c0_78, %c0_79] : memref<256x128xf32, #tpu.memory_space<vmem>>, vector<256x128xf32>
    %85 = arith.addf %84, %83 : vector<256x128xf32>
    %c0_80 = arith.constant 0 : index
    %c0_81 = arith.constant 0 : index
    %86 = vector.load %arg6[%c0_80, %c0_81] : memref<256x128xf32, #tpu.memory_space<vmem>>, vector<256x128xf32>
    tpu.vector_store %arg6[%c0_80, %c0_81], %85 {strides = array<i32>} : memref<256x128xf32, #tpu.memory_space<vmem>>, vector<256x128xf32>,
    %c2_i32_82 = arith.constant 2 : i32
    %87 = arith.addi %0, %c2_i32_82 : i32
    %c0_83 = arith.constant 0 : index
    %88 = arith.index_cast %87 : i32 to index
    %c2_84 = arith.constant 2 : index
    %c0_85 = arith.constant 0 : index
    %89 = vector.load %arg2[%c0_83, %88, %c2_84, %c0_85] : memref<1x18x18x4xbf16, #tpu.memory_space<vmem>>, vector<1x16x16x4xbf16>
    %90 = vector.shape_cast %89 : vector<1x16x16x4xbf16> to vector<16x16x4xbf16>
    %91 = vector.shape_cast %90 : vector<16x16x4xbf16> to vector<256x4xbf16>
    %c8 = arith.constant 8 : index
    %c0_86 = arith.constant 0 : index
    %c0_87 = arith.constant 0 : index
    %92 = vector.load %arg3[%c8, %c0_86, %c0_87] : memref<9x4x128xbf16, #tpu.memory_space<vmem>>, vector<1x4x128xbf16>
    %93 = vector.shape_cast %92 : vector<1x4x128xbf16> to vector<4x128xbf16>
    %cst_88 = arith.constant dense<0.000000e+00> : vector<256x128xf32>
    %94 = tpu.matmul %91, %93, %cst_88 {dimension_numbers = #tpu.dot_dimension_numbers<[1], [0], [0], [1], [0, 0, 1, 1], [], []>} : vector<256x4xbf16>, vector<4x128xbf16>, vector<256x128xf32> -> vector<256x128xf32>
    %c0_89 = arith.constant 0 : index
    %c0_90 = arith.constant 0 : index
    %95 = vector.load %arg6[%c0_89, %c0_90] : memref<256x128xf32, #tpu.memory_space<vmem>>, vector<256x128xf32>
    %96 = arith.addf %95, %94 : vector<256x128xf32>
    %c0_91 = arith.constant 0 : index
    %c0_92 = arith.constant 0 : index
    %97 = vector.load %arg6[%c0_91, %c0_92] : memref<256x128xf32, #tpu.memory_space<vmem>>, vector<256x128xf32>
    tpu.vector_store %arg6[%c0_91, %c0_92], %96 {strides = array<i32>} : memref<256x128xf32, #tpu.memory_space<vmem>>, vector<256x128xf32>,
    %c0_93 = arith.constant 0 : index
    %c0_94 = arith.constant 0 : index
    %98 = vector.load %arg6[%c0_93, %c0_94] : memref<256x128xf32, #tpu.memory_space<vmem>>, vector<256x128xf32>
    %c0_95 = arith.constant 0 : index
    %c0_96 = arith.constant 0 : index
    %99 = vector.load %arg4[%c0_95, %c0_96] : memref<1x128xf32, #tpu.memory_space<vmem>>, vector<1x128xf32>
    %100 = vector.broadcast %99 : vector<1x128xf32> to vector<256x128xf32>
    %101 = arith.addf %98, %100 : vector<256x128xf32>
    %102 = vector.shape_cast %101 : vector<256x128xf32> to vector<16x16x128xf32>
    %c0_97 = arith.constant 0 : index
    %c0_98 = arith.constant 0 : index
    %c0_99 = arith.constant 0 : index
    %c0_100 = arith.constant 0 : index
    %103 = vector.load %arg5[%c0_97, %c0_98, %c0_99, %c0_100] : memref<1x16x16x128xf32, #tpu.memory_space<vmem>>, vector<1x16x16x128xf32>
    %104 = vector.shape_cast %103 : vector<1x16x16x128xf32> to vector<16x16x128xf32>
    %105 = vector.shape_cast %102 : vector<16x16x128xf32> to vector<1x16x16x128xf32>
    tpu.vector_store %arg5[%c0_97, %c0_98, %c0_99, %c0_100], %105 {strides = array<i32>} : memref<1x16x16x128xf32, #tpu.memory_space<vmem>>, vector<1x16x16x128xf32>,
    return
  }
  func.func @transform_0(%arg0: i32, %arg1: i32) -> (i32, i32, i32, i32) {
    %c0_i32 = arith.constant 0 : i32
    %c0_i32_0 = arith.constant 0 : i32
    %c0_i32_1 = arith.constant 0 : i32
    %c0_i32_2 = arith.constant 0 : i32
    return %arg0, %c0_i32, %c0_i32_0, %c0_i32_1 : i32, i32, i32, i32
  }
  func.func @transform_1(%arg0: i32, %arg1: i32) -> (i32, i32, i32) {
    %c0_i32 = arith.constant 0 : i32
    %c0_i32_0 = arith.constant 0 : i32
    %c0_i32_1 = arith.constant 0 : i32
    %c0_i32_2 = arith.constant 0 : i32
    return %c0_i32, %c0_i32_0, %c0_i32_1 : i32, i32, i32
  }
  func.func @transform_2(%arg0: i32, %arg1: i32) -> (i32, i32) {
    %c0_i32 = arith.constant 0 : i32
    %c0_i32_0 = arith.constant 0 : i32
    %c0_i32_1 = arith.constant 0 : i32
    return %c0_i32, %c0_i32_0 : i32, i32
  }
  func.func @transform_3(%arg0: i32, %arg1: i32) -> (i32, i32, i32, i32) {
    %c0_i32 = arith.constant 0 : i32
    %c0_i32_0 = arith.constant 0 : i32
    %c0_i32_1 = arith.constant 0 : i32
    return %arg0, %arg1, %c0_i32, %c0_i32_0 : i32, i32, i32, i32
  }
}

</mosaic_0001>

<bundles_post_ra>
// kernel: tpu_custom_call.1
= control target key start
LH: loop header
LB: loop body
LE: loop exit
PB: predicated region body
PF: predicated region fallthrough
CT: control target
= control target key end

     0   :  { %8 = vsyncpa [#allocation4], 0  ;;  %s7339_s0 = inlined_call_operand.vmem [shape: bf16[2,18,18,4], index: 0, kind: input, shape index: {}]   ;;  %s7340_s1 = inlined_call_operand.vmem [shape: bf16[9,4,128], index: 1, kind: input, shape index: {}]   ;;  %s7341_s2 = inlined_call_operand.vmem [shape: f32[1,128], index: 2, kind: input, shape index: {}]   ;;  %s7342_s3 = inlined_call_operand.hbm [shape: f32[2,16,16,128], index: 3, kind: output, shape index: {}]  }
   0x1   :  { %10 = vsyncpa [#allocation4 + $0x1], 0  ;;  %s5902_s12 = smov 0   ;;  %s5904_s13 = smov 0  }
   0x2   :  { %s5906_s14 = smov 0   ;;  %s5908_s15 = smov 0  }
   0x3   :  { %s5910_s16 = smov 0   ;;  %s5912_s17 = smov 0  }
   0x4 LB: > { %s5028_s18 = sadd.s32 4294967295, %s5878_s17   ;;  %s5029_s19 = sadd.s32 4294967294, %s5878_s17   ;;  %s5878_s17 = sphi %s5912_s17, %s16_s17   ;;  %s5874_s16 = sphi %s5910_s16, %s7373_s16   ;;  %s5870_s15 = sphi %s5908_s15, %s7372_s15   ;;  %s5866_s14 = sphi %s5906_s14, %s7371_s14   ;;  %s5862_s13 = sphi %s5904_s13, %s7370_s13   ;;  %s5858_s12 = sphi %s5902_s12, %s7369_s12  }
   0x5   : > { %s28_s20 = sadd.s32 1, %s5874_s16  ;;  %s105_s21 = sadd.s32 1, %s5866_s14 }
   0x6   : > { %p30_p0 = scmp.ge.s32.totalorder %s28_s20, 2  ;;  %p115_p1 = scmp.ne.s32.totalorder %s5866_s14, %s5862_s13 }
   0x7   : > { %p116_p2 = scmp.eq.s32.totalorder %s5028_s18, 1  ;;  %p121_p3 = scmp.ne.s32.totalorder %s5862_s13, %s5858_s12 }
   0x8   : > { %s7375_s20 = smov (%p30_p0, %s28_s20), 0  ;;  %p122_p5 = scmp.eq.s32.totalorder %s5029_s19, 1 }
   0x9   : > { %p5942_p4 = por %p116_p2, %p115_p1  ;;  %s100_s23 = ssub.s32 %s5874_s16, %s7375_s20 }
   0xa   : > { %p5032_p6 = scmp.ge.s32.totalorder %s5878_s17, 1  ;;  %p103_p7 = scmp.eq.s32.totalorder %s100_s23, 0 }
   0xb   : > { %p5949_p8 = por %p122_p5, %p121_p3  ;;  %p154_p9 = scmp.lt.s32.totalorder %s5878_s17, 3 }
   0xc   : > { %s5955_s25 = scalar_select %p103_p7, %s5866_s14, %s105_s21  }
   0xd   : > { %p155_p10 = pnand %p5032_p6, %p154_p9 }
   0xf   : > { %158 = sbr.rel (%p155_p10) target bundleno = 740 (0x2e4), region = 32 }
  0x14   : > { %v221_v0 = vld [vmem:[%s7340_s1] sm:$0x3]  ;;  %vm351_vm0 = vcmask 1041408   ;;  %p178_p11 = scmp.lt.s32.totalorder %s5870_s15, 1  ;;  %v5148_v2 = vld [vmem:[%s7340_s1 + $0x4] sm:$0x3] }
  0x15   : > { %v353_v1 = vsel %vm351_vm0, %v221_v0, 0  ;;  %v5197_v3 = vld [vmem:[%s7340_s1 + $0x6] sm:$0x3]  ;;  %v1507_v4 = vsel %vm351_vm0, %v5148_v2, 0  ;;  %v5115_v6 = vld [vmem:[%s7340_s1 + $0x2] sm:$0x3] }
  0x16   : > { %5737 = vmatpush.bf16.msra.mxu1 %v353_v1  ;;  %5738 = vmatpush.bf16.msra.mxu2 %v353_v1  ;;  %s179_s5 = scalar_select %p178_p11, %s5870_s15, 1  ;;  %v1861_v5 = vsel %vm351_vm0, %v5197_v3, 0  ;;  %v1010_v7 = vsel %vm351_vm0, %v5115_v6, 0  ;;  %v5326_v8 = vld [vmem:[%s7340_s1 + $0x8] sm:$0x3]  ;;  %vm302_vm1 = vcmask 31744  }
  0x17   : > { %5739 = vmatpush.bf16.msra.mxu3 %v353_v1  ;;  %362 = vmatpush.bf16.msra.mxu0 %v353_v1  ;;  %v2579_v9 = vsel %vm351_vm0, %v5326_v8, 0  ;;  %v5456_v28 = vld [vmem:[%s7340_s1 + $0xc] sm:$0x3]  ;;  %v5585_v29 = vld [vmem:[%s7340_s1 + $0xe] sm:$0x3]  ;;  %vm1293_vm4 = vcmask 1042432  }
  0x18   : > { %s5740_s10 = smul.u32 216, %s179_s5  ;;  %v3427_v30 = vsel %vm351_vm0, %v5456_v28, 0  ;;  %v4145_v31 = vsel %vm351_vm0, %v5585_v29, 0  ;;  %v5407_v32 = vld [vmem:[%s7340_s1 + $0xa] sm:$0x3]  ;;  %vm1294_vm5 = vcmask 1046532  }
  0x19   : > { %v5666_v33 = vld [vmem:[%s7340_s1 + $0x10] sm:$0x3]  ;;  %v3073_v36 = vsel %vm351_vm0, %v5407_v32, 0  ;;  %vm524_vm2 = vsmask.f32 3328  ;;  %vm6043_vm7 = vmor %vm1293_vm4, %vm1294_vm5  ;;  %s175_s5 = sand.u32 1, %s5862_s13  }
  0x1a   : > { %1516 = vmatpush.bf16.msrb.mxu2 %v1507_v4  ;;  %1019 = vmatpush.bf16.msrb.mxu1 %v1010_v7  ;;  %s5982_s19 = scalar_lea.vmem %s7339_s0, %s5740_s10  ;;  %v4639_v37 = vsel %vm351_vm0, %v5666_v33, 0  ;;  %vm525_vm3 = vsmask.f32 7440  ;;  %s5033_s6 = sshll.u32 %s175_s5, 8 }
  0x1b   : > { %1870 = vmatpush.bf16.msrb.mxu3 %v1861_v5  ;;  %2588 = vmatpush.bf16.msrb.mxu0 %v2579_v9  ;;  %v5692_v10 = vld [vmem:[%s5982_s19 + $0x30] sm:$0xff]  ;;  %v5696_v11 = vld [vmem:[%s5982_s19 + $0x60] sm:$0xff]  ;;  %v5694_v18 = vld [vmem:[%s5982_s19 + $0x48] sm:$0xff]  ;;  %s7028_s9 = scalar_lea.vmem [#allocation3], %s5033_s6  ;;  %s5736_s18 = sshll.u32 %s5870_s15, 8 }
  0x1c   : > { %v5700_v12 = vld [vmem:[%s5982_s19 + $0x90] sm:$0xff]  ;;  %v5688_v13 = vld [vmem:[%s5982_s19] sm:$0xff]  ;;  %5103 = vmatmul.msk.bf16.vlgmr.msra.gmra.mxu1 %vm302_vm1, %v5692_v10  ;;  %5107 = vmatmul.msk.bf16.vlgmr.msra.gmra.mxu2 %vm302_vm1, %v5696_v11  ;;  %v5698_v19 = vld [vmem:[%s5982_s19 + $0x78] sm:$0xff]  ;;  %s4941_s23 = scalar_lea.hbm %s7342_s3, %s5736_s18  ;;  %s4942_s26 = sshll.u32 %s7028_s9, 4  ;;  %s4943_s26 = int_to_ptr.vmem [resolvable:$true] %s4942_s26 }
  0x1d   : > { %5111 = vmatmul.msk.bf16.vlgmr.msra.gmra.mxu3 %vm302_vm1, %v5700_v12  ;;  %5099 = vmatmul.msk.bf16.vlgmr.msra.gmra.mxu0 %vm302_vm1, %v5688_v13  ;;  %v5693_v14 = vld [vmem:[%s5982_s19 + $0x3c] sm:$0xff]  ;;  %v5697_v15 = vld [vmem:[%s5982_s19 + $0x6c] sm:$0xff]  ;;  %v477_v23 = vld [vmem:[%s5982_s19 + $0x4] sm:$0xf]  ;;  %s4944_s27 = sshll.u32 %s4941_s23, 4  ;;  %s4927_s15 = scalar_lea.sflag [#allocation4], %s175_s5  ;;  %s4945_s27 = int_to_ptr.hbm [resolvable:$true] %s4944_s27 }
  0x1e   : > { %v5701_v16 = vld [vmem:[%s5982_s19 + $0x9c] sm:$0xff]  ;;  %v5689_v17 = vld [vmem:[%s5982_s19 + $0xc] sm:$0xff]  ;;  %v537_v26 = vshll.u32 %v477_v23, 16  ;;  %v541_v27 = vshrl.u32 %v477_v23, 16  ;;  %3436 = vmatpush.bf16.msra.mxu2 %v3427_v30  ;;  %3082 = vmatpush.bf16.msra.mxu1 %v3073_v36  ;;  %v478_v38 = vld [vmem:[%s5982_s19 + $0x8] sm:$0x1] }
  0x1f   : > { %v5702_v20 = vld [vmem:[%s5982_s19 + $0xa8] sm:$0xff]  ;;  %v5690_v21 = vld [vmem:[%s5982_s19 + $0x18] sm:$0xff]  ;;  %v476_v22 = vld [vmem:[%s5982_s19] sm:$0xf]  ;;  %4154 = vmatpush.bf16.msra.mxu3 %v4145_v31  ;;  %4648 = vmatpush.bf16.msra.mxu0 %v4639_v37  ;;  %v547_v48 = vshll.u32 %v478_v38, 16  ;;  %s5814_s28 = sshra.s32 %s4945_s27, 4  ;;  %s5815_s28 = int_to_ptr.hbm [resolvable:$true] %s5814_s28 }
  0x20   : > { %v528_v24 = vshrl.u32 %v476_v22, 16  ;;  %v531_v25 = vshll.u32 %v476_v22, 16  ;;  %v5278_v34 = vld [vmem:[%s5982_s19 + $0xc] sm:$0xf]  ;;  %v5279_v35 = vld [vmem:[%s5982_s19 + $0x10] sm:$0xf]  ;;  %vm6039_vm6 = vmor %vm524_vm2, %vm525_vm3  ;;  %p5821_p1 = scmp.lt.s32.totalorder %s5815_s28, %s7342_s3 }
  0x21   : > { %v539_v41 = vrot.slane %v537_v26, 5  ;;  %v543_v42 = vrot.slane %v541_v27, 4  ;;  %v1198_v43 = vld [vmem:[%s5982_s19 + $0x4] sm:$0xf]  ;;  %v2097_v44 = vshrl.u32 %v5278_v34, 16  ;;  %v2100_v45 = vshll.u32 %v5278_v34, 16 }
  0x22   : > { %v530_v39 = vrot.slane %v528_v24, 4  ;;  %v533_v40 = vrot.slane %v531_v25, 5  ;;  %v2106_v46 = vshll.u32 %v5279_v35, 16  ;;  %v2110_v47 = vshrl.u32 %v5279_v35, 16  ;;  %v1197_v52 = vld [vmem:[%s5982_s19] sm:$0xe] }
  0x23   : > { %v544_v50 = vor.u32 %v543_v42, %v539_v41  ;;  %v1298_v51 = vrot.slane %v1198_v43, 5  ;;  %v2099_v53 = vrot.slane %v2097_v44, 4  ;;  %v2102_v54 = vrot.slane %v2100_v45, 5  ;;  %v1199_v57 = vld [vmem:[%s5982_s19 + $0x8] sm:$0x1]  ;;  %v5695_v59 = vld [vmem:[%s5982_s19 + $0x54] sm:$0xff] }
  0x24   : > { %v534_v49 = vor.u32 %v533_v40, %v530_v39  ;;  %v2108_v55 = vrot.slane %v2106_v46, 5  ;;  %v2112_v56 = vrot.slane %v2110_v47, 4  ;;  %v5280_v58 = vld [vmem:[%s5982_s19 + $0x14] sm:$0x1]  ;;  %v5699_v60 = vld [vmem:[%s5982_s19 + $0x84] sm:$0xff]  ;;  %v549_v61 = vrot.slane %v547_v48, 5 }
  0x25   : > { %v5703_v62 = vld [vmem:[%s5982_s19 + $0xb4] sm:$0xff]  ;;  %v5691_v63 = vld [vmem:[%s5982_s19 + $0x24] sm:$0xff]  ;;  %v545_v2 = vrot.slane %v544_v50, 4  ;;  %v5132_v3 = vrot.slane %v1197_v52, 9  ;;  %v1300_v4 = vrot.slane %v1298_v51, 4  ;;  %v1301_v6 = vrot.slane %v1199_v57, 5 }
  0x26   : > { %v535_v1 = vrot.slane %v534_v49, 4  ;;  %v2103_v7 = vor.u32 %v2102_v54, %v2099_v53  ;;  %v2113_v8 = vor.u32 %v2112_v56, %v2108_v55  ;;  %v2116_v9 = vshll.u32 %v5280_v58, 16  ;;  %v479_v10 = vld [vmem:[%s5982_s19 + $0xc] sm:$0xf]  ;;  %v480_v11 = vld [vmem:[%s5982_s19 + $0x10] sm:$0xf] }
  0x27   : > { %v550_v13 = vsel %vm6039_vm6, %v545_v2, %v549_v61  ;;  %v555_v22 = vshll.u32 %v479_v10, 16  ;;  %v561_v23 = vshll.u32 %v480_v11, 16  ;;  %v565_v24 = vshrl.u32 %v480_v11, 16  ;;  %v481_v35 = vld [vmem:[%s5982_s19 + $0x14] sm:$0x1]  ;;  %v5735_v5 = vld [vmem:[%s5982_s19 + $0xcc] sm:$0xff] }
  0x28   : > { %v540_v12 = vsel %vm6039_vm6, %v535_v1, %v539_v41  ;;  %v914_v30 = vunpack.c.l.b16 %v550_v13  ;;  %v1201_v40 = vld [vmem:[%s5982_s19 + $0x10] sm:$0xf]  ;;  %v5283_v47 = vld [vmem:[%s5982_s19 + $0x20] sm:$0x1]  ;;  %v571_v48 = vshll.u32 %v481_v35, 16  ;;  %s5816_s29 = scalar_lea.hbm %s5815_s28, 256 }
  0x29   : > { %v913_v29 = vunpack.c.l.b16 %v540_v12  ;;  %v557_v37 = vrot.slane %v555_v22, 5  ;;  %v563_v38 = vrot.slane %v561_v23, 5  ;;  %v567_v39 = vrot.slane %v565_v24, 4  ;;  %v1200_v54 = vld [vmem:[%s5982_s19 + $0xc] sm:$0xe]  ;;  %p5817_p12 = scmp.ne.s32.totalorder %s5815_s28, %s5816_s29  ;;  %s5820_s6 = scalar_lea.hbm %s7342_s3, 512 }
  0x2a   : > { %v1305_v52 = vrot.slane %v1201_v40, 5  ;;  %v2140_v58 = vshll.u32 %v5283_v47, 16  ;;  %v573_v61 = vrot.slane %v571_v48, 5  ;;  %v5133_v2 = vrot.slane %v1200_v54, 9  ;;  %v1204_v40 = vld [vmem:[%s5982_s19 + $0x1c] sm:$0xf]  ;;  %p5822_p2 = scmp.lt.s32.totalorder %s5820_s6, %s5816_s29 }
  0x2b   : > { %v945_v49 = vpack.c.b16 %v914_v30, %v913_v29  ;;  %v568_v53 = vor.u32 %v567_v39, %v563_v38  ;;  %v5705_v48 = vld [vmem:[%s5982_s19 + $0x18] sm:$0xff]  ;;  %p5818_p13 = pnand %p5817_p12, %p5942_p4 }
  0x2c   : > { %5104 = vmatmul.msk.bf16.gmra.mxu1 %vm302_vm1, %v5693_v14  ;;  %5108 = vmatmul.msk.bf16.gmra.mxu2 %vm302_vm1, %v5697_v15  ;;  %v1299_v14 = vsel %vm6043_vm7, %v5132_v3, %v1298_v51  ;;  %v5281_v15 = vld [vmem:[%s5982_s19 + $0x18] sm:$0xf]  ;;  %v1307_v3 = vrot.slane %v1305_v52, 4  ;;  %p5823_p3 = por %p5822_p2, %p5821_p1 }
  0x2d   : > { %5112 = vmatmul.msk.bf16.gmra.mxu3 %vm302_vm1, %v5701_v16  ;;  %5100 = vmatmul.msk.bf16.gmra.mxu0 %vm302_vm1, %v5689_v17  ;;  %v5282_v16 = vld [vmem:[%s5982_s19 + $0x1c] sm:$0xf]  ;;  %v1302_v17 = vsel %vm6043_vm7, %v1300_v4, %v1301_v6  ;;  %v2121_v25 = vshrl.u32 %v5281_v15, 16  ;;  %v2124_v26 = vshll.u32 %v5281_v15, 16  ;;  %v1410_v31 = vunpack.c.l.b16 %v1299_v14  ;;  %v1203_v54 = vld [vmem:[%s5982_s19 + $0x18] sm:$0xe]  ;;  %p5819_p0 = pneg %p5818_p13 }
  0x2e   : > { %v2130_v27 = vshll.u32 %v5282_v16, 16  ;;  %v2134_v28 = vshrl.u32 %v5282_v16, 16  ;;  %v1411_v32 = vunpack.c.l.b16 %v1302_v17  ;;  %v569_v6 = vrot.slane %v568_v53, 4  ;;  %v5284_v16 = vld [vmem:[%s5982_s19 + $0x24] sm:$0xf] }
  0x2f   : > { %v2123_v41 = vrot.slane %v2121_v25, 4  ;;  %v2126_v42 = vrot.slane %v2124_v26, 5  ;;  %v1306_v15 = vsel %vm6043_vm7, %v5133_v2, %v1305_v52  ;;  %v5285_v17 = vld [vmem:[%s5982_s19 + $0x28] sm:$0xf]  ;;  %v484_v26 = vld [vmem:[%s5982_s19 + $0x20] sm:$0x1]  ;;  %p5824_p5 = pnand %p5823_p3, %p5819_p0 }
  0x30   : > { %v2132_v43 = vrot.slane %v2130_v27, 5  ;;  %v2136_v44 = vrot.slane %v2134_v28, 4  ;;  %v1442_v50 = vpack.c.b16 %v1411_v32, %v1410_v31  ;;  %v2145_v27 = vshrl.u32 %v5284_v16, 16  ;;  %v5287_v2 = vld [vmem:[%s5982_s19 + $0x30] sm:$0xf] }
  0x31   : > { %v2127_v56 = vor.u32 %v2126_v42, %v2123_v41  ;;  %v2148_v28 = vshll.u32 %v5284_v16, 16  ;;  %v2154_v29 = vshll.u32 %v5285_v17, 16  ;;  %v2158_v30 = vshrl.u32 %v5285_v17, 16 }
  0x32   : > { %v2137_v57 = vor.u32 %v2136_v44, %v2132_v43  ;;  %v595_v39 = vshll.u32 %v484_v26, 16  ;;  %v2147_v41 = vrot.slane %v2145_v27, 4  ;;  %v1312_v52 = vrot.slane %v1204_v40, 5 }
  0x33   : > { %v2150_v42 = vrot.slane %v2148_v28, 5  ;;  %v2160_v44 = vrot.slane %v2158_v30, 4 }
  0x3c   : > { %5105 = vmatmul.msk.bf16.gmra.mxu1 %vm302_vm1, %v5694_v18  ;;  %5109 = vmatmul.msk.bf16.gmra.mxu2 %vm302_vm1, %v5698_v19  ;;  %v2104_v18 = vrot.slane %v2103_v7, 4  ;;  %v2114_v19 = vrot.slane %v2113_v8, 4  ;;  %v2128_v7 = vrot.slane %v2127_v56, 4  ;;  %v2138_v8 = vrot.slane %v2137_v57, 4 }
  0x3d   : > { %5113 = vmatmul.msk.bf16.gmra.mxu3 %vm302_vm1, %v5702_v20  ;;  %5101 = vmatmul.msk.bf16.gmra.mxu0 %vm302_vm1, %v5690_v21  ;;  %v2118_v20 = vrot.slane %v2116_v9, 5  ;;  %v552_v21 = vshrl.u32 %v479_v10, 16  ;;  %v2142_v9 = vrot.slane %v2140_v58, 5  ;;  %v2151_v56 = vor.u32 %v2150_v42, %v2147_v41 }
  0x3e   : > { %v2109_v33 = vsel %vm6039_vm6, %v2104_v18, %v2108_v55  ;;  %v1202_v55 = vld [vmem:[%s5982_s19 + $0x14] sm:$0x1]  ;;  %v574_v18 = vsel %vm6039_vm6, %v569_v6, %v573_v61 }
  0x3f   : > { %v2119_v34 = vsel %vm6039_vm6, %v2114_v19, %v2118_v20  ;;  %v554_v36 = vrot.slane %v552_v21, 4  ;;  %v2482_v45 = vunpack.c.l.b16 %v2109_v33  ;;  %v1308_v4 = vrot.slane %v1202_v55, 5  ;;  %v1205_v55 = vld [vmem:[%s5982_s19 + $0x20] sm:$0x1] }
  0x40   : > { %v2483_v46 = vunpack.c.l.b16 %v2119_v34  ;;  %v2133_v20 = vsel %vm6039_vm6, %v2128_v7, %v2132_v43  ;;  %v2143_v21 = vsel %vm6039_vm6, %v2138_v8, %v2142_v9  ;;  %v916_v32 = vunpack.c.l.b16 %v574_v18  ;;  %v5288_v8 = vld [vmem:[%s5982_s19 + $0x34] sm:$0xf] }
  0x41   : > { %v558_v51 = vor.u32 %v557_v37, %v554_v36  ;;  %v1309_v19 = vsel %vm6043_vm7, %v1307_v3, %v1308_v4  ;;  %v1412_v33 = vunpack.c.l.b16 %v1306_v15  ;;  %v2484_v35 = vunpack.c.l.b16 %v2133_v20 }
  0x42   : > { %v1413_v34 = vunpack.c.l.b16 %v1309_v19  ;;  %v2485_v36 = vunpack.c.l.b16 %v2143_v21  ;;  %v2156_v43 = vrot.slane %v2154_v29, 5  ;;  %v2152_v4 = vrot.slane %v2151_v56, 4  ;;  %v487_v29 = vld [vmem:[%s5982_s19 + $0x2c] sm:$0x1] }
  0x43   : > { %v559_v1 = vrot.slane %v558_v51, 4  ;;  %v597_v51 = vrot.slane %v595_v39, 5  ;;  %v2178_v17 = vshll.u32 %v5288_v8, 16  ;;  %v2182_v18 = vshrl.u32 %v5288_v8, 16 }
  0x44   : > { %v1443_v47 = vpack.c.b16 %v1413_v34, %v1412_v33  ;;  %v2161_v57 = vor.u32 %v2160_v44, %v2156_v43  ;;  %v2157_v21 = vsel %vm6039_vm6, %v2152_v4, %v2156_v43  ;;  %v1207_v34 = vld [vmem:[%s5982_s19 + $0x28] sm:$0xf]  ;;  %v619_v40 = vshll.u32 %v487_v29, 16  ;;  %v5291_v4 = vld [vmem:[%s5982_s19 + $0x40] sm:$0xf] }
  0x45   : > { %v564_v14 = vsel %vm6039_vm6, %v559_v1, %v563_v38  ;;  %v1315_v1 = vrot.slane %v1205_v55, 5  ;;  %v1319_v43 = vrot.slane %v1207_v34, 5  ;;  %v1209_v29 = vld [vmem:[%s5982_s19 + $0x30] sm:$0xe] }
  0x46   : > { %v915_v31 = vunpack.c.l.b16 %v564_v14  ;;  %v2162_v6 = vrot.slane %v2161_v57, 4  ;;  %v2172_v14 = vshll.u32 %v5287_v2, 16 }
  0x47   : > { %v1321_v56 = vrot.slane %v1319_v43, 4 }
  0x4c   : > { %5106 = vmatmul.msk.bf16.gmra.mxu1 %vm302_vm1, %v5695_v59  ;;  %5110 = vmatmul.msk.bf16.gmra.mxu2 %vm302_vm1, %v5699_v60  ;;  %v5704_v59 = vld [vmem:[%s5982_s19 + $0xc] sm:$0xff]  ;;  %v2514_v60 = vpack.c.b16 %v2483_v46, %v2482_v45  ;;  %v946_v46 = vpack.c.b16 %v916_v32, %v915_v31  ;;  %v2174_v31 = vrot.slane %v2172_v14, 5  ;;  %v2486_v32 = vunpack.c.l.b16 %v2157_v21 }
  0x4d   : > { %5114 = vmatmul.msk.bf16.gmra.mxu3 %vm302_vm1, %v5703_v62  ;;  %5102 = vmatmul.msk.bf16.gmra.mxu0 %vm302_vm1, %v5691_v63  ;;  %v482_v62 = vld [vmem:[%s5982_s19 + $0x18] sm:$0xf]  ;;  %v483_v63 = vld [vmem:[%s5982_s19 + $0x1c] sm:$0xf]  ;;  %v5286_v45 = vld [vmem:[%s5982_s19 + $0x2c] sm:$0x1] }
  0x4e   : > { %v576_v10 = vshrl.u32 %v482_v62, 16  ;;  %v579_v11 = vshll.u32 %v482_v62, 16  ;;  %v585_v12 = vshll.u32 %v483_v63, 16  ;;  %v589_v13 = vshrl.u32 %v483_v63, 16 }
  0x4f   : > { %v2164_v58 = vshll.u32 %v5286_v45, 16  ;;  %v5134_v62 = vrot.slane %v1203_v54, 9  ;;  %v1314_v63 = vrot.slane %v1312_v52, 4  ;;  %v5706_v45 = vld [vmem:[%s5982_s19 + $0x24] sm:$0xff]  ;;  %v621_v54 = vrot.slane %v619_v40, 5 }
  0x50   : > { %v578_v22 = vrot.slane %v576_v10, 4  ;;  %v581_v23 = vrot.slane %v579_v11, 5  ;;  %v587_v24 = vrot.slane %v585_v12, 5  ;;  %v591_v25 = vrot.slane %v589_v13, 4  ;;  %v1211_v40 = vld [vmem:[%s5982_s19 + $0x38] sm:$0x1] }
  0x51   : > { %v2166_v7 = vrot.slane %v2164_v58, 5  ;;  %v2169_v13 = vshrl.u32 %v5287_v2, 16  ;;  %v1313_v15 = vsel %vm6043_vm7, %v5134_v62, %v1312_v52  ;;  %v1316_v16 = vsel %vm6043_vm7, %v1314_v63, %v1315_v1 }
  0x52   : > { %v582_v37 = vor.u32 %v581_v23, %v578_v22  ;;  %v592_v38 = vor.u32 %v591_v25, %v587_v24  ;;  %v1414_v27 = vunpack.c.l.b16 %v1313_v15  ;;  %v1415_v28 = vunpack.c.l.b16 %v1316_v16 }
  0x53   : > { %v2167_v22 = vsel %vm6039_vm6, %v2162_v6, %v2166_v7  ;;  %v2171_v30 = vrot.slane %v2169_v13, 4  ;;  %v2202_v16 = vshll.u32 %v5291_v4, 16 }
  0x54   : > { %v593_v53 = vrot.slane %v592_v38, 4  ;;  %v2487_v33 = vunpack.c.l.b16 %v2167_v22  ;;  %v1444_v42 = vpack.c.b16 %v1415_v28, %v1414_v27 }
  0x55   : > { %v2175_v44 = vor.u32 %v2174_v31, %v2171_v30  ;;  %v5292_v30 = vld [vmem:[%s5982_s19 + $0x44] sm:$0x1] }
  0x56   : > { %v598_v3 = vsel %vm6039_vm6, %v593_v53, %v597_v51  ;;  %v488_v51 = vld [vmem:[%s5982_s19 + $0x30] sm:$0xf] }
  0x57   : > { %v918_v20 = vunpack.c.l.b16 %v598_v3  ;;  %v2176_v58 = vrot.slane %v2175_v44, 4  ;;  %v624_v62 = vshrl.u32 %v488_v51, 16  ;;  %v627_v63 = vshll.u32 %v488_v51, 16  ;;  %v5290_v3 = vld [vmem:[%s5982_s19 + $0x3c] sm:$0xf] }
  0x58   : > { %v2193_v14 = vshrl.u32 %v5290_v3, 16  ;;  %v2196_v15 = vshll.u32 %v5290_v3, 16  ;;  %v5136_v44 = vrot.slane %v1209_v29, 9  ;;  %v1329_v51 = vrot.slane %v1211_v40, 5  ;;  %v5708_v40 = vld [vmem:[%s5982_s19 + $0x3c] sm:$0xff] }
  0x59   : > { %v629_v13 = vrot.slane %v627_v63, 5 }
  0x5a   : > { %v2195_v31 = vrot.slane %v2193_v14, 4 }
  0x5c   : > { %5116 = vmatmul.msk.bf16.vlgmr.msrb.gmra.mxu1 %vm302_vm1, %v945_v49  ;;  %5149 = vmatmul.msk.bf16.vlgmr.msrb.gmra.mxu2 %vm302_vm1, %v1442_v50  ;;  %v2515_v49 = vpack.c.b16 %v2485_v36, %v2484_v35  ;;  %v583_v50 = vrot.slane %v582_v37, 4  ;;  %v2180_v35 = vrot.slane %v2178_v17, 5  ;;  %v2184_v36 = vrot.slane %v2182_v18, 4  ;;  %v5289_v37 = vld [vmem:[%s5982_s19 + $0x38] sm:$0x1] }
  0x5d   : > { %5262 = vmatmul.msk.bf16.vlgmr.msrb.gmra.mxu3 %vm302_vm1, %v5704_v59  ;;  %5327 = vmatmul.msk.bf16.vlgmr.msrb.gmra.mxu0 %vm302_vm1, %v2514_v60  ;;  %v485_v59 = vld [vmem:[%s5982_s19 + $0x24] sm:$0xf]  ;;  %v486_v60 = vld [vmem:[%s5982_s19 + $0x28] sm:$0xf]  ;;  %v2206_v17 = vshrl.u32 %v5291_v4, 16 }
  0x5e   : > { %v588_v61 = vsel %vm6039_vm6, %v583_v50, %v587_v24  ;;  %v600_v9 = vshrl.u32 %v485_v59, 16  ;;  %v603_v10 = vshll.u32 %v485_v59, 16  ;;  %v609_v11 = vshll.u32 %v486_v60, 16  ;;  %v489_v59 = vld [vmem:[%s5982_s19 + $0x34] sm:$0xf] }
  0x5f   : > { %v613_v12 = vshrl.u32 %v486_v60, 16  ;;  %v917_v19 = vunpack.c.l.b16 %v588_v61  ;;  %v2188_v50 = vshll.u32 %v5289_v37, 16  ;;  %v633_v1 = vshll.u32 %v489_v59, 16 }
  0x60   : > { %v602_v23 = vrot.slane %v600_v9, 4  ;;  %v605_v24 = vrot.slane %v603_v10, 5  ;;  %v611_v25 = vrot.slane %v609_v11, 5  ;;  %v637_v2 = vshrl.u32 %v489_v59, 16 }
  0x61   : > { %v615_v26 = vrot.slane %v613_v12, 4  ;;  %v947_v41 = vpack.c.b16 %v918_v20, %v917_v19  ;;  %v2190_v61 = vrot.slane %v2188_v50, 5  ;;  %v2181_v10 = vsel %vm6039_vm6, %v2176_v58, %v2180_v35  ;;  %v5294_v58 = vld [vmem:[%s5982_s19 + $0x4c] sm:$0xf] }
  0x62   : > { %v606_v38 = vor.u32 %v605_v24, %v602_v23  ;;  %v626_v12 = vrot.slane %v624_v62, 4  ;;  %v635_v18 = vrot.slane %v633_v1, 5  ;;  %v639_v19 = vrot.slane %v637_v2, 4  ;;  %v490_v24 = vld [vmem:[%s5982_s19 + $0x38] sm:$0x1] }
  0x63   : > { %v616_v39 = vor.u32 %v615_v26, %v611_v25  ;;  %v2488_v26 = vunpack.c.l.b16 %v2181_v10  ;;  %v2208_v34 = vrot.slane %v2206_v17, 4  ;;  %v493_v17 = vld [vmem:[%s5982_s19 + $0x44] sm:$0x1] }
  0x64   : > { %v607_v52 = vrot.slane %v606_v38, 4  ;;  %v630_v28 = vor.u32 %v629_v13, %v626_v12 }
  0x65   : > { %v617_v53 = vrot.slane %v616_v39, 4 }
  0x66   : > { %v612_v6 = vsel %vm6039_vm6, %v607_v52, %v611_v25  ;;  %v1210_v25 = vld [vmem:[%s5982_s19 + $0x34] sm:$0xf]  ;;  %v491_v52 = vld [vmem:[%s5982_s19 + $0x3c] sm:$0xf] }
  0x67   : > { %v622_v7 = vsel %vm6039_vm6, %v617_v53, %v621_v54  ;;  %v919_v20 = vunpack.c.l.b16 %v612_v6  ;;  %v1326_v37 = vrot.slane %v1210_v25, 5  ;;  %v492_v53 = vld [vmem:[%s5982_s19 + $0x40] sm:$0xf]  ;;  %v651_v62 = vshll.u32 %v491_v52, 16 }
  0x68   : > { %v920_v21 = vunpack.c.l.b16 %v622_v7  ;;  %v657_v2 = vshll.u32 %v492_v53, 16  ;;  %v661_v3 = vshrl.u32 %v492_v53, 16  ;;  %v2226_v7 = vshll.u32 %v5294_v58, 16  ;;  %v495_v53 = vld [vmem:[%s5982_s19 + $0x4c] sm:$0xf] }
  0x69   : > { %v1328_v50 = vrot.slane %v1326_v37, 4  ;;  %v653_v14 = vrot.slane %v651_v62, 5 }
  0x6a   : > { %v948_v38 = vpack.c.b16 %v920_v21, %v919_v20  ;;  %v1213_v20 = vld [vmem:[%s5982_s19 + $0x40] sm:$0xf] }
  0x6b   : > { %v1330_v1 = vsel %vm6043_vm7, %v1328_v50, %v1329_v51 }
  0x6c   : > { %5117 = vmatmul.msk.bf16.gmra.mxu1 %vm302_vm1, %v946_v46  ;;  %5150 = vmatmul.msk.bf16.gmra.mxu2 %vm302_vm1, %v1443_v47  ;;  %v2516_v46 = vpack.c.b16 %v2487_v33, %v2486_v32  ;;  %v1206_v47 = vld [vmem:[%s5982_s19 + $0x24] sm:$0xe]  ;;  %v2198_v32 = vrot.slane %v2196_v15, 5  ;;  %v2204_v33 = vrot.slane %v2202_v16, 5  ;;  %v1419_v16 = vunpack.c.l.b16 %v1330_v1 }
  0x6d   : > { %5263 = vmatmul.msk.bf16.gmra.mxu3 %vm302_vm1, %v5705_v48  ;;  %5328 = vmatmul.msk.bf16.gmra.mxu0 %vm302_vm1, %v2515_v49  ;;  %v1208_v48 = vld [vmem:[%s5982_s19 + $0x2c] sm:$0x1]  ;;  %v2185_v49 = vor.u32 %v2184_v36, %v2180_v35  ;;  %v5135_v55 = vrot.slane %v1206_v47, 9  ;;  %v640_v35 = vor.u32 %v639_v19, %v635_v18  ;;  %v643_v36 = vshll.u32 %v490_v24, 16 }
  0x6e   : > { %v1322_v57 = vrot.slane %v1208_v48, 5  ;;  %v2209_v47 = vor.u32 %v2208_v34, %v2204_v33  ;;  %v663_v19 = vrot.slane %v661_v3, 4  ;;  %v681_v3 = vshll.u32 %v495_v53, 16 }
  0x6f   : > { %v2186_v60 = vrot.slane %v2185_v49, 4  ;;  %v1320_v8 = vsel %vm6043_vm7, %v5135_v55, %v1319_v43  ;;  %v631_v43 = vrot.slane %v630_v28, 4  ;;  %v641_v48 = vrot.slane %v640_v35, 4  ;;  %v1214_v35 = vld [vmem:[%s5982_s19 + $0x44] sm:$0x1] }
  0x70   : > { %v1323_v9 = vsel %vm6043_vm7, %v1321_v56, %v1322_v57  ;;  %v1416_v22 = vunpack.c.l.b16 %v1320_v8  ;;  %v645_v49 = vrot.slane %v643_v36, 5  ;;  %v1327_v55 = vsel %vm6043_vm7, %v5136_v44, %v1326_v37  ;;  %v5293_v57 = vld [vmem:[%s5982_s19 + $0x48] sm:$0xf] }
  0x71   : > { %v2191_v11 = vsel %vm6039_vm6, %v2186_v60, %v2190_v61  ;;  %v1417_v23 = vunpack.c.l.b16 %v1323_v9  ;;  %v636_v54 = vsel %vm6039_vm6, %v631_v43, %v635_v18  ;;  %v2210_v60 = vrot.slane %v2209_v47, 4 }
  0x72   : > { %v2489_v27 = vunpack.c.l.b16 %v2191_v11  ;;  %v648_v61 = vshrl.u32 %v491_v52, 16  ;;  %v646_v63 = vsel %vm6039_vm6, %v641_v48, %v645_v49  ;;  %v2217_v4 = vshrl.u32 %v5293_v57, 16  ;;  %v494_v52 = vld [vmem:[%s5982_s19 + $0x48] sm:$0xf] }
  0x73   : > { %v1445_v39 = vpack.c.b16 %v1417_v23, %v1416_v22  ;;  %v2220_v6 = vshll.u32 %v5293_v57, 16  ;;  %v2230_v8 = vshrl.u32 %v5294_v58, 16  ;;  %v921_v9 = vunpack.c.l.b16 %v636_v54  ;;  %v5297_v57 = vld [vmem:[%s5982_s19 + $0x58] sm:$0xf] }
  0x74   : > { %v1418_v10 = vunpack.c.l.b16 %v1327_v55  ;;  %v650_v13 = vrot.slane %v648_v61, 4  ;;  %v922_v15 = vunpack.c.l.b16 %v646_v63  ;;  %v659_v18 = vrot.slane %v657_v2, 5 }
  0x75   : > { %v2219_v21 = vrot.slane %v2217_v4, 4  ;;  %v2222_v22 = vrot.slane %v2220_v6, 5  ;;  %v2228_v23 = vrot.slane %v2226_v7, 5  ;;  %v2232_v24 = vrot.slane %v2230_v8, 4 }
  0x76   : > { %v654_v28 = vor.u32 %v653_v14, %v650_v13  ;;  %v949_v29 = vpack.c.b16 %v922_v15, %v921_v9  ;;  %v1446_v34 = vpack.c.b16 %v1419_v16, %v1418_v10  ;;  %v1336_v48 = vrot.slane %v1214_v35, 5 }
  0x77   : > { %v2223_v36 = vor.u32 %v2222_v22, %v2219_v21  ;;  %v2233_v37 = vor.u32 %v2232_v24, %v2228_v23  ;;  %v672_v61 = vshrl.u32 %v494_v52, 16  ;;  %v675_v62 = vshll.u32 %v494_v52, 16  ;;  %v5298_v24 = vld [vmem:[%s5982_s19 + $0x5c] sm:$0x1] }
  0x78   : > { %v655_v43 = vrot.slane %v654_v28, 4  ;;  %v685_v4 = vshrl.u32 %v495_v53, 16  ;;  %v2250_v9 = vshll.u32 %v5297_v57, 16  ;;  %v2254_v10 = vshrl.u32 %v5297_v57, 16 }
  0x79   : > { %v2224_v49 = vrot.slane %v2223_v36, 4  ;;  %v2234_v50 = vrot.slane %v2233_v37, 4  ;;  %v674_v16 = vrot.slane %v672_v61, 4  ;;  %v6210_v21 = vrot.slane %v681_v3, 5  ;;  %v1215_v36 = vld [vmem:[%s5982_s19 + $0x48] sm:$0xe] }
  0x7a   : > { %v660_v54 = vsel %vm6039_vm6, %v655_v43, %v659_v18  ;;  %v687_v22 = vrot.slane %v685_v4, 4  ;;  %v2256_v28 = vrot.slane %v2254_v10, 4  ;;  %v5299_v3 = vld [vmem:[%s5982_s19 + $0x60] sm:$0xf]  ;;  %v5300_v4 = vld [vmem:[%s5982_s19 + $0x64] sm:$0xf] }
  0x7b   : > { %v2229_v1 = vsel %vm6039_vm6, %v2224_v49, %v2228_v23  ;;  %v1216_v23 = vld [vmem:[%s5982_s19 + $0x4c] sm:$0xf] }
  0x7c   : > { %5118 = vmatmul.msk.bf16.gmra.mxu1 %vm302_vm1, %v947_v41  ;;  %5151 = vmatmul.msk.bf16.gmra.mxu2 %vm302_vm1, %v1444_v42  ;;  %v5707_v41 = vld [vmem:[%s5982_s19 + $0x30] sm:$0xff]  ;;  %v2517_v42 = vpack.c.b16 %v2489_v27, %v2488_v26  ;;  %v688_v35 = vor.u32 %v687_v22, %v6210_v21  ;;  %v1340_v37 = vrot.slane %v1216_v23, 5  ;;  %v2278_v22 = vshrl.u32 %v5300_v4, 16 }
  0x7d   : > { %5264 = vmatmul.msk.bf16.gmra.mxu3 %vm302_vm1, %v5706_v45  ;;  %5329 = vmatmul.msk.bf16.gmra.mxu0 %vm302_vm1, %v2516_v46  ;;  %v2212_v45 = vshll.u32 %v5292_v30, 16  ;;  %v2199_v46 = vor.u32 %v2198_v32, %v2195_v31  ;;  %v5295_v27 = vld [vmem:[%s5982_s19 + $0x50] sm:$0x1]  ;;  %v664_v30 = vor.u32 %v663_v19, %v659_v18  ;;  %v667_v31 = vshll.u32 %v493_v17, 16  ;;  %v1212_v32 = vld [vmem:[%s5982_s19 + $0x3c] sm:$0xe] }
  0x7e   : > { %v5137_v44 = vrot.slane %v1212_v32, 9  ;;  %v677_v17 = vrot.slane %v675_v62, 5  ;;  %v2492_v18 = vunpack.c.l.b16 %v2229_v1  ;;  %v689_v52 = vrot.slane %v688_v35, 4 }
  0x7f   : > { %v2214_v56 = vrot.slane %v2212_v45, 5  ;;  %v2200_v59 = vrot.slane %v2199_v46, 4  ;;  %v665_v45 = vrot.slane %v664_v30, 4  ;;  %v669_v46 = vrot.slane %v667_v31, 5 }
  0x80   : > { %v678_v31 = vor.u32 %v677_v17, %v674_v16  ;;  %v1342_v53 = vrot.slane %v1340_v37, 4 }
  0x81   : > { %v2205_v11 = vsel %vm6039_vm6, %v2200_v59, %v2204_v33  ;;  %v2215_v12 = vsel %vm6039_vm6, %v2210_v60, %v2214_v56  ;;  %v1333_v33 = vrot.slane %v1213_v20, 5  ;;  %v5296_v56 = vld [vmem:[%s5982_s19 + $0x54] sm:$0xf]  ;;  %v670_v59 = vsel %vm6039_vm6, %v665_v45, %v669_v46  ;;  %v496_v20 = vld [vmem:[%s5982_s19 + $0x50] sm:$0x1] }
  0x82   : > { %v2490_v25 = vunpack.c.l.b16 %v2205_v11  ;;  %v2491_v26 = vunpack.c.l.b16 %v2215_v12  ;;  %v2241_v7 = vshrl.u32 %v5296_v56, 16  ;;  %v2244_v8 = vshll.u32 %v5296_v56, 16  ;;  %v498_v56 = vld [vmem:[%s5982_s19 + $0x58] sm:$0xf] }
  0x83   : > { %v1335_v47 = vrot.slane %v1333_v33, 4  ;;  %v1334_v55 = vsel %vm6043_vm7, %v5137_v44, %v1333_v33  ;;  %v923_v12 = vunpack.c.l.b16 %v660_v54  ;;  %v924_v14 = vunpack.c.l.b16 %v670_v59  ;;  %v1217_v44 = vld [vmem:[%s5982_s19 + $0x50] sm:$0x1] }
  0x84   : > { %v1420_v13 = vunpack.c.l.b16 %v1334_v55  ;;  %v691_v32 = vshll.u32 %v496_v20, 16  ;;  %v679_v49 = vrot.slane %v678_v31, 4  ;;  %v1343_v54 = vrot.slane %v1217_v44, 5  ;;  %v1219_v31 = vld [vmem:[%s5982_s19 + $0x58] sm:$0xf] }
  0x85   : > { %v1337_v60 = vsel %vm6043_vm7, %v1335_v47, %v1336_v48  ;;  %v950_v30 = vpack.c.b16 %v924_v14, %v923_v12  ;;  %v497_v48 = vld [vmem:[%s5982_s19 + $0x54] sm:$0xf]  ;;  %v705_v1 = vshll.u32 %v498_v56, 16  ;;  %v2268_v20 = vshll.u32 %v5299_v3, 16 }
  0x86   : > { %v1421_v15 = vunpack.c.l.b16 %v1337_v60  ;;  %v696_v60 = vshrl.u32 %v497_v48, 16  ;;  %v699_v61 = vshll.u32 %v497_v48, 16  ;;  %v1344_v12 = vsel %vm6043_vm7, %v1342_v53, %v1343_v54  ;;  %v1220_v53 = vld [vmem:[%s5982_s19 + $0x5c] sm:$0x1] }
  0x87   : > { %v6259_v23 = vrot.slane %v705_v1, 5  ;;  %v2280_v44 = vrot.slane %v2278_v22, 4 }
  0x88   : > { %v698_v16 = vrot.slane %v696_v60, 4  ;;  %v701_v17 = vrot.slane %v699_v61, 5 }
  0x8a   : > { %v702_v35 = vor.u32 %v701_v17, %v698_v16  ;;  %v5302_v17 = vld [vmem:[%s5982_s19 + $0x6c] sm:$0xf] }
  0x8c   : > { %5119 = vmatmul.msk.bf16.gmra.mxu1 %vm302_vm1, %v948_v38  ;;  %5152 = vmatmul.msk.bf16.gmra.mxu2 %vm302_vm1, %v1445_v39  ;;  %v2236_v38 = vshll.u32 %v5295_v27, 16  ;;  %v6214_v27 = vrot.slane %v2250_v9, 5 }
  0x8d   : > { %5265 = vmatmul.msk.bf16.gmra.mxu3 %vm302_vm1, %v5707_v41  ;;  %5330 = vmatmul.msk.bf16.gmra.mxu0 %vm302_vm1, %v2517_v42  ;;  %v2518_v41 = vpack.c.b16 %v2491_v26, %v2490_v25  ;;  %v2243_v25 = vrot.slane %v2241_v7, 4  ;;  %v2246_v26 = vrot.slane %v2244_v8, 5  ;;  %v684_v8 = vsel %vm6039_vm6, %v679_v49, %v6210_v21 }
  0x8e   : > { %v2238_v51 = vrot.slane %v2236_v38, 5  ;;  %v2260_v38 = vshll.u32 %v5298_v24, 16  ;;  %v2257_v46 = vor.u32 %v2256_v28, %v6214_v27  ;;  %v2274_v21 = vshll.u32 %v5300_v4, 16 }
  0x8f   : > { %v2247_v45 = vor.u32 %v2246_v26, %v2243_v25  ;;  %v925_v25 = vunpack.c.l.b16 %v684_v8  ;;  %v1423_v28 = vunpack.c.l.b16 %v1344_v12  ;;  %v1347_v49 = vrot.slane %v1219_v31, 5  ;;  %v501_v12 = vld [vmem:[%s5982_s19 + $0x64] sm:$0xf] }
  0x90   : > { %v2239_v2 = vsel %vm6039_vm6, %v2234_v50, %v2238_v51  ;;  %v693_v50 = vrot.slane %v691_v32, 5  ;;  %v5138_v51 = vrot.slane %v1215_v36, 9  ;;  %v2262_v55 = vrot.slane %v2260_v38, 5  ;;  %v1218_v36 = vld [vmem:[%s5982_s19 + $0x54] sm:$0xe] }
  0x91   : > { %v2493_v19 = vunpack.c.l.b16 %v2239_v2  ;;  %v2248_v57 = vrot.slane %v2247_v45, 4  ;;  %v2258_v59 = vrot.slane %v2257_v46, 4  ;;  %v709_v2 = vshrl.u32 %v498_v56, 16 }
  0x92   : > { %v694_v9 = vsel %vm6039_vm6, %v689_v52, %v693_v50  ;;  %v1341_v10 = vsel %vm6043_vm7, %v5138_v51, %v1340_v37  ;;  %v5301_v37 = vld [vmem:[%s5982_s19 + $0x68] sm:$0x1]  ;;  %v1349_v8 = vrot.slane %v1347_v49, 4  ;;  %v2289_v31 = vshrl.u32 %v5302_v17, 16 }
  0x93   : > { %v2519_v43 = vpack.c.b16 %v2493_v19, %v2492_v18  ;;  %v2253_v14 = vsel %vm6039_vm6, %v2248_v57, %v6214_v27  ;;  %v2265_v19 = vshrl.u32 %v5299_v3, 16  ;;  %v711_v24 = vrot.slane %v709_v2, 4 }
  0x94   : > { %v926_v26 = vunpack.c.l.b16 %v694_v9  ;;  %v1422_v27 = vunpack.c.l.b16 %v1341_v10  ;;  %v2494_v32 = vunpack.c.l.b16 %v2253_v14  ;;  %v703_v57 = vrot.slane %v702_v35, 4  ;;  %v500_v10 = vld [vmem:[%s5982_s19 + $0x60] sm:$0xf] }
  0x95   : > { %v2267_v38 = vrot.slane %v2265_v19, 4  ;;  %v712_v46 = vor.u32 %v711_v24, %v6259_v23  ;;  %v2284_v60 = vshll.u32 %v5301_v37, 16  ;;  %v1350_v9 = vrot.slane %v1220_v53, 5  ;;  %v5303_v19 = vld [vmem:[%s5982_s19 + $0x70] sm:$0xf] }
  0x96   : > { %v951_v51 = vpack.c.b16 %v926_v26, %v925_v25  ;;  %v1448_v52 = vpack.c.b16 %v1423_v28, %v1422_v27  ;;  %v708_v14 = vsel %vm6039_vm6, %v703_v57, %v6259_v23  ;;  %v720_v22 = vshrl.u32 %v500_v10, 16  ;;  %v502_v53 = vld [vmem:[%s5982_s19 + $0x68] sm:$0x1]  ;;  %v1222_v57 = vld [vmem:[%s5982_s19 + $0x64] sm:$0xf] }
  0x97   : > { %v713_v3 = vrot.slane %v712_v46, 4  ;;  %v2286_v16 = vrot.slane %v2284_v60, 5  ;;  %v723_v24 = vshll.u32 %v500_v10, 16  ;;  %v1351_v27 = vsel %vm6043_vm7, %v1349_v8, %v1350_v9 }
  0x98   : > { %v729_v28 = vshll.u32 %v501_v12, 16  ;;  %v733_v23 = vshrl.u32 %v501_v12, 16  ;;  %v2302_v35 = vshrl.u32 %v5303_v19, 16  ;;  %v927_v37 = vunpack.c.l.b16 %v708_v14 }
  0x99   : > { %v6176_v39 = vpop.f32.mrf.mxu1  ;;  %v739_v14 = vshll.u32 %v502_v53, 16 }
  0x9a   : > { %v6179_v42 = vpop.f32.mrf.mxu0 }
  0x9c   : > { %5120 = vmatmul.msk.bf16.gmra.mxu1 %vm302_vm1, %v949_v29  ;;  %5153 = vmatmul.msk.bf16.gmra.mxu2 %vm302_vm1, %v1446_v34  ;;  %v1447_v34 = vpack.c.b16 %v1421_v15, %v1420_v13  ;;  %v2263_v15 = vsel %vm6039_vm6, %v2258_v59, %v2262_v55  ;;  %v5710_v55 = vld [vmem:[%s5982_s19 + $0x54] sm:$0xff]  ;;  %v5139_v59 = vrot.slane %v1218_v36, 9 }
  0x9d   : > { %5266 = vmatmul.msk.bf16.gmra.mxu3 %vm302_vm1, %v5708_v40  ;;  %5331 = vmatmul.msk.bf16.gmra.mxu0 %vm302_vm1, %v2518_v41  ;;  %v5709_v41 = vld [vmem:[%s5982_s19 + $0x48] sm:$0xff] }
  0x9f   : > { %v6193_v58 = vpop.f32.mrf.mxu2 }
  0xa0   : > { %v6199_v63 = vpop.f32.mrf.mxu3 }
  0xa1   : > { %v6205_v6 = vpop.f32.mrf.mxu1 }
  0xa2   : > { %v6207_v11 = vpop.f32.mrf.mxu0 }
  0xa7   : > { %v6216_v29 = vpop.f32.mrf.mxu2 }
  0xa8   : > { %v6218_v33 = vpop.f32.mrf.mxu3 }
  0xa9   : > { %7349 = vst [vmem:[#allocation6_spill] sm:$0xff] %v6218_v33  ;;  %v6222_v40 = vpop.f32.mrf.mxu1 }
  0xaa   : > { %v6227_v47 = vpop.f32.mrf.mxu0 }
  0xac   : > { %5121 = vmatmul.msk.bf16.gmra.mxu1 %vm302_vm1, %v950_v30  ;;  %5154 = vmatmul.msk.bf16.gmra.mxu2 %vm302_vm1, %v1447_v34  ;;  %v499_v30 = vld [vmem:[%s5982_s19 + $0x5c] sm:$0x1]  ;;  %v2495_v34 = vunpack.c.l.b16 %v2263_v15  ;;  %v1348_v15 = vsel %vm6043_vm7, %v5139_v59, %v1347_v49  ;;  %v725_v49 = vrot.slane %v723_v24, 5  ;;  %v2291_v59 = vrot.slane %v2289_v31, 4 }
  0xad   : > { %5267 = vmatmul.msk.bf16.gmra.mxu3 %vm302_vm1, %v5709_v41  ;;  %5332 = vmatmul.msk.bf16.gmra.mxu0 %vm302_vm1, %v2519_v43  ;;  %v2270_v41 = vrot.slane %v2268_v20, 5  ;;  %v6265_v43 = vrot.slane %v2274_v21, 5  ;;  %v715_v48 = vshll.u32 %v499_v30, 16 }
  0xae   : > { %v2520_v56 = vpack.c.b16 %v2495_v34, %v2494_v32  ;;  %v2292_v32 = vshll.u32 %v5302_v17, 16  ;;  %v2298_v34 = vshll.u32 %v5303_v19, 16  ;;  %v1221_v19 = vld [vmem:[%s5982_s19 + $0x60] sm:$0xe] }
  0xaf   : > { %v6235_v62 = vpop.f32.mrf.mxu2  ;;  %v2271_v1 = vor.u32 %v2270_v41, %v2267_v38  ;;  %v2281_v2 = vor.u32 %v2280_v44, %v6265_v43  ;;  %v717_v4 = vrot.slane %v715_v48, 5  ;;  %v1424_v38 = vunpack.c.l.b16 %v1348_v15 }
  0xb0   : > { %v6239_v7 = vpop.f32.mrf.mxu3  ;;  %v722_v48 = vrot.slane %v720_v22, 4  ;;  %v2294_v60 = vrot.slane %v2292_v32, 5  ;;  %v1354_v15 = vrot.slane %v1222_v57, 5  ;;  %v5306_v57 = vld [vmem:[%s5982_s19 + $0x7c] sm:$0xf] }
  0xb1   : > { %7350 = vst [vmem:[#allocation7_spill] sm:$0xff] %v6239_v7  ;;  %v6250_v13 = vpop.f32.mrf.mxu1  ;;  %v2272_v20 = vrot.slane %v2271_v1, 4  ;;  %v2282_v21 = vrot.slane %v2281_v2, 4  ;;  %v718_v26 = vsel %vm6039_vm6, %v713_v3, %v717_v4  ;;  %v6313_v1 = vrot.slane %v2298_v34, 5  ;;  %v5304_v4 = vld [vmem:[%s5982_s19 + $0x74] sm:$0x1] }
  0xb2   : > { %v6257_v18 = vpop.f32.mrf.mxu0  ;;  %v2304_v2 = vrot.slane %v2302_v35, 4  ;;  %v726_v8 = vor.u32 %v725_v49, %v722_v48  ;;  %v2308_v22 = vshll.u32 %v5304_v4, 16  ;;  %v741_v34 = vrot.slane %v739_v14, 5  ;;  %v509_v7 = vld [vmem:[%s5982_s19 + $0x84] sm:$0xf] }
  0xb3   : > { %v2277_v44 = vsel %vm6039_vm6, %v2272_v20, %v6265_v43  ;;  %v2287_v46 = vsel %vm6039_vm6, %v2282_v21, %v2286_v16  ;;  %v2295_v20 = vor.u32 %v2294_v60, %v2291_v59  ;;  %v5140_v35 = vrot.slane %v1221_v19, 9 }
  0xb4   : > { %v2496_v43 = vunpack.c.l.b16 %v2277_v44  ;;  %v2497_v3 = vunpack.c.l.b16 %v2287_v46  ;;  %v2305_v21 = vor.u32 %v2304_v2, %v6313_v1  ;;  %v727_v31 = vrot.slane %v726_v8, 4 }
  0xb5   : > { %v2296_v46 = vrot.slane %v2295_v20, 4  ;;  %v2310_v49 = vrot.slane %v2308_v22, 5  ;;  %v1355_v2 = vsel %vm6043_vm7, %v5140_v35, %v1354_v15  ;;  %v2322_v19 = vshll.u32 %v5306_v57, 16 }
  0xb6   : > { %v2306_v48 = vrot.slane %v2305_v21, 4  ;;  %v2326_v20 = vshrl.u32 %v5306_v57, 16 }
  0xb7   : > { %v6267_v45 = vpop.f32.mrf.mxu2 }
  0xb8   : > { %v6270_v50 = vpop.f32.mrf.mxu3 }
  0xb9   : > { %7351 = vst [vmem:[#allocation8_spill] sm:$0xff] %v6270_v50  ;;  %v6273_v54 = vpop.f32.mrf.mxu1  ;;  %v1229_v50 = vld [vmem:[%s5982_s19 + $0x80] sm:$0x1] }
  0xba   : > { %v6276_v61 = vpop.f32.mrf.mxu0 }
  0xbc   : > { %5122 = vmatmul.msk.bf16.gmra.mxu1 %vm302_vm1, %v951_v51  ;;  %5155 = vmatmul.msk.bf16.gmra.mxu2 %vm302_vm1, %v1448_v52  ;;  %v928_v51 = vunpack.c.l.b16 %v718_v26  ;;  %v1425_v52 = vunpack.c.l.b16 %v1351_v27  ;;  %v5711_v26 = vld [vmem:[%s5982_s19 + $0x60] sm:$0xff]  ;;  %v2521_v27 = vpack.c.b16 %v2497_v3, %v2496_v43 }
  0xbd   : > { %5268 = vmatmul.msk.bf16.gmra.mxu3 %vm302_vm1, %v5710_v55  ;;  %5333 = vmatmul.msk.bf16.gmra.mxu0 %vm302_vm1, %v2520_v56  ;;  %v6310_v55 = vrot.slane %v729_v28, 5  ;;  %v735_v56 = vrot.slane %v733_v23, 4  ;;  %v1223_v28 = vld [vmem:[%s5982_s19 + $0x68] sm:$0x1] }
  0xbe   : > { %v952_v10 = vpack.c.b16 %v928_v51, %v927_v37  ;;  %v1449_v17 = vpack.c.b16 %v1425_v52, %v1424_v38  ;;  %v1356_v37 = vrot.slane %v1354_v15, 4  ;;  %v503_v38 = vld [vmem:[%s5982_s19 + $0x6c] sm:$0xf]  ;;  %v1357_v44 = vrot.slane %v1223_v28, 5  ;;  %v504_v51 = vld [vmem:[%s5982_s19 + $0x70] sm:$0xf] }
  0xbf   : > { %v6292_v25 = vpop.f32.mrf.mxu2  ;;  %v736_v12 = vor.u32 %v735_v56, %v6310_v55  ;;  %v744_v52 = vshrl.u32 %v503_v38, 16  ;;  %v747_v53 = vshll.u32 %v503_v38, 16  ;;  %v5305_v56 = vld [vmem:[%s5982_s19 + $0x78] sm:$0xf]  ;;  %v732_v60 = vsel %vm6039_vm6, %v727_v31, %v6310_v55  ;;  %v505_v38 = vld [vmem:[%s5982_s19 + $0x74] sm:$0x1] }
  0xc0   : > { %v6298_v30 = vpop.f32.mrf.mxu3  ;;  %v753_v43 = vshll.u32 %v504_v51, 16  ;;  %v757_v3 = vshrl.u32 %v504_v51, 16  ;;  %v2311_v55 = vsel %vm6039_vm6, %v2306_v48, %v2310_v49  ;;  %v2313_v15 = vshrl.u32 %v5305_v56, 16 }
  0xc1   : > { %7352 = vst [vmem:[#allocation9_spill] sm:$0xff] %v6298_v30  ;;  %v6300_v36 = vpop.f32.mrf.mxu1  ;;  %v737_v32 = vrot.slane %v736_v12, 4  ;;  %v2301_v12 = vsel %vm6039_vm6, %v2296_v46, %v6313_v1  ;;  %v746_v22 = vrot.slane %v744_v52, 4  ;;  %v1426_v28 = vunpack.c.l.b16 %v1355_v2  ;;  %v5307_v46 = vld [vmem:[%s5982_s19 + $0x80] sm:$0x1] }
  0xc2   : > { %v6302_v41 = vpop.f32.mrf.mxu0  ;;  %v6359_v31 = vrot.slane %v753_v43, 5  ;;  %v759_v1 = vrot.slane %v757_v3, 4  ;;  %v2498_v35 = vunpack.c.l.b16 %v2301_v12  ;;  %v2315_v48 = vrot.slane %v2313_v15, 4  ;;  %v5712_v15 = vld [vmem:[%s5982_s19 + $0x6c] sm:$0xff] }
  0xc3   : > { %v742_v8 = vsel %vm6039_vm6, %v737_v32, %v741_v34  ;;  %v6364_v51 = vrot.slane %v2322_v19, 5  ;;  %v2328_v52 = vrot.slane %v2326_v20, 4  ;;  %v2332_v12 = vshll.u32 %v5307_v46, 16  ;;  %v1226_v19 = vld [vmem:[%s5982_s19 + $0x74] sm:$0x1] }
  0xc4   : > { %v930_v32 = vunpack.c.l.b16 %v742_v8  ;;  %v760_v57 = vor.u32 %v759_v1, %v6359_v31  ;;  %v507_v46 = vld [vmem:[%s5982_s19 + $0x7c] sm:$0xf] }
  0xc7   : > { %v6316_v9 = vpop.f32.mrf.mxu2 }
  0xc8   : > { %v6319_v16 = vpop.f32.mrf.mxu3 }
  0xc9   : > { %7353 = vst [vmem:[#allocation10_spill] sm:$0xff] %v6319_v16  ;;  %v6323_v24 = vpop.f32.mrf.mxu1 }
  0xca   : > { %v6327_v23 = vpop.f32.mrf.mxu0 }
  0xcc   : > { %5123 = vmatmul.msk.bf16.gmra.mxu1 %vm302_vm1, %v952_v10  ;;  %5156 = vmatmul.msk.bf16.gmra.mxu2 %vm302_vm1, %v1449_v17  ;;  %v1358_v10 = vsel %vm6043_vm7, %v1356_v37, %v1357_v44  ;;  %v2316_v17 = vshll.u32 %v5305_v56, 16  ;;  %v2499_v37 = vunpack.c.l.b16 %v2311_v55  ;;  %v1225_v44 = vld [vmem:[%s5982_s19 + $0x70] sm:$0xf] }
  0xcd   : > { %5269 = vmatmul.msk.bf16.gmra.mxu3 %vm302_vm1, %v5711_v26  ;;  %5334 = vmatmul.msk.bf16.gmra.mxu0 %vm302_vm1, %v2521_v27  ;;  %v749_v26 = vrot.slane %v747_v53, 5  ;;  %v929_v27 = vunpack.c.l.b16 %v732_v60  ;;  %v1427_v34 = vunpack.c.l.b16 %v1358_v10  ;;  %v763_v60 = vshll.u32 %v505_v38, 16  ;;  %v1224_v10 = vld [vmem:[%s5982_s19 + $0x6c] sm:$0xe] }
  0xce   : > { %v2318_v49 = vrot.slane %v2316_v17, 5  ;;  %v1361_v2 = vrot.slane %v1225_v44, 5  ;;  %v2522_v17 = vpack.c.b16 %v2499_v37, %v2498_v35  ;;  %v506_v44 = vld [vmem:[%s5982_s19 + $0x78] sm:$0xf]  ;;  %v1364_v35 = vrot.slane %v1226_v19, 5 }
  0xcf   : > { %v6337_v59 = vpop.f32.mrf.mxu2  ;;  %v750_v53 = vor.u32 %v749_v26, %v746_v22  ;;  %v953_v3 = vpack.c.b16 %v930_v32, %v929_v27  ;;  %v1450_v8 = vpack.c.b16 %v1427_v34, %v1426_v28  ;;  %v2329_v22 = vor.u32 %v2328_v52, %v6364_v51 }
  0xd0   : > { %v6344_v4 = vpop.f32.mrf.mxu3  ;;  %v2319_v20 = vor.u32 %v2318_v49, %v2315_v48  ;;  %v761_v27 = vrot.slane %v760_v57, 4  ;;  %v765_v28 = vrot.slane %v763_v60, 5  ;;  %v5141_v32 = vrot.slane %v1224_v10, 9  ;;  %v5308_v48 = vld [vmem:[%s5982_s19 + $0x84] sm:$0xf] }
  0xd1   : > { %7354 = vst [vmem:[#allocation11_spill] sm:$0xff] %v6344_v4  ;;  %v6355_v14 = vpop.f32.mrf.mxu1  ;;  %v751_v38 = vrot.slane %v750_v53, 4  ;;  %v1363_v34 = vrot.slane %v1361_v2, 4  ;;  %v2334_v37 = vrot.slane %v2332_v12, 5  ;;  %v5309_v49 = vld [vmem:[%s5982_s19 + $0x88] sm:$0xf] }
  0xd2   : > { %v6357_v21 = vpop.f32.mrf.mxu0  ;;  %v2330_v52 = vrot.slane %v2329_v22, 4  ;;  %v768_v53 = vshrl.u32 %v506_v44, 16  ;;  %v771_v57 = vshll.u32 %v506_v44, 16  ;;  %v777_v10 = vshll.u32 %v507_v46, 16 }
  0xd3   : > { %v756_v60 = vsel %vm6039_vm6, %v751_v38, %v6359_v31  ;;  %v2340_v19 = vshll.u32 %v5308_v48, 16  ;;  %v2346_v12 = vshll.u32 %v5309_v49, 16  ;;  %v1365_v31 = vsel %vm6043_vm7, %v1363_v34, %v1364_v35  ;;  %v1228_v34 = vld [vmem:[%s5982_s19 + $0x7c] sm:$0xf] }
  0xd4   : > { %v2335_v44 = vsel %vm6039_vm6, %v2330_v52, %v2334_v37  ;;  %v1368_v30 = vrot.slane %v1228_v34, 5 }
  0xd5   : > { %v6405_v16 = vrot.slane %v2346_v12, 5 }
  0xd7   : > { %v6366_v56 = vpop.f32.mrf.mxu2 }
  0xd8   : > { %v6369_v43 = vpop.f32.mrf.mxu3 }
  0xd9   : > { %7355 = vst [vmem:[#allocation12_spill] sm:$0xff] %v6369_v43  ;;  %v1021_v55 = vpop.f32.mrf.mxu1  ;;  %v2350_v43 = vshrl.u32 %v5309_v49, 16  ;;  %v508_v49 = vld [vmem:[%s5982_s19 + $0x80] sm:$0x1] }
  0xda   : > { %v1133_v26 = vadd.f32 %v1021_v55, %v6179_v42  ;;  %v6376_v1 = vpop.f32.mrf.mxu0  ;;  %v2320_v42 = vrot.slane %v2319_v20, 4  ;;  %v1362_v20 = vsel %vm6043_vm7, %v5141_v32, %v1361_v2  ;;  %v6402_v2 = vrot.slane %v777_v10, 5 }
  0xdb   : > { %v1428_v52 = vunpack.c.l.b16 %v1362_v20  ;;  %v787_v10 = vshll.u32 %v508_v49, 16 }
  0xdc   : > { %5124 = vmatmul.msk.bf16.gmra.mxu1 %vm302_vm1, %v953_v3  ;;  %5157 = vmatmul.msk.bf16.gmra.mxu2 %vm302_vm1, %v1450_v8  ;;  %v781_v3 = vshrl.u32 %v507_v46, 16  ;;  %v2337_v8 = vshrl.u32 %v5308_v48, 16  ;;  %v2325_v38 = vsel %vm6039_vm6, %v2320_v42, %v6364_v51  ;;  %v773_v46 = vrot.slane %v771_v57, 5  ;;  %v5310_v57 = vld [vmem:[%s5982_s19 + $0x8c] sm:$0x1] }
  0xdd   : > { %5270 = vmatmul.msk.bf16.gmra.mxu3 %vm302_vm1, %v5712_v15  ;;  %5335 = vmatmul.msk.bf16.gmra.mxu0 %vm302_vm1, %v2522_v17  ;;  %v766_v17 = vsel %vm6039_vm6, %v761_v27, %v765_v28  ;;  %v2352_v51 = vrot.slane %v2350_v43, 4  ;;  %v931_v42 = vunpack.c.l.b16 %v756_v60  ;;  %v2356_v60 = vshll.u32 %v5310_v57, 16 }
  0xde   : > { %v783_v32 = vrot.slane %v781_v3, 4  ;;  %v2339_v35 = vrot.slane %v2337_v8, 4  ;;  %v932_v37 = vunpack.c.l.b16 %v766_v17  ;;  %v789_v49 = vrot.slane %v787_v10, 5 }
  0xdf   : > { %v1518_v55 = vpop.f32.mrf.mxu2  ;;  %v2353_v43 = vor.u32 %v2352_v51, %v6405_v16  ;;  %v1370_v51 = vrot.slane %v1368_v30, 4  ;;  %v792_v57 = vshrl.u32 %v509_v7, 16 }
  0xe0   : > { %v1630_v4 = vadd.f32 %v1518_v55, %v1133_v26  ;;  %v1872_v15 = vpop.f32.mrf.mxu3  ;;  %v770_v26 = vrot.slane %v768_v53, 4  ;;  %v2342_v55 = vrot.slane %v2340_v19, 5  ;;  %v1429_v53 = vunpack.c.l.b16 %v1365_v31 }
  0xe1   : > { %v1023_v22 = vpop.f32.mrf.mxu1  ;;  %v784_v3 = vor.u32 %v783_v32, %v6402_v2  ;;  %v954_v20 = vpack.c.b16 %v932_v37, %v931_v42  ;;  %v2354_v37 = vrot.slane %v2353_v43, 4 }
  0xe2   : > { %v1984_v48 = vadd.f32 %v1872_v15, %v1630_v4  ;;  %v1134_v27 = vadd.f32 %v1023_v22, %v6207_v11  ;;  %v2592_v28 = vpop.f32.mrf.mxu0  ;;  %v2500_v4 = vunpack.c.l.b16 %v2325_v38  ;;  %v2501_v11 = vunpack.c.l.b16 %v2335_v44  ;;  %v1227_v22 = vld [vmem:[%s5982_s19 + $0x78] sm:$0xe] }
  0xe3   : > { %v774_v15 = vor.u32 %v773_v46, %v770_v26  ;;  %v2343_v19 = vor.u32 %v2342_v55, %v2339_v35  ;;  %v1451_v31 = vpack.c.b16 %v1429_v53, %v1428_v52  ;;  %v5713_v44 = vld [vmem:[%s5982_s19 + $0x78] sm:$0xff]  ;;  %v5142_v32 = vrot.slane %v1227_v22, 9  ;;  %v510_v53 = vld [vmem:[%s5982_s19 + $0x88] sm:$0xf]  ;;  %v5312_v22 = vld [vmem:[%s5982_s19 + $0x94] sm:$0xf] }
  0xe4   : > { %v2523_v26 = vpack.c.b16 %v2501_v11, %v2500_v4  ;;  %v785_v55 = vrot.slane %v784_v3, 4  ;;  %v2358_v52 = vrot.slane %v2356_v60, 5  ;;  %v795_v4 = vshll.u32 %v509_v7, 16  ;;  %v5311_v3 = vld [vmem:[%s5982_s19 + $0x90] sm:$0xf] }
  0xe5   : > { %v775_v46 = vrot.slane %v774_v15, 4  ;;  %v2344_v42 = vrot.slane %v2343_v19, 4  ;;  %v6421_v11 = vadd.f32 %v6376_v1, %v1984_v48  ;;  %v801_v15 = vshll.u32 %v510_v53, 16 }
  0xe6   : > { %v805_v10 = vshrl.u32 %v510_v53, 16  ;;  %v790_v7 = vsel %vm6039_vm6, %v785_v55, %v789_v49  ;;  %v1369_v1 = vsel %vm6043_vm7, %v5142_v32, %v1368_v30  ;;  %v2359_v43 = vsel %vm6039_vm6, %v2354_v37, %v2358_v52  ;;  %v1231_v52 = vld [vmem:[%s5982_s19 + $0x88] sm:$0xf] }
  0xe7   : > { %v1520_v8 = vpop.f32.mrf.mxu2  ;;  %v794_v60 = vrot.slane %v792_v57, 4  ;;  %v2370_v30 = vshll.u32 %v5312_v22, 16  ;;  %v6445_v32 = vrot.slane %v801_v15, 5  ;;  %v1430_v55 = vunpack.c.l.b16 %v1369_v1 }
  0xe8   : > { %v1631_v12 = vadd.f32 %v1520_v8, %v1134_v27  ;;  %v1874_v17 = vpop.f32.mrf.mxu3  ;;  %v1371_v27 = vrot.slane %v1229_v50, 5  ;;  %v780_v50 = vsel %vm6039_vm6, %v775_v46, %v6402_v2 }
  0xe9   : > { %v1026_v38 = vpop.f32.mrf.mxu1 }
  0xea   : > { %v1985_v34 = vadd.f32 %v1874_v17, %v1631_v12  ;;  %v1135_v33 = vadd.f32 %v1026_v38, %v6227_v47  ;;  %v6415_v35 = vpop.f32.mrf.mxu0  ;;  %v1372_v48 = vsel %vm6043_vm7, %v1370_v51, %v1371_v27  ;;  %v797_v12 = vrot.slane %v795_v4, 5 }
  0xeb   : > { %v2364_v38 = vshll.u32 %v5311_v3, 16  ;;  %v1431_v51 = vunpack.c.l.b16 %v1372_v48  ;;  %v6448_v4 = vrot.slane %v2370_v30, 5 }
  0xec   : > { %5125 = vmatmul.msk.bf16.gmra.mxu1 %vm302_vm1, %v954_v20  ;;  %5158 = vmatmul.msk.bf16.gmra.mxu2 %vm302_vm1, %v1451_v31  ;;  %v6423_v47 = vadd.f32 %v2592_v28, %v1985_v34  ;;  %v2349_v28 = vsel %vm6039_vm6, %v2344_v42, %v6405_v16  ;;  %v511_v20 = vld [vmem:[%s5982_s19 + $0x8c] sm:$0x1]  ;;  %v2361_v31 = vshrl.u32 %v5311_v3, 16  ;;  %v933_v16 = vunpack.c.l.b16 %v780_v50 }
  0xed   : > { %5271 = vmatmul.msk.bf16.gmra.mxu3 %vm302_vm1, %v5713_v44  ;;  %5336 = vmatmul.msk.bf16.gmra.mxu0 %vm302_vm1, %v2523_v26  ;;  %v2374_v44 = vshrl.u32 %v5312_v22, 16  ;;  %v934_v34 = vunpack.c.l.b16 %v790_v7  ;;  %v2502_v27 = vunpack.c.l.b16 %v2349_v28  ;;  %v2503_v42 = vunpack.c.l.b16 %v2359_v43  ;;  %v5313_v22 = vld [vmem:[%s5982_s19 + $0x98] sm:$0x1] }
  0xee   : > { %v811_v37 = vshll.u32 %v511_v20, 16  ;;  %v2363_v53 = vrot.slane %v2361_v31, 4  ;;  %v2366_v57 = vrot.slane %v2364_v38, 5  ;;  %v798_v15 = vor.u32 %v797_v12, %v794_v60  ;;  %v1232_v20 = vld [vmem:[%s5982_s19 + $0x8c] sm:$0x1] }
  0xef   : > { %v1523_v8 = vpop.f32.mrf.mxu2  ;;  %v1452_v7 = vpack.c.b16 %v1431_v51, %v1430_v55  ;;  %v2524_v28 = vpack.c.b16 %v2503_v42, %v2502_v27  ;;  %v2380_v38 = vshll.u32 %v5313_v22, 16  ;;  %v1378_v51 = vrot.slane %v1232_v20, 5  ;;  %v513_v27 = vld [vmem:[%s5982_s19 + $0x94] sm:$0xf]  ;;  %v5314_v42 = vld [vmem:[%s5982_s19 + $0x9c] sm:$0xf] }
  0xf0   : > { %v1632_v2 = vadd.f32 %v1523_v8, %v1135_v33  ;;  %v1877_v19 = vpop.f32.mrf.mxu3  ;;  %v807_v33 = vrot.slane %v805_v10, 4  ;;  %v1230_v10 = vld [vmem:[%s5982_s19 + $0x84] sm:$0xe]  ;;  %v955_v8 = vpack.c.b16 %v934_v34, %v933_v16  ;;  %v2367_v60 = vor.u32 %v2366_v57, %v2363_v53  ;;  %v512_v34 = vld [vmem:[%s5982_s19 + $0x90] sm:$0xf] }
  0xf1   : > { %v1028_v17 = vpop.f32.mrf.mxu1  ;;  %v5143_v31 = vrot.slane %v1230_v10, 9  ;;  %v825_v22 = vshll.u32 %v513_v27, 16 }
  0xf2   : > { %v1986_v26 = vadd.f32 %v1877_v19, %v1632_v2  ;;  %v1136_v46 = vadd.f32 %v1028_v17, %v6257_v18  ;;  %v2597_v49 = vpop.f32.mrf.mxu0  ;;  %v2376_v18 = vrot.slane %v2374_v44, 4  ;;  %v808_v3 = vor.u32 %v807_v33, %v6445_v32  ;;  %v5714_v17 = vld [vmem:[%s5982_s19 + $0x84] sm:$0xff] }
  0xf3   : > { %v813_v2 = vrot.slane %v811_v37, 5  ;;  %v1375_v19 = vrot.slane %v1231_v52, 5  ;;  %v2368_v53 = vrot.slane %v2367_v60, 4 }
  0xf4   : > { %v2377_v12 = vor.u32 %v2376_v18, %v6448_v4  ;;  %v809_v16 = vrot.slane %v808_v3, 4  ;;  %v6465_v37 = vadd.f32 %v6415_v35, %v1986_v26  ;;  %v2382_v18 = vrot.slane %v2380_v38, 5 }
  0xf5   : > { %v1377_v55 = vrot.slane %v1375_v19, 4  ;;  %v816_v26 = vshrl.u32 %v512_v34, 16 }
  0xf6   : > { %v2378_v57 = vrot.slane %v2377_v12, 4  ;;  %v814_v35 = vsel %vm6039_vm6, %v809_v16, %v813_v2  ;;  %v2373_v2 = vsel %vm6039_vm6, %v2368_v53, %v6448_v4  ;;  %v6488_v16 = vrot.slane %v825_v22, 5  ;;  %v1233_v22 = vld [vmem:[%s5982_s19 + $0x90] sm:$0xe] }
  0xf7   : > { %v1525_v50 = vpop.f32.mrf.mxu2  ;;  %v936_v20 = vunpack.c.l.b16 %v814_v35 }
  0xf8   : > { %v1633_v1 = vadd.f32 %v1525_v50, %v1136_v46  ;;  %v1879_v48 = vpop.f32.mrf.mxu3  ;;  %v799_v46 = vrot.slane %v798_v15, 4  ;;  %v5315_v15 = vld [vmem:[%s5982_s19 + $0xa0] sm:$0xf]  ;;  %v829_v50 = vshrl.u32 %v513_v27, 16 }
  0xf9   : > { %v1031_v43 = vpop.f32.mrf.mxu1 }
  0xfa   : > { %v1987_v30 = vadd.f32 %v1879_v48, %v1633_v1  ;;  %v1137_v44 = vadd.f32 %v1031_v43, %v6276_v61  ;;  %v6457_v33 = vpop.f32.mrf.mxu0  ;;  %v1376_v61 = vsel %vm6043_vm7, %v5143_v31, %v1375_v19  ;;  %v804_v3 = vsel %vm6039_vm6, %v799_v46, %v6445_v32 }
  0xfb   : > { %v2394_v19 = vshll.u32 %v5315_v15, 16  ;;  %v2398_v43 = vshrl.u32 %v5315_v15, 16  ;;  %v935_v32 = vunpack.c.l.b16 %v804_v3  ;;  %v2383_v31 = vsel %vm6039_vm6, %v2378_v57, %v2382_v18  ;;  %v5316_v3 = vld [vmem:[%s5982_s19 + $0xa4] sm:$0x1] }
  0xfc   : > { %5126 = vmatmul.msk.bf16.gmra.mxu1 %vm302_vm1, %v955_v8  ;;  %5159 = vmatmul.msk.bf16.gmra.mxu2 %vm302_vm1, %v1452_v7  ;;  %v6467_v52 = vadd.f32 %v2597_v49, %v1987_v30  ;;  %v819_v49 = vshll.u32 %v512_v34, 16  ;;  %v2385_v8 = vshrl.u32 %v5314_v42, 16  ;;  %v2388_v7 = vshll.u32 %v5314_v42, 16  ;;  %v514_v30 = vld [vmem:[%s5982_s19 + $0x98] sm:$0x1] }
  0xfd   : > { %5272 = vmatmul.msk.bf16.gmra.mxu3 %vm302_vm1, %v5714_v17  ;;  %5337 = vmatmul.msk.bf16.gmra.mxu0 %vm302_vm1, %v2524_v28  ;;  %v1379_v28 = vsel %vm6043_vm7, %v1377_v55, %v1378_v51  ;;  %v831_v34 = vrot.slane %v829_v50, 4  ;;  %v1432_v27 = vunpack.c.l.b16 %v1376_v61  ;;  %v1234_v42 = vld [vmem:[%s5982_s19 + $0x94] sm:$0xf]  ;;  %v6491_v53 = vrot.slane %v2394_v19, 5  ;;  %v1235_v50 = vld [vmem:[%s5982_s19 + $0x98] sm:$0x1] }
  0xfe   : > { %v821_v46 = vrot.slane %v819_v49, 5  ;;  %v2387_v55 = vrot.slane %v2385_v8, 4  ;;  %v2390_v51 = vrot.slane %v2388_v7, 5  ;;  %v1433_v4 = vunpack.c.l.b16 %v1379_v28 }
  0xff   : > { %v1528_v10 = vpop.f32.mrf.mxu2  ;;  %v2400_v57 = vrot.slane %v2398_v43, 4  ;;  %v2504_v18 = vunpack.c.l.b16 %v2373_v2  ;;  %v835_v15 = vshll.u32 %v514_v30, 16  ;;  %v956_v35 = vpack.c.b16 %v936_v20, %v935_v32 }
 0x100   : > { %v1634_v1 = vadd.f32 %v1528_v10, %v1137_v44  ;;  %v1882_v48 = vpop.f32.mrf.mxu3  ;;  %v818_v44 = vrot.slane %v816_v26, 4  ;;  %v832_v10 = vor.u32 %v831_v34, %v6488_v16  ;;  %v1382_v8 = vrot.slane %v1234_v42, 5  ;;  %v515_v34 = vld [vmem:[%s5982_s19 + $0x9c] sm:$0xf] }
 0x101   : > { %v1033_v17 = vpop.f32.mrf.mxu1  ;;  %v2391_v61 = vor.u32 %v2390_v51, %v2387_v55  ;;  %v2401_v28 = vor.u32 %v2400_v57, %v6491_v53  ;;  %v2404_v19 = vshll.u32 %v5316_v3, 16 }
 0x102   : > { %v1988_v60 = vadd.f32 %v1882_v48, %v1634_v1  ;;  %v1138_v12 = vadd.f32 %v1033_v17, %v6302_v41  ;;  %v2602_v38 = vpop.f32.mrf.mxu0  ;;  %v2505_v41 = vunpack.c.l.b16 %v2383_v31  ;;  %v822_v49 = vor.u32 %v821_v46, %v818_v44  ;;  %v5715_v17 = vld [vmem:[%s5982_s19 + $0x90] sm:$0xff] }
 0x103   : > { %v1453_v48 = vpack.c.b16 %v1433_v4, %v1432_v27  ;;  %v837_v31 = vrot.slane %v835_v15, 5  ;;  %v5144_v44 = vrot.slane %v1233_v22, 9  ;;  %v1385_v46 = vrot.slane %v1235_v50, 5 }
 0x104   : > { %v2525_v2 = vpack.c.b16 %v2505_v41, %v2504_v18  ;;  %v823_v55 = vrot.slane %v822_v49, 4  ;;  %v1384_v51 = vrot.slane %v1382_v8, 4  ;;  %v2392_v27 = vrot.slane %v2391_v61, 4  ;;  %v516_v18 = vld [vmem:[%s5982_s19 + $0xa0] sm:$0xf] }
 0x105   : > { %v2402_v4 = vrot.slane %v2401_v28, 4  ;;  %v2406_v42 = vrot.slane %v2404_v19, 5  ;;  %v840_v41 = vshrl.u32 %v515_v34, 16  ;;  %v843_v15 = vshll.u32 %v515_v34, 16 }
 0x106   : > { %v1383_v3 = vsel %vm6043_vm7, %v5144_v44, %v1382_v8  ;;  %v828_v49 = vsel %vm6039_vm6, %v823_v55, %v6488_v16  ;;  %v849_v61 = vshll.u32 %v516_v18, 16 }
 0x107   : > { %v1530_v26 = vpop.f32.mrf.mxu2  ;;  %v2407_v8 = vsel %vm6039_vm6, %v2402_v4, %v2406_v42  ;;  %v842_v16 = vrot.slane %v840_v41, 4  ;;  %v1434_v44 = vunpack.c.l.b16 %v1383_v3  ;;  %v1237_v42 = vld [vmem:[%s5982_s19 + $0xa0] sm:$0xf] }
 0x108   : > { %v1635_v7 = vadd.f32 %v1530_v26, %v1138_v12  ;;  %v1884_v1 = vpop.f32.mrf.mxu3  ;;  %v833_v12 = vrot.slane %v832_v10, 4  ;;  %v5318_v10 = vld [vmem:[%s5982_s19 + $0xac] sm:$0xf]  ;;  %v6530_v34 = vrot.slane %v849_v61, 5 }
 0x109   : > { %v1036_v43 = vpop.f32.mrf.mxu1 }
 0x10a   : > { %v1989_v32 = vadd.f32 %v1884_v1, %v1635_v7  ;;  %v1139_v20 = vadd.f32 %v1036_v43, %v6327_v23  ;;  %v6500_v30 = vpop.f32.mrf.mxu0  ;;  %v6506_v23 = vadd.f32 %v6457_v33, %v1988_v60  ;;  %v838_v33 = vsel %vm6039_vm6, %v833_v12, %v837_v31 }
 0x10b   : > { %v1386_v60 = vsel %vm6043_vm7, %v1384_v51, %v1385_v46  ;;  %v853_v7 = vshrl.u32 %v516_v18, 16  ;;  %v2422_v31 = vshrl.u32 %v5318_v10, 16  ;;  %v2507_v51 = vunpack.c.l.b16 %v2407_v8  ;;  %v1236_v18 = vld [vmem:[%s5982_s19 + $0x9c] sm:$0xe] }
 0x10c   : > { %5127 = vmatmul.msk.bf16.gmra.mxu1 %vm302_vm1, %v956_v35  ;;  %5160 = vmatmul.msk.bf16.gmra.mxu2 %vm302_vm1, %v1453_v48  ;;  %v6508_v57 = vadd.f32 %v2602_v38, %v1989_v32  ;;  %v5317_v35 = vld [vmem:[%s5982_s19 + $0xa8] sm:$0xf]  ;;  %v2397_v38 = vsel %vm6039_vm6, %v2392_v27, %v6491_v53  ;;  %v845_v48 = vrot.slane %v843_v15, 5  ;;  %v937_v32 = vunpack.c.l.b16 %v828_v49  ;;  %v517_v27 = vld [vmem:[%s5982_s19 + $0xa4] sm:$0x1]  ;;  %v5716_v8 = vld [vmem:[%s5982_s19 + $0x9c] sm:$0xff] }
 0x10d   : > { %5273 = vmatmul.msk.bf16.gmra.mxu3 %vm302_vm1, %v5715_v17  ;;  %5338 = vmatmul.msk.bf16.gmra.mxu0 %vm302_vm1, %v2525_v2  ;;  %v2409_v28 = vshrl.u32 %v5317_v35, 16  ;;  %v2412_v19 = vshll.u32 %v5317_v35, 16  ;;  %v2418_v2 = vshll.u32 %v5318_v10, 16  ;;  %v1435_v46 = vunpack.c.l.b16 %v1386_v60  ;;  %v5319_v49 = vld [vmem:[%s5982_s19 + $0xb0] sm:$0x1] }
 0x10e   : > { %v855_v55 = vrot.slane %v853_v7, 4  ;;  %v2506_v12 = vunpack.c.l.b16 %v2397_v38  ;;  %v846_v4 = vor.u32 %v845_v48, %v842_v16  ;;  %v2424_v35 = vrot.slane %v2422_v31, 4 }
 0x10f   : > { %v1533_v26 = vpop.f32.mrf.mxu2  ;;  %v2411_v41 = vrot.slane %v2409_v28, 4  ;;  %v6535_v15 = vrot.slane %v2418_v2, 5  ;;  %v1454_v10 = vpack.c.b16 %v1435_v46, %v1434_v44  ;;  %v1389_v16 = vrot.slane %v1237_v42, 5  ;;  %v518_v44 = vld [vmem:[%s5982_s19 + $0xa8] sm:$0xf] }
 0x110   : > { %v1636_v22 = vadd.f32 %v1533_v26, %v1139_v20  ;;  %v1887_v50 = vpop.f32.mrf.mxu3  ;;  %v938_v20 = vunpack.c.l.b16 %v838_v33  ;;  %v856_v38 = vor.u32 %v855_v55, %v6530_v34  ;;  %v2526_v61 = vpack.c.b16 %v2507_v51, %v2506_v12  ;;  %v519_v46 = vld [vmem:[%s5982_s19 + $0xac] sm:$0xf] }
 0x111   : > { %v1038_v1 = vpop.f32.mrf.mxu1  ;;  %v847_v7 = vrot.slane %v846_v4, 4  ;;  %v2428_v31 = vshll.u32 %v5319_v49, 16  ;;  %v1391_v4 = vrot.slane %v1389_v16, 4  ;;  %v873_v49 = vshll.u32 %v519_v46, 16 }
 0x112   : > { %v1990_v43 = vadd.f32 %v1887_v50, %v1636_v22  ;;  %v1140_v17 = vadd.f32 %v1038_v1, %v6357_v21  ;;  %v2607_v53 = vpop.f32.mrf.mxu0  ;;  %v2414_v21 = vrot.slane %v2412_v19, 5  ;;  %v957_v3 = vpack.c.b16 %v938_v20, %v937_v32  ;;  %v1238_v19 = vld [vmem:[%s5982_s19 + $0xa4] sm:$0x1] }
 0x113   : > { %v859_v22 = vshll.u32 %v517_v27, 16  ;;  %v5145_v1 = vrot.slane %v1236_v18, 9  ;;  %v857_v32 = vrot.slane %v856_v38, 4  ;;  %v852_v51 = vsel %vm6039_vm6, %v847_v7, %v6530_v34  ;;  %v5320_v18 = vld [vmem:[%s5982_s19 + $0xb4] sm:$0xf] }
 0x114   : > { %v2415_v2 = vor.u32 %v2414_v21, %v2411_v41  ;;  %v6549_v55 = vadd.f32 %v6500_v30, %v1990_v43  ;;  %v1392_v42 = vrot.slane %v1238_v19, 5  ;;  %v5321_v21 = vld [vmem:[%s5982_s19 + $0xb8] sm:$0xf]  ;;  %v2433_v38 = vshrl.u32 %v5320_v18, 16 }
 0x115   : > { %v861_v20 = vrot.slane %v859_v22, 5  ;;  %v1390_v27 = vsel %vm6043_vm7, %v5145_v1, %v1389_v16  ;;  %v2436_v22 = vshll.u32 %v5320_v18, 16  ;;  %v2446_v7 = vshrl.u32 %v5321_v21, 16 }
 0x116   : > { %v2416_v30 = vrot.slane %v2415_v2, 4 }
 0x117   : > { %v1535_v26 = vpop.f32.mrf.mxu2 }
 0x118   : > { %v1637_v33 = vadd.f32 %v1535_v26, %v1140_v17  ;;  %v1889_v60 = vpop.f32.mrf.mxu3  ;;  %v2425_v17 = vor.u32 %v2424_v35, %v6535_v15  ;;  %v864_v26 = vshrl.u32 %v518_v44, 16  ;;  %v2421_v19 = vsel %vm6039_vm6, %v2416_v30, %v6535_v15 }
 0x119   : > { %v1041_v50 = vpop.f32.mrf.mxu1  ;;  %v2508_v18 = vunpack.c.l.b16 %v2421_v19  ;;  %v2448_v30 = vrot.slane %v2446_v7, 4  ;;  %v5717_v19 = vld [vmem:[%s5982_s19 + $0xa8] sm:$0xff] }
 0x11a   : > { %v1991_v48 = vadd.f32 %v1889_v60, %v1637_v33  ;;  %v6540_v28 = vpop.f32.mrf.mxu0  ;;  %v1141_v41 = vadd.f32 %v1041_v50, %v6176_v39  ;;  %v2426_v43 = vrot.slane %v2425_v17, 4  ;;  %v877_v33 = vshrl.u32 %v519_v46, 16  ;;  %v520_v17 = vld [vmem:[%s5982_s19 + $0xb0] sm:$0x1] }
 0x11b   : > { %v1393_v39 = vsel %vm6043_vm7, %v1391_v4, %v1392_v42  ;;  %v1436_v50 = vunpack.c.l.b16 %v1390_v27  ;;  %v1240_v4 = vld [vmem:[%s5982_s19 + $0xac] sm:$0xf]  ;;  %v2435_v42 = vrot.slane %v2433_v38, 4 }
 0x11c   : > { %5128 = vmatmul.msk.bf16.gmra.mxu1 %vm302_vm1, %v957_v3  ;;  %5161 = vmatmul.msk.bf16.gmra.mxu2 %vm302_vm1, %v1454_v10  ;;  %v6551_v12 = vadd.f32 %v2607_v53, %v1991_v48  ;;  %v2430_v53 = vrot.slane %v2428_v31, 5  ;;  %v867_v3 = vshll.u32 %v518_v44, 16  ;;  %v862_v10 = vsel %vm6039_vm6, %v857_v32, %v861_v20 }
 0x11d   : > { %5274 = vmatmul.msk.bf16.gmra.mxu3 %vm302_vm1, %v5716_v8  ;;  %5339 = vmatmul.msk.bf16.gmra.mxu0 %vm302_vm1, %v2526_v61  ;;  %v2442_v61 = vshll.u32 %v5321_v21, 16  ;;  %v939_v48 = vunpack.c.l.b16 %v852_v51  ;;  %v866_v31 = vrot.slane %v864_v26, 4  ;;  %v6573_v20 = vrot.slane %v873_v49, 5  ;;  %v5322_v21 = vld [vmem:[%s5982_s19 + $0xbc] sm:$0x1] }
 0x11e   : > { %v2431_v2 = vsel %vm6039_vm6, %v2426_v43, %v2430_v53  ;;  %v869_v32 = vrot.slane %v867_v3, 5  ;;  %v879_v44 = vrot.slane %v877_v33, 4  ;;  %v940_v46 = vunpack.c.l.b16 %v862_v10  ;;  %v1239_v49 = vld [vmem:[%s5982_s19 + $0xa8] sm:$0xe] }
 0x11f   : > { %v1538_v35 = vpop.f32.mrf.mxu2  ;;  %v1437_v27 = vunpack.c.l.b16 %v1393_v39  ;;  %v2438_v51 = vrot.slane %v2436_v22, 5  ;;  %v6576_v15 = vrot.slane %v2442_v61, 5  ;;  %v883_v53 = vshll.u32 %v520_v17, 16  ;;  %v1241_v22 = vld [vmem:[%s5982_s19 + $0xb0] sm:$0x1] }
 0x120   : > { %v1638_v60 = vadd.f32 %v1538_v35, %v1141_v41  ;;  %v1892_v34 = vpop.f32.mrf.mxu3  ;;  %v2509_v41 = vunpack.c.l.b16 %v2431_v2  ;;  %v870_v26 = vor.u32 %v869_v32, %v866_v31  ;;  %v880_v3 = vor.u32 %v879_v44, %v6573_v20 }
 0x121   : > { %v1043_v8 = vpop.f32.mrf.mxu1  ;;  %v1396_v33 = vrot.slane %v1240_v4, 5  ;;  %v958_v10 = vpack.c.b16 %v940_v46, %v939_v48  ;;  %v1455_v38 = vpack.c.b16 %v1437_v27, %v1436_v50  ;;  %v2439_v39 = vor.u32 %v2438_v51, %v2435_v42 }
 0x122   : > { %v1992_v1 = vadd.f32 %v1892_v34, %v1638_v60  ;;  %v2612_v16 = vpop.f32.mrf.mxu0  ;;  %v1142_v43 = vadd.f32 %v1043_v8, %v6205_v6  ;;  %v2527_v7 = vpack.c.b16 %v2509_v41, %v2508_v18  ;;  %v2449_v2 = vor.u32 %v2448_v30, %v6576_v15  ;;  %v521_v18 = vld [vmem:[%s5982_s19 + $0xb4] sm:$0xf]  ;;  %v522_v30 = vld [vmem:[%s5982_s19 + $0xb8] sm:$0xf] }
 0x123   : > { %v2452_v6 = vshll.u32 %v5322_v21, 16  ;;  %v885_v31 = vrot.slane %v883_v53, 5  ;;  %v5146_v32 = vrot.slane %v1239_v49, 9  ;;  %v871_v44 = vrot.slane %v870_v26, 4  ;;  %v5323_v53 = vld [vmem:[%s5982_s19 + $0xc0] sm:$0xf] }
 0x124   : > { %v881_v4 = vrot.slane %v880_v3, 4  ;;  %v1399_v48 = vrot.slane %v1241_v22, 5  ;;  %v2440_v50 = vrot.slane %v2439_v39, 4  ;;  %v6588_v46 = vadd.f32 %v6540_v28, %v1992_v1  ;;  %v5324_v26 = vld [vmem:[%s5982_s19 + $0xc4] sm:$0xf] }
 0x125   : > { %v2450_v42 = vrot.slane %v2449_v2, 4  ;;  %v2454_v51 = vrot.slane %v2452_v6, 5  ;;  %v1397_v1 = vsel %vm6043_vm7, %v5146_v32, %v1396_v33  ;;  %v901_v22 = vshrl.u32 %v522_v30, 16 }
 0x126   : > { %v886_v28 = vsel %vm6039_vm6, %v881_v4, %v885_v31  ;;  %v2470_v2 = vshrl.u32 %v5324_v26, 16  ;;  %v523_v4 = vld [vmem:[%s5982_s19 + $0xbc] sm:$0x1] }
 0x127   : > { %v1540_v35 = vpop.f32.mrf.mxu2 }
 0x128   : > { %v1639_v60 = vadd.f32 %v1540_v35, %v1142_v43  ;;  %v1894_v34 = vpop.f32.mrf.mxu3  ;;  %v1398_v43 = vrot.slane %v1396_v33, 4  ;;  %v876_v35 = vsel %vm6039_vm6, %v871_v44, %v6573_v20  ;;  %v2455_v20 = vsel %vm6039_vm6, %v2450_v42, %v2454_v51  ;;  %v1243_v51 = vld [vmem:[%s5982_s19 + $0xb8] sm:$0xf] }
 0x129   : > { %v1046_v61 = vpop.f32.mrf.mxu1  ;;  %v2457_v33 = vshrl.u32 %v5323_v53, 16  ;;  %v941_v6 = vunpack.c.l.b16 %v876_v35  ;;  %v2511_v44 = vunpack.c.l.b16 %v2455_v20  ;;  %v903_v42 = vrot.slane %v901_v22, 4 }
 0x12a   : > { %v1993_v8 = vadd.f32 %v1894_v34, %v1639_v60  ;;  %v2615_v17 = vpop.f32.mrf.mxu0  ;;  %v1143_v41 = vadd.f32 %v1046_v61, %v6222_v40  ;;  %v2445_v40 = vsel %vm6039_vm6, %v2440_v50, %v6576_v15  ;;  %v888_v60 = vshrl.u32 %v521_v18, 16 }
 0x12b   : > { %v891_v34 = vshll.u32 %v521_v18, 16  ;;  %v1438_v15 = vunpack.c.l.b16 %v1397_v1  ;;  %v2510_v32 = vunpack.c.l.b16 %v2445_v40  ;;  %v2459_v18 = vrot.slane %v2457_v33, 4 }
 0x12c   : > { %5129 = vmatmul.msk.bf16.gmra.mxu1 %vm302_vm1, %v958_v10  ;;  %5162 = vmatmul.msk.bf16.gmra.mxu2 %vm302_vm1, %v1455_v38  ;;  %v6590_v27 = vadd.f32 %v2612_v16, %v1993_v8  ;;  %v1400_v16 = vsel %vm6043_vm7, %v1398_v43, %v1399_v48  ;;  %v897_v38 = vshll.u32 %v522_v30, 16  ;;  %v942_v8 = vunpack.c.l.b16 %v886_v28 }
 0x12d   : > { %5275 = vmatmul.msk.bf16.gmra.mxu3 %vm302_vm1, %v5717_v19  ;;  %5340 = vmatmul.msk.bf16.gmra.mxu0 %vm302_vm1, %v2527_v7  ;;  %v2460_v19 = vshll.u32 %v5323_v53, 16  ;;  %v2466_v7 = vshll.u32 %v5324_v26, 16  ;;  %v1439_v31 = vunpack.c.l.b16 %v1400_v16  ;;  %v890_v43 = vrot.slane %v888_v60, 4  ;;  %v1242_v53 = vld [vmem:[%s5982_s19 + $0xb4] sm:$0xe] }
 0x12e   : > { %v893_v48 = vrot.slane %v891_v34, 5  ;;  %v6614_v50 = vrot.slane %v897_v38, 5  ;;  %v2472_v28 = vrot.slane %v2470_v2, 4  ;;  %v959_v16 = vpack.c.b16 %v942_v8, %v941_v6  ;;  %v5325_v26 = vld [vmem:[%s5982_s19 + $0xc8] sm:$0x1] }
 0x12f   : > { %v1543_v21 = vpop.f32.mrf.mxu2  ;;  %v6621_v35 = vrot.slane %v2466_v7, 5  ;;  %v1456_v40 = vpack.c.b16 %v1439_v31, %v1438_v15  ;;  %v2528_v60 = vpack.c.b16 %v2511_v44, %v2510_v32  ;;  %v907_v34 = vshll.u32 %v523_v4, 16  ;;  %v5537_v31 = vld [vmem:[%s5982_s19 + $0x18] sm:$0xf]  ;;  %v5538_v32 = vld [vmem:[%s5982_s19 + $0x1c] sm:$0xf] }
 0x130   : > { %v1640_v3 = vadd.f32 %v1543_v21, %v1143_v41  ;;  %v1897_v49 = vpop.f32.mrf.mxu3  ;;  %v2462_v21 = vrot.slane %v2460_v19, 5  ;;  %v894_v38 = vor.u32 %v893_v48, %v890_v43  ;;  %v5147_v22 = vrot.slane %v1242_v53, 9 }
 0x131   : > { %v1048_v10 = vpop.f32.mrf.mxu1  ;;  %v1403_v33 = vrot.slane %v1243_v51, 5  ;;  %v2473_v2 = vor.u32 %v2472_v28, %v6621_v35  ;;  %v2476_v6 = vshll.u32 %v5325_v26, 16  ;;  %v909_v8 = vrot.slane %v907_v34, 5 }
 0x132   : > { %v1994_v39 = vadd.f32 %v1897_v49, %v1640_v3  ;;  %v2617_v61 = vpop.f32.mrf.mxu0  ;;  %v1144_v30 = vadd.f32 %v1048_v10, %v6250_v13  ;;  %v904_v13 = vor.u32 %v903_v42, %v6614_v50  ;;  %v1244_v10 = vld [vmem:[%s5982_s19 + $0xbc] sm:$0x1]  ;;  %v2463_v7 = vor.u32 %v2462_v21, %v2459_v18 }
 0x133   : > { %v1406_v15 = vrot.slane %v1244_v10, 5  ;;  %v895_v4 = vrot.slane %v894_v38, 4  ;;  %v1404_v48 = vsel %vm6043_vm7, %v5147_v22, %v1403_v33  ;;  %v1405_v42 = vrot.slane %v1403_v33, 4  ;;  %v5344_v10 = vld [vmem:[%s5982_s19 + $0x10] sm:$0xf] }
 0x134   : > { %v6617_v41 = vadd.f32 %v2615_v17, %v1994_v39  ;;  %v5718_v17 = vld [vmem:[%s5982_s19 + $0xb4] sm:$0xff]  ;;  %v905_v43 = vrot.slane %v904_v13, 4  ;;  %v2464_v18 = vrot.slane %v2463_v7, 4  ;;  %v2478_v53 = vrot.slane %v2476_v6, 5 }
 0x135   : > { %v3663_v28 = vshrl.u32 %v5537_v31, 16 }
 0x136   : > { %v2469_v38 = vsel %vm6039_vm6, %v2464_v18, %v6621_v35  ;;  %v5603_v35 = vld [vmem:[%s5982_s19 + $0x1c] sm:$0xf] }
 0x137   : > { %v1545_v1 = vpop.f32.mrf.mxu2 }
 0x138   : > { %v1641_v3 = vadd.f32 %v1545_v1, %v1144_v30  ;;  %v1899_v49 = vpop.f32.mrf.mxu3  ;;  %v2474_v30 = vrot.slane %v2473_v2, 4  ;;  %v3672_v1 = vshll.u32 %v5538_v32, 16 }
 0x139   : > { %v1051_v20 = vpop.f32.mrf.mxu1 }
 0x13a   : > { %v1995_v39 = vadd.f32 %v1899_v49, %v1641_v3  ;;  %v2620_v19 = vpop.f32.mrf.mxu0  ;;  %v1145_v51 = vadd.f32 %v1051_v20, %v6273_v54  ;;  %v910_v54 = vsel %vm6039_vm6, %v905_v43, %v909_v8  ;;  %v2479_v13 = vsel %vm6039_vm6, %v2474_v30, %v2478_v53  ;;  %v5539_v8 = vld [vmem:[%s5982_s19 + $0x20] sm:$0x1] }
 0x13b   : > { %v6652_v33 = vrot.slane %v3672_v1, 5  ;;  %v944_v2 = vunpack.c.l.b16 %v910_v54  ;;  %v2864_v43 = vrot.slane %v5344_v10, 5  ;;  %v3682_v30 = vshll.u32 %v5539_v8, 16  ;;  %v5541_v8 = vld [vmem:[%s5982_s19 + $0x28] sm:$0xf] }
 0x13c   : > { %5130 = vmatmul.msk.bf16.gmra.mxu1 %vm302_vm1, %v959_v16  ;;  %5163 = vmatmul.msk.bf16.gmra.mxu2 %vm302_vm1, %v1456_v40  ;;  %v6632_v44 = vadd.f32 %v2617_v61, %v1995_v39  ;;  %v3666_v61 = vshll.u32 %v5537_v31, 16  ;;  %v3676_v16 = vshrl.u32 %v5538_v32, 16  ;;  %v900_v40 = vsel %vm6039_vm6, %v895_v4, %v6614_v50 }
 0x13d   : > { %5276 = vmatmul.msk.bf16.gmra.mxu3 %vm302_vm1, %v5718_v17  ;;  %5341 = vmatmul.msk.bf16.gmra.mxu0 %vm302_vm1, %v2528_v60  ;;  %v1407_v60 = vsel %vm6043_vm7, %v1405_v42, %v1406_v15  ;;  %v1440_v17 = vunpack.c.l.b16 %v1404_v48  ;;  %v3665_v50 = vrot.slane %v3663_v28, 4  ;;  %v943_v7 = vunpack.c.l.b16 %v900_v40  ;;  %v5343_v42 = vld [vmem:[%s5982_s19 + $0xc] sm:$0xe]  ;;  %v5602_v40 = vld [vmem:[%s5982_s19 + $0x18] sm:$0xe] }
 0x13e   : > { %v3668_v22 = vrot.slane %v3666_v61, 5  ;;  %v3678_v39 = vrot.slane %v3676_v16, 4  ;;  %v1441_v6 = vunpack.c.l.b16 %v1407_v60  ;;  %v2512_v31 = vunpack.c.l.b16 %v2469_v38  ;;  %v5345_v61 = vld [vmem:[%s5982_s19 + $0x14] sm:$0x1] }
 0x13f   : > { %v1548_v21 = vpop.f32.mrf.mxu2  ;;  %v2513_v32 = vunpack.c.l.b16 %v2479_v13  ;;  %v960_v28 = vpack.c.b16 %v944_v2, %v943_v7  ;;  %v4430_v1 = vrot.slane %v5603_v35, 5  ;;  %v5391_v60 = vrot.slane %v5343_v42, 9 }
 0x140   : > { %v1642_v26 = vadd.f32 %v1548_v21, %v1145_v51  ;;  %v1902_v3 = vpop.f32.mrf.mxu3  ;;  %v3669_v51 = vor.u32 %v3668_v22, %v3665_v50  ;;  %v3679_v18 = vor.u32 %v3678_v39, %v6652_v33  ;;  %v2867_v38 = vrot.slane %v5345_v61, 5 }
 0x141   : > { %v1053_v49 = vpop.f32.mrf.mxu1  ;;  %v3684_v50 = vrot.slane %v3682_v30, 5  ;;  %v4432_v22 = vrot.slane %v4430_v1, 4 }
 0x142   : > { %v1996_v34 = vadd.f32 %v1902_v3, %v1642_v26  ;;  %v2622_v20 = vpop.f32.mrf.mxu0  ;;  %v1146_v4 = vadd.f32 %v1053_v49, %v6300_v36  ;;  %v5719_v26 = vld [vmem:[%s5982_s19 + $0xc0] sm:$0xff]  ;;  %v2529_v3 = vpack.c.b16 %v2513_v32, %v2512_v31  ;;  %v3670_v13 = vrot.slane %v3669_v51, 4 }
 0x143   : > { %v5604_v36 = vld [vmem:[%s5982_s19 + $0x20] sm:$0x1]  ;;  %v3680_v10 = vrot.slane %v3679_v18, 4  ;;  %v2865_v32 = vsel %vm6043_vm7, %v5391_v60, %v2864_v43 }
 0x144   : > { %v6655_v15 = vadd.f32 %v2620_v19, %v1996_v34  ;;  %v1457_v19 = vpack.c.b16 %v1441_v6, %v1440_v17  ;;  %v2866_v34 = vrot.slane %v2864_v43, 4  ;;  %v5650_v17 = vrot.slane %v5602_v40, 9  ;;  %v5540_v6 = vld [vmem:[%s5982_s19 + $0x24] sm:$0xf] }
 0x145   : > { %v4433_v39 = vrot.slane %v5604_v36, 5  ;;  %v3685_v42 = vsel %vm6039_vm6, %v3680_v10, %v3684_v50  ;;  %v3687_v18 = vshrl.u32 %v5540_v6, 16  ;;  %v3690_v30 = vshll.u32 %v5540_v6, 16  ;;  %v5347_v36 = vld [vmem:[%s5982_s19 + $0x1c] sm:$0xf] }
 0x146   : > { %v2868_v35 = vsel %vm6043_vm7, %v2866_v34, %v2867_v38  ;;  %v5542_v10 = vld [vmem:[%s5982_s19 + $0x2c] sm:$0x1] }
 0x147   : > { %v1550_v48 = vpop.f32.mrf.mxu2  ;;  %v4434_v51 = vsel %vm6043_vm7, %v4432_v22, %v4433_v39  ;;  %v2977_v61 = vunpack.c.l.b16 %v2868_v35  ;;  %v3692_v60 = vrot.slane %v3690_v30, 5  ;;  %v5346_v35 = vld [vmem:[%s5982_s19 + $0x18] sm:$0xe] }
 0x148   : > { %v1643_v53 = vadd.f32 %v1550_v48, %v1146_v4  ;;  %v1904_v21 = vpop.f32.mrf.mxu3  ;;  %v5392_v30 = vrot.slane %v5346_v35, 9 }
 0x149   : > { %v1056_v16 = vpop.f32.mrf.mxu1 }
 0x14a   : > { %v1997_v49 = vadd.f32 %v1904_v21, %v1643_v53  ;;  %v2625_v54 = vpop.f32.mrf.mxu0  ;;  %v1147_v2 = vadd.f32 %v1056_v16, %v6323_v24  ;;  %v4431_v24 = vsel %vm6043_vm7, %v5650_v17, %v4430_v1  ;;  %v3696_v53 = vshll.u32 %v5541_v8, 16  ;;  %v5606_v17 = vld [vmem:[%s5982_s19 + $0x28] sm:$0xf] }
 0x14b   : > { %v3700_v21 = vshrl.u32 %v5541_v8, 16  ;;  %v4543_v1 = vunpack.c.l.b16 %v4434_v51  ;;  %v2871_v8 = vrot.slane %v5347_v36, 5  ;;  %v4437_v51 = vrot.slane %v5606_v17, 5 }
 0x14c   : > { %5131 = vmatmul.msk.bf16.gmra.mxu1 %vm302_vm1, %v960_v28  ;;  %5164 = vmatmul.msk.bf16.gmra.mxu2 %vm302_vm1, %v1457_v19  ;;  %v6667_v7 = vadd.f32 %v2622_v20, %v1997_v49  ;;  %v3675_v20 = vsel %vm6039_vm6, %v3670_v13, %v6652_v33  ;;  %v2976_v19 = vunpack.c.l.b16 %v2865_v32  ;;  %v3689_v49 = vrot.slane %v3687_v18, 4  ;;  %v5607_v18 = vld [vmem:[%s5982_s19 + $0x2c] sm:$0x1] }
 0x14d   : > { %5277 = vmatmul.msk.bf16.gmra.mxu3 %vm302_vm1, %v5719_v26  ;;  %5342 = vmatmul.msk.bf16.gmra.mxu0 %vm302_vm1, %v2529_v3  ;;  %v4048_v16 = vunpack.c.l.b16 %v3675_v20  ;;  %v4049_v26 = vunpack.c.l.b16 %v3685_v42  ;;  %v4542_v3 = vunpack.c.l.b16 %v4431_v24  ;;  %v6690_v34 = vrot.slane %v3696_v53, 5  ;;  %v5348_v24 = vld [vmem:[%s5982_s19 + $0x20] sm:$0x1] }
 0x14e   : > { %v3702_v38 = vrot.slane %v3700_v21, 4  ;;  %v3693_v20 = vor.u32 %v3692_v60, %v3689_v49  ;;  %v2873_v53 = vrot.slane %v2871_v8, 4  ;;  %v5543_v21 = vld [vmem:[%s5982_s19 + $0x30] sm:$0xf]  ;;  %v4439_v49 = vrot.slane %v4437_v51, 4 }
 0x14f   : > { %v1553_v31 = vpop.f32.mrf.mxu2  ;;  %v4080_v6 = vpack.c.b16 %v4049_v26, %v4048_v16  ;;  %v4574_v32 = vpack.c.b16 %v4543_v1, %v4542_v3  ;;  %v4440_v60 = vrot.slane %v5607_v18, 5  ;;  %v5545_v18 = vld [vmem:[%s5982_s19 + $0x38] sm:$0x1] }
 0x150   : > { %v1644_v4 = vadd.f32 %v1553_v31, %v1147_v2  ;;  %v1907_v48 = vpop.f32.mrf.mxu3  ;;  %v3008_v2 = vpack.c.b16 %v2977_v61, %v2976_v19  ;;  %v2874_v61 = vrot.slane %v5348_v24, 5  ;;  %v3694_v16 = vrot.slane %v3693_v20, 4 }
 0x151   : > { %v1058_v43 = vpop.f32.mrf.mxu1  ;;  %v4441_v20 = vsel %vm6043_vm7, %v4439_v49, %v4440_v60  ;;  %v3730_v60 = vshll.u32 %v5545_v18, 16 }
 0x152   : > { %v1998_v28 = vadd.f32 %v1907_v48, %v1644_v4  ;;  %v2627_v33 = vpop.f32.mrf.mxu0  ;;  %v1148_v13 = vadd.f32 %v1058_v43, %v6355_v14  ;;  %v3703_v14 = vor.u32 %v3702_v38, %v6690_v34  ;;  %v3706_v4 = vshll.u32 %v5542_v10, 16  ;;  %v5605_v43 = vld [vmem:[%s5982_s19 + $0x24] sm:$0xe] }
 0x153   : > { %v5651_v36 = vrot.slane %v5605_v43, 9  ;;  %v3714_v10 = vshll.u32 %v5543_v21, 16 }
 0x154   : > { %v6687_v40 = vadd.f32 %v2625_v54, %v1998_v28  ;;  %v5720_v54 = vld [vmem:[%s5982_s19 + $0x18] sm:$0xff]  ;;  %v5544_v28 = vld [vmem:[%s5982_s19 + $0x34] sm:$0xf]  ;;  %v3704_v26 = vrot.slane %v3703_v14, 4  ;;  %v3708_v3 = vrot.slane %v3706_v4, 5 }
 0x155   : > { %v4438_v35 = vsel %vm6043_vm7, %v5651_v36, %v4437_v51  ;;  %v3716_v4 = vrot.slane %v3714_v10, 5  ;;  %v5721_v10 = vld [vmem:[%s5982_s19 + $0x24] sm:$0xff] }
 0x156   : > { %v4544_v51 = vunpack.c.l.b16 %v4438_v35 }
 0x157   : > { %v1555_v50 = vpop.f32.mrf.mxu2 }
 0x158   : > { %v1645_v22 = vadd.f32 %v1555_v50, %v1148_v13  ;;  %v1909_v39 = vpop.f32.mrf.mxu3  ;;  %v3711_v13 = vshrl.u32 %v5543_v21, 16  ;;  %v3720_v50 = vshll.u32 %v5544_v28, 16 }
 0x159   : > { %v1061_v31 = vpop.f32.mrf.mxu1 }
 0x15a   : > { %v1999_v48 = vadd.f32 %v1909_v39, %v1645_v22  ;;  %v2630_v42 = vpop.f32.mrf.mxu0  ;;  %v1149_v1 = vadd.f32 %v1061_v31, %v6193_v58  ;;  %v3699_v58 = vsel %vm6039_vm6, %v3694_v16, %v6690_v34  ;;  %v3713_v14 = vrot.slane %v3711_v13, 4 }
 0x15c   : > { %5408 = vmatmul.msk.bf16.vlgmr.msra.gmra.mxu1 %vm302_vm1, %v3008_v2  ;;  %5521 = vmatmul.msk.bf16.vlgmr.msra.gmra.mxu2 %vm302_vm1, %v5720_v54  ;;  %v6705_v19 = vadd.f32 %v2627_v33, %v1999_v48  ;;  %v3724_v33 = vshrl.u32 %v5544_v28, 16  ;;  %v2872_v2 = vsel %vm6043_vm7, %v5392_v30, %v2871_v8  ;;  %v2875_v54 = vsel %vm6043_vm7, %v2873_v53, %v2874_v61  ;;  %v5350_v8 = vld [vmem:[%s5982_s19 + $0x28] sm:$0xf]  ;;  %v5609_v61 = vld [vmem:[%s5982_s19 + $0x34] sm:$0xf] }
 0x15d   : > { %5586 = vmatmul.msk.bf16.vlgmr.msra.gmra.mxu3 %vm302_vm1, %v4080_v6  ;;  %5667 = vmatmul.msk.bf16.vlgmr.msra.gmra.mxu0 %vm302_vm1, %v4574_v32  ;;  %v3709_v32 = vsel %vm6039_vm6, %v3704_v26, %v3708_v3  ;;  %v6724_v48 = vrot.slane %v3720_v50, 5  ;;  %v2978_v34 = vunpack.c.l.b16 %v2872_v2  ;;  %v2979_v43 = vunpack.c.l.b16 %v2875_v54  ;;  %v5351_v50 = vld [vmem:[%s5982_s19 + $0x2c] sm:$0x1]  ;;  %v5608_v54 = vld [vmem:[%s5982_s19 + $0x30] sm:$0xe] }
 0x15e   : > { %v3726_v24 = vrot.slane %v3724_v33, 4  ;;  %v4050_v53 = vunpack.c.l.b16 %v3699_v58  ;;  %v4051_v21 = vunpack.c.l.b16 %v3709_v32  ;;  %v4545_v28 = vunpack.c.l.b16 %v4441_v20 }
 0x15f   : > { %v1558_v38 = vpop.f32.mrf.mxu2  ;;  %v2878_v26 = vrot.slane %v5350_v8, 5  ;;  %v3717_v36 = vor.u32 %v3716_v4, %v3713_v14  ;;  %v3009_v13 = vpack.c.b16 %v2979_v43, %v2978_v34  ;;  %v4444_v33 = vrot.slane %v5609_v61, 5 }
 0x160   : > { %v1646_v17 = vadd.f32 %v1558_v38, %v1149_v1  ;;  %v1912_v22 = vpop.f32.mrf.mxu3  ;;  %v5349_v1 = vld [vmem:[%s5982_s19 + $0x24] sm:$0xe]  ;;  %v3727_v49 = vor.u32 %v3726_v24, %v6724_v48  ;;  %v4575_v2 = vpack.c.b16 %v4545_v28, %v4544_v51  ;;  %v2881_v35 = vrot.slane %v5351_v50, 5 }
 0x161   : > { %v1063_v39 = vpop.f32.mrf.mxu1  ;;  %v2880_v32 = vrot.slane %v2878_v26, 4  ;;  %v3718_v20 = vrot.slane %v3717_v36, 4  ;;  %v3732_v14 = vrot.slane %v3730_v60, 5  ;;  %v5652_v4 = vrot.slane %v5608_v54, 9 }
 0x162   : > { %v2000_v6 = vadd.f32 %v1912_v22, %v1646_v17  ;;  %v2632_v31 = vpop.f32.mrf.mxu0  ;;  %v1150_v16 = vadd.f32 %v1063_v39, %v6216_v29  ;;  %v4081_v22 = vpack.c.b16 %v4051_v21, %v4050_v53  ;;  %v5610_v29 = vld [vmem:[%s5982_s19 + $0x38] sm:$0x1]  ;;  %v3728_v8 = vrot.slane %v3727_v49, 4  ;;  %v5546_v53 = vld [vmem:[%s5982_s19 + $0x3c] sm:$0xf] }
 0x163   : > { %v4446_v24 = vrot.slane %v4444_v33, 4  ;;  %v4447_v34 = vrot.slane %v5610_v29, 5  ;;  %v5547_v21 = vld [vmem:[%s5982_s19 + $0x40] sm:$0xf]  ;;  %v2882_v61 = vsel %vm6043_vm7, %v2880_v32, %v2881_v35  ;;  %v3735_v49 = vshrl.u32 %v5546_v53, 16 }
 0x164   : > { %v6727_v30 = vadd.f32 %v2630_v42, %v2000_v6  ;;  %v5393_v6 = vrot.slane %v5349_v1, 9  ;;  %v3733_v1 = vsel %vm6039_vm6, %v3728_v8, %v3732_v14  ;;  %v3738_v60 = vshll.u32 %v5546_v53, 16  ;;  %v5353_v29 = vld [vmem:[%s5982_s19 + $0x34] sm:$0xf]  ;;  %v5548_v8 = vld [vmem:[%s5982_s19 + $0x44] sm:$0x1] }
 0x165   : > { %v4448_v36 = vsel %vm6043_vm7, %v4446_v24, %v4447_v34  ;;  %v2981_v50 = vunpack.c.l.b16 %v2882_v61  ;;  %v5352_v61 = vld [vmem:[%s5982_s19 + $0x30] sm:$0xe] }
 0x166   : > { %v2879_v28 = vsel %vm6043_vm7, %v5393_v6, %v2878_v26  ;;  %v3740_v6 = vrot.slane %v3738_v60, 5  ;;  %v5394_v60 = vrot.slane %v5352_v61, 9 }
 0x167   : > { %v1560_v3 = vpop.f32.mrf.mxu2 }
 0x168   : > { %v1647_v42 = vadd.f32 %v1560_v3, %v1150_v16  ;;  %v1914_v38 = vpop.f32.mrf.mxu3 }
 0x169   : > { %v1066_v17 = vpop.f32.mrf.mxu1 }
 0x16a   : > { %v2001_v39 = vadd.f32 %v1914_v38, %v1647_v42  ;;  %v2635_v58 = vpop.f32.mrf.mxu0  ;;  %v1151_v18 = vadd.f32 %v1066_v17, %v6235_v62  ;;  %v4445_v62 = vsel %vm6043_vm7, %v5652_v4, %v4444_v33  ;;  %v3744_v42 = vshll.u32 %v5547_v21, 16  ;;  %v5612_v4 = vld [vmem:[%s5982_s19 + $0x40] sm:$0xf] }
 0x16b   : > { %v3748_v38 = vshrl.u32 %v5547_v21, 16  ;;  %v4547_v33 = vunpack.c.l.b16 %v4448_v36  ;;  %v2885_v21 = vrot.slane %v5353_v29, 5  ;;  %v4451_v36 = vrot.slane %v5612_v4, 5 }
 0x16c   : > { %5409 = vmatmul.msk.bf16.gmra.mxu1 %vm302_vm1, %v3009_v13  ;;  %5522 = vmatmul.msk.bf16.gmra.mxu2 %vm302_vm1, %v5721_v10  ;;  %v6739_v43 = vadd.f32 %v2632_v31, %v2001_v39  ;;  %v3723_v31 = vsel %vm6039_vm6, %v3718_v20, %v6724_v48  ;;  %v2980_v10 = vunpack.c.l.b16 %v2879_v28  ;;  %v3737_v39 = vrot.slane %v3735_v49, 4  ;;  %v5613_v49 = vld [vmem:[%s5982_s19 + $0x44] sm:$0x1] }
 0x16d   : > { %5587 = vmatmul.msk.bf16.gmra.mxu3 %vm302_vm1, %v4081_v22  ;;  %5668 = vmatmul.msk.bf16.gmra.mxu0 %vm302_vm1, %v4575_v2  ;;  %v4052_v17 = vunpack.c.l.b16 %v3723_v31  ;;  %v4053_v22 = vunpack.c.l.b16 %v3733_v1  ;;  %v4546_v2 = vunpack.c.l.b16 %v4445_v62  ;;  %v6762_v32 = vrot.slane %v3744_v42, 5  ;;  %v5354_v62 = vld [vmem:[%s5982_s19 + $0x38] sm:$0x1] }
 0x16e   : > { %v3750_v35 = vrot.slane %v3748_v38, 4  ;;  %v3741_v31 = vor.u32 %v3740_v6, %v3737_v39  ;;  %v2887_v42 = vrot.slane %v2885_v21, 4  ;;  %v5549_v38 = vld [vmem:[%s5982_s19 + $0x48] sm:$0xf]  ;;  %v4453_v39 = vrot.slane %v4451_v36, 4 }
 0x16f   : > { %v1563_v51 = vpop.f32.mrf.mxu2  ;;  %v4082_v53 = vpack.c.b16 %v4053_v22, %v4052_v17  ;;  %v4576_v28 = vpack.c.b16 %v4547_v33, %v4546_v2  ;;  %v4454_v6 = vrot.slane %v5613_v49, 5  ;;  %v5551_v49 = vld [vmem:[%s5982_s19 + $0x50] sm:$0x1] }
 0x170   : > { %v1648_v16 = vadd.f32 %v1563_v51, %v1151_v18  ;;  %v1917_v3 = vpop.f32.mrf.mxu3  ;;  %v3010_v18 = vpack.c.b16 %v2981_v50, %v2980_v10  ;;  %v2888_v50 = vrot.slane %v5354_v62, 5  ;;  %v3742_v17 = vrot.slane %v3741_v31, 4 }
 0x171   : > { %v1068_v26 = vpop.f32.mrf.mxu1  ;;  %v4455_v31 = vsel %vm6043_vm7, %v4453_v39, %v4454_v6  ;;  %v3778_v6 = vshll.u32 %v5551_v49, 16 }
 0x172   : > { %v2002_v13 = vadd.f32 %v1917_v3, %v1648_v16  ;;  %v2637_v48 = vpop.f32.mrf.mxu0  ;;  %v1152_v20 = vadd.f32 %v1068_v26, %v6267_v45  ;;  %v3751_v45 = vor.u32 %v3750_v35, %v6762_v32  ;;  %v3754_v16 = vshll.u32 %v5548_v8, 16  ;;  %v5611_v26 = vld [vmem:[%s5982_s19 + $0x3c] sm:$0xe] }
 0x173   : > { %v5653_v29 = vrot.slane %v5611_v26, 9  ;;  %v3762_v8 = vshll.u32 %v5549_v38, 16 }
 0x174   : > { %v6759_v54 = vadd.f32 %v2635_v58, %v2002_v13  ;;  %v5722_v58 = vld [vmem:[%s5982_s19 + $0x30] sm:$0xff]  ;;  %v5550_v13 = vld [vmem:[%s5982_s19 + $0x4c] sm:$0xf]  ;;  %v3752_v22 = vrot.slane %v3751_v45, 4  ;;  %v3756_v2 = vrot.slane %v3754_v16, 5 }
 0x175   : > { %v4452_v61 = vsel %vm6043_vm7, %v5653_v29, %v4451_v36  ;;  %v3764_v16 = vrot.slane %v3762_v8, 5  ;;  %v5723_v8 = vld [vmem:[%s5982_s19 + $0x3c] sm:$0xff] }
 0x176   : > { %v4548_v36 = vunpack.c.l.b16 %v4452_v61 }
 0x177   : > { %v1565_v14 = vpop.f32.mrf.mxu2 }
 0x178   : > { %v1649_v24 = vadd.f32 %v1565_v14, %v1152_v20  ;;  %v1919_v34 = vpop.f32.mrf.mxu3  ;;  %v3759_v20 = vshrl.u32 %v5549_v38, 16  ;;  %v3768_v14 = vshll.u32 %v5550_v13, 16 }
 0x179   : > { %v1071_v51 = vpop.f32.mrf.mxu1 }
 0x17a   : > { %v2003_v3 = vadd.f32 %v1919_v34, %v1649_v24  ;;  %v2640_v1 = vpop.f32.mrf.mxu0  ;;  %v1153_v33 = vadd.f32 %v1071_v51, %v6292_v25  ;;  %v3747_v25 = vsel %vm6039_vm6, %v3742_v17, %v6762_v32  ;;  %v3761_v45 = vrot.slane %v3759_v20, 4 }
 0x17c   : > { %5410 = vmatmul.msk.bf16.gmra.mxu1 %vm302_vm1, %v3010_v18  ;;  %5523 = vmatmul.msk.bf16.gmra.mxu2 %vm302_vm1, %v5722_v58  ;;  %v6777_v10 = vadd.f32 %v2637_v48, %v2003_v3  ;;  %v3772_v48 = vshrl.u32 %v5550_v13, 16  ;;  %v2886_v18 = vsel %vm6043_vm7, %v5394_v60, %v2885_v21  ;;  %v2889_v58 = vsel %vm6043_vm7, %v2887_v42, %v2888_v50  ;;  %v5356_v21 = vld [vmem:[%s5982_s19 + $0x40] sm:$0xf]  ;;  %v5615_v50 = vld [vmem:[%s5982_s19 + $0x4c] sm:$0xf] }
 0x17d   : > { %5588 = vmatmul.msk.bf16.gmra.mxu3 %vm302_vm1, %v4082_v53  ;;  %5669 = vmatmul.msk.bf16.gmra.mxu0 %vm302_vm1, %v4576_v28  ;;  %v3757_v28 = vsel %vm6039_vm6, %v3752_v22, %v3756_v2  ;;  %v6796_v3 = vrot.slane %v3768_v14, 5  ;;  %v2982_v32 = vunpack.c.l.b16 %v2886_v18  ;;  %v2983_v26 = vunpack.c.l.b16 %v2889_v58  ;;  %v5357_v14 = vld [vmem:[%s5982_s19 + $0x44] sm:$0x1]  ;;  %v5614_v58 = vld [vmem:[%s5982_s19 + $0x48] sm:$0xe] }
 0x17e   : > { %v3774_v62 = vrot.slane %v3772_v48, 4  ;;  %v4054_v42 = vunpack.c.l.b16 %v3747_v25  ;;  %v4055_v38 = vunpack.c.l.b16 %v3757_v28  ;;  %v4549_v13 = vunpack.c.l.b16 %v4455_v31 }
 0x17f   : > { %v1568_v35 = vpop.f32.mrf.mxu2  ;;  %v2892_v22 = vrot.slane %v5356_v21, 5  ;;  %v3765_v29 = vor.u32 %v3764_v16, %v3761_v45  ;;  %v3011_v20 = vpack.c.b16 %v2983_v26, %v2982_v32  ;;  %v4458_v48 = vrot.slane %v5615_v50, 5 }
 0x180   : > { %v1650_v4 = vadd.f32 %v1568_v35, %v1153_v33  ;;  %v1922_v24 = vpop.f32.mrf.mxu3  ;;  %v5355_v33 = vld [vmem:[%s5982_s19 + $0x3c] sm:$0xe]  ;;  %v3775_v39 = vor.u32 %v3774_v62, %v6796_v3  ;;  %v4577_v18 = vpack.c.b16 %v4549_v13, %v4548_v36  ;;  %v2895_v61 = vrot.slane %v5357_v14, 5 }
 0x181   : > { %v1073_v34 = vpop.f32.mrf.mxu1  ;;  %v2894_v28 = vrot.slane %v2892_v22, 4  ;;  %v3766_v31 = vrot.slane %v3765_v29, 4  ;;  %v3780_v45 = vrot.slane %v3778_v6, 5  ;;  %v5654_v16 = vrot.slane %v5614_v58, 9 }
 0x182   : > { %v2004_v53 = vadd.f32 %v1922_v24, %v1650_v4  ;;  %v2642_v51 = vpop.f32.mrf.mxu0  ;;  %v1154_v17 = vadd.f32 %v1073_v34, %v6316_v9  ;;  %v4083_v24 = vpack.c.b16 %v4055_v38, %v4054_v42  ;;  %v5616_v9 = vld [vmem:[%s5982_s19 + $0x50] sm:$0x1]  ;;  %v3776_v21 = vrot.slane %v3775_v39, 4  ;;  %v5552_v42 = vld [vmem:[%s5982_s19 + $0x54] sm:$0xf] }
 0x183   : > { %v4460_v62 = vrot.slane %v4458_v48, 4  ;;  %v4461_v32 = vrot.slane %v5616_v9, 5  ;;  %v5553_v38 = vld [vmem:[%s5982_s19 + $0x58] sm:$0xf]  ;;  %v2896_v50 = vsel %vm6043_vm7, %v2894_v28, %v2895_v61  ;;  %v3783_v39 = vshrl.u32 %v5552_v42, 16 }
 0x184   : > { %v6799_v60 = vadd.f32 %v2640_v1, %v2004_v53  ;;  %v5395_v53 = vrot.slane %v5355_v33, 9  ;;  %v3781_v33 = vsel %vm6039_vm6, %v3776_v21, %v3780_v45  ;;  %v3786_v6 = vshll.u32 %v5552_v42, 16  ;;  %v5359_v9 = vld [vmem:[%s5982_s19 + $0x4c] sm:$0xf]  ;;  %v5554_v21 = vld [vmem:[%s5982_s19 + $0x5c] sm:$0x1] }
 0x185   : > { %v4462_v29 = vsel %vm6043_vm7, %v4460_v62, %v4461_v32  ;;  %v2985_v14 = vunpack.c.l.b16 %v2896_v50  ;;  %v5358_v50 = vld [vmem:[%s5982_s19 + $0x48] sm:$0xe] }
 0x186   : > { %v2893_v13 = vsel %vm6043_vm7, %v5395_v53, %v2892_v22  ;;  %v3788_v53 = vrot.slane %v3786_v6, 5  ;;  %v5396_v6 = vrot.slane %v5358_v50, 9 }
 0x187   : > { %v1570_v2 = vpop.f32.mrf.mxu2 }
 0x188   : > { %v1651_v1 = vadd.f32 %v1570_v2, %v1154_v17  ;;  %v1924_v35 = vpop.f32.mrf.mxu3 }
 0x189   : > { %v1076_v4 = vpop.f32.mrf.mxu1 }
 0x18a   : > { %v2005_v34 = vadd.f32 %v1924_v35, %v1651_v1  ;;  %v2645_v25 = vpop.f32.mrf.mxu0  ;;  %v1155_v49 = vadd.f32 %v1076_v4, %v6337_v59  ;;  %v4459_v59 = vsel %vm6043_vm7, %v5654_v16, %v4458_v48  ;;  %v3792_v1 = vshll.u32 %v5553_v38, 16  ;;  %v5618_v16 = vld [vmem:[%s5982_s19 + $0x58] sm:$0xf] }
 0x18b   : > { %v3796_v35 = vshrl.u32 %v5553_v38, 16  ;;  %v4551_v48 = vunpack.c.l.b16 %v4462_v29  ;;  %v2899_v38 = vrot.slane %v5359_v9, 5  ;;  %v4465_v29 = vrot.slane %v5618_v16, 5 }
 0x18c   : > { %5411 = vmatmul.msk.bf16.gmra.mxu1 %vm302_vm1, %v3011_v20  ;;  %5524 = vmatmul.msk.bf16.gmra.mxu2 %vm302_vm1, %v5723_v8  ;;  %v6811_v26 = vadd.f32 %v2642_v51, %v2005_v34  ;;  %v3771_v51 = vsel %vm6039_vm6, %v3766_v31, %v6796_v3  ;;  %v2984_v8 = vunpack.c.l.b16 %v2893_v13  ;;  %v3785_v34 = vrot.slane %v3783_v39, 4  ;;  %v5619_v39 = vld [vmem:[%s5982_s19 + $0x5c] sm:$0x1] }
 0x18d   : > { %5589 = vmatmul.msk.bf16.gmra.mxu3 %vm302_vm1, %v4083_v24  ;;  %5670 = vmatmul.msk.bf16.gmra.mxu0 %vm302_vm1, %v4577_v18  ;;  %v4056_v4 = vunpack.c.l.b16 %v3771_v51  ;;  %v4057_v24 = vunpack.c.l.b16 %v3781_v33  ;;  %v4550_v18 = vunpack.c.l.b16 %v4459_v59  ;;  %v6834_v28 = vrot.slane %v3792_v1, 5  ;;  %v5360_v59 = vld [vmem:[%s5982_s19 + $0x50] sm:$0x1] }
 0x18e   : > { %v3798_v61 = vrot.slane %v3796_v35, 4  ;;  %v3789_v51 = vor.u32 %v3788_v53, %v3785_v34  ;;  %v2901_v1 = vrot.slane %v2899_v38, 4  ;;  %v5555_v35 = vld [vmem:[%s5982_s19 + $0x60] sm:$0xf]  ;;  %v4467_v34 = vrot.slane %v4465_v29, 4 }
 0x18f   : > { %v1573_v36 = vpop.f32.mrf.mxu2  ;;  %v4084_v42 = vpack.c.b16 %v4057_v24, %v4056_v4  ;;  %v4578_v13 = vpack.c.b16 %v4551_v48, %v4550_v18  ;;  %v4468_v53 = vrot.slane %v5619_v39, 5  ;;  %v5557_v39 = vld [vmem:[%s5982_s19 + $0x68] sm:$0x1] }
 0x190   : > { %v1652_v17 = vadd.f32 %v1573_v36, %v1155_v49  ;;  %v1927_v2 = vpop.f32.mrf.mxu3  ;;  %v3012_v49 = vpack.c.b16 %v2985_v14, %v2984_v8  ;;  %v2902_v14 = vrot.slane %v5360_v59, 5  ;;  %v3790_v4 = vrot.slane %v3789_v51, 4 }
 0x191   : > { %v1078_v22 = vpop.f32.mrf.mxu1  ;;  %v4469_v51 = vsel %vm6043_vm7, %v4467_v34, %v4468_v53 }
 0x192   : > { %v2006_v20 = vadd.f32 %v1927_v2, %v1652_v17  ;;  %v2647_v3 = vpop.f32.mrf.mxu0  ;;  %v1156_v31 = vadd.f32 %v1078_v22, %v6366_v56  ;;  %v3799_v56 = vor.u32 %v3798_v61, %v6834_v28  ;;  %v3802_v17 = vshll.u32 %v5554_v21, 16  ;;  %v5617_v22 = vld [vmem:[%s5982_s19 + $0x54] sm:$0xe] }
 0x193   : > { %v5655_v9 = vrot.slane %v5617_v22, 9  ;;  %v3810_v21 = vshll.u32 %v5555_v35, 16 }
 0x194   : > { %v6831_v58 = vadd.f32 %v2645_v25, %v2006_v20  ;;  %v5724_v25 = vld [vmem:[%s5982_s19 + $0x48] sm:$0xff]  ;;  %v5556_v20 = vld [vmem:[%s5982_s19 + $0x64] sm:$0xf]  ;;  %v3800_v24 = vrot.slane %v3799_v56, 4  ;;  %v3804_v18 = vrot.slane %v3802_v17, 5 }
 0x195   : > { %v4466_v50 = vsel %vm6043_vm7, %v5655_v9, %v4465_v29  ;;  %v3812_v17 = vrot.slane %v3810_v21, 5  ;;  %v5361_v9 = vld [vmem:[%s5982_s19 + $0x54] sm:$0xe] }
 0x196   : > { %v4552_v29 = vunpack.c.l.b16 %v4466_v50  ;;  %v5397_v50 = vrot.slane %v5361_v9, 9 }
 0x197   : > { %v1575_v45 = vpop.f32.mrf.mxu2 }
 0x198   : > { %v1653_v62 = vadd.f32 %v1575_v45, %v1156_v31  ;;  %v1929_v32 = vpop.f32.mrf.mxu3  ;;  %v3807_v31 = vshrl.u32 %v5555_v35, 16  ;;  %v3816_v45 = vshll.u32 %v5556_v20, 16 }
 0x199   : > { %v1081_v36 = vpop.f32.mrf.mxu1 }
 0x19a   : > { %v2007_v2 = vadd.f32 %v1929_v32, %v1653_v62  ;;  %v2650_v33 = vpop.f32.mrf.mxu0  ;;  %v1157_v48 = vadd.f32 %v1081_v36, %v6199_v63  ;;  %v3795_v63 = vsel %vm6039_vm6, %v3790_v4, %v6834_v28  ;;  %v3809_v56 = vrot.slane %v3807_v31, 4  ;;  %v7356_v4 = vld [vmem:[#allocation6_spill] sm:$0xff] }
 0x19c   : > { %5412 = vmatmul.msk.bf16.gmra.mxu1 %vm302_vm1, %v3012_v49  ;;  %5525 = vmatmul.msk.bf16.gmra.mxu2 %vm302_vm1, %v5724_v25  ;;  %v6849_v8 = vadd.f32 %v2647_v3, %v2007_v2  ;;  %v3820_v3 = vshrl.u32 %v5556_v20, 16  ;;  %v2900_v49 = vsel %vm6043_vm7, %v5396_v6, %v2899_v38  ;;  %v2903_v25 = vsel %vm6043_vm7, %v2901_v1, %v2902_v14  ;;  %v5362_v38 = vld [vmem:[%s5982_s19 + $0x58] sm:$0xf]  ;;  %v5621_v14 = vld [vmem:[%s5982_s19 + $0x64] sm:$0xf] }
 0x19d   : > { %5590 = vmatmul.msk.bf16.gmra.mxu3 %vm302_vm1, %v4084_v42  ;;  %5671 = vmatmul.msk.bf16.gmra.mxu0 %vm302_vm1, %v4578_v13  ;;  %v3805_v13 = vsel %vm6039_vm6, %v3800_v24, %v3804_v18  ;;  %v6868_v2 = vrot.slane %v3816_v45, 5  ;;  %v2986_v28 = vunpack.c.l.b16 %v2900_v49  ;;  %v2987_v22 = vunpack.c.l.b16 %v2903_v25  ;;  %v5725_v45 = vld [vmem:[%s5982_s19 + $0x54] sm:$0xff] }
 0x19e   : > { %v3822_v59 = vrot.slane %v3820_v3, 4  ;;  %v4058_v1 = vunpack.c.l.b16 %v3795_v63  ;;  %v4059_v35 = vunpack.c.l.b16 %v3805_v13  ;;  %v4553_v20 = vunpack.c.l.b16 %v4469_v51  ;;  %v5363_v3 = vld [vmem:[%s5982_s19 + $0x5c] sm:$0x1]  ;;  %v5620_v63 = vld [vmem:[%s5982_s19 + $0x60] sm:$0xe] }
 0x19f   : > { %v1578_v61 = vpop.f32.mrf.mxu2  ;;  %v2906_v18 = vrot.slane %v5362_v38, 5  ;;  %v3813_v34 = vor.u32 %v3812_v17, %v3809_v56  ;;  %v3013_v21 = vpack.c.b16 %v2987_v22, %v2986_v28  ;;  %v2909_v38 = vrot.slane %v5363_v3, 5 }
 0x1a0   : > { %v1654_v16 = vadd.f32 %v1578_v61, %v1157_v48  ;;  %v1932_v62 = vpop.f32.mrf.mxu3  ;;  %v3823_v53 = vor.u32 %v3822_v59, %v6868_v2  ;;  %v3826_v61 = vshll.u32 %v5557_v39, 16  ;;  %v4085_v49 = vpack.c.b16 %v4059_v35, %v4058_v1  ;;  %v7357_v35 = vld [vmem:[#allocation7_spill] sm:$0xff] }
 0x1a1   : > { %v1083_v32 = vpop.f32.mrf.mxu1  ;;  %v4579_v25 = vpack.c.b16 %v4553_v20, %v4552_v29  ;;  %v2908_v51 = vrot.slane %v2906_v18, 4  ;;  %v3814_v56 = vrot.slane %v3813_v34, 4  ;;  %v5656_v28 = vrot.slane %v5620_v63, 9  ;;  %v5558_v20 = vld [vmem:[%s5982_s19 + $0x6c] sm:$0xf] }
 0x1a2   : > { %v2008_v42 = vadd.f32 %v1932_v62, %v1654_v16  ;;  %v2652_v36 = vpop.f32.mrf.mxu0  ;;  %v1158_v24 = vadd.f32 %v1083_v32, %v7356_v4  ;;  %v4472_v16 = vrot.slane %v5621_v14, 5  ;;  %v5622_v32 = vld [vmem:[%s5982_s19 + $0x68] sm:$0x1]  ;;  %v3824_v17 = vrot.slane %v3823_v53, 4  ;;  %v5559_v14 = vld [vmem:[%s5982_s19 + $0x70] sm:$0xf] }
 0x1a3   : > { %v3828_v59 = vrot.slane %v3826_v61, 5  ;;  %v4475_v39 = vrot.slane %v5622_v32, 5  ;;  %v3844_v3 = vshrl.u32 %v5559_v14, 16 }
 0x1a4   : > { %v6871_v6 = vadd.f32 %v2650_v33, %v2008_v42  ;;  %v4474_v22 = vrot.slane %v4472_v16, 4  ;;  %v4473_v61 = vsel %vm6043_vm7, %v5656_v28, %v4472_v16  ;;  %v7358_v28 = vld [vmem:[#allocation8_spill] sm:$0xff] }
 0x1a5   : > { %v3829_v53 = vsel %vm6039_vm6, %v3824_v17, %v3828_v59  ;;  %v3846_v59 = vrot.slane %v3844_v3, 4  ;;  %v5623_v3 = vld [vmem:[%s5982_s19 + $0x6c] sm:$0xe] }
 0x1a6   : > { %v4061_v32 = vunpack.c.l.b16 %v3829_v53 }
 0x1a7   : > { %v1580_v48 = vpop.f32.mrf.mxu2 }
 0x1a8   : > { %v1655_v33 = vadd.f32 %v1580_v48, %v1158_v24  ;;  %v1934_v31 = vpop.f32.mrf.mxu3  ;;  %v2907_v24 = vsel %vm6043_vm7, %v5397_v50, %v2906_v18  ;;  %v2910_v48 = vsel %vm6043_vm7, %v2908_v51, %v2909_v38  ;;  %v5365_v51 = vld [vmem:[%s5982_s19 + $0x64] sm:$0xf] }
 0x1a9   : > { %v1086_v62 = vpop.f32.mrf.mxu1 }
 0x1aa   : > { %v2009_v42 = vadd.f32 %v1934_v31, %v1655_v33  ;;  %v2655_v13 = vpop.f32.mrf.mxu0  ;;  %v1159_v29 = vadd.f32 %v1086_v62, %v7357_v35  ;;  %v4476_v33 = vsel %vm6043_vm7, %v4474_v22, %v4475_v39  ;;  %v3831_v31 = vshrl.u32 %v5558_v20, 16  ;;  %v5560_v39 = vld [vmem:[%s5982_s19 + $0x74] sm:$0x1] }
 0x1ab   : > { %v4555_v16 = vunpack.c.l.b16 %v4476_v33  ;;  %v3850_v33 = vshll.u32 %v5560_v39, 16 }
 0x1ac   : > { %5413 = vmatmul.msk.bf16.gmra.mxu1 %vm302_vm1, %v3013_v21  ;;  %5526 = vmatmul.msk.bf16.gmra.mxu2 %vm302_vm1, %v5725_v45  ;;  %v6883_v1 = vadd.f32 %v2652_v36, %v2009_v42  ;;  %v3819_v36 = vsel %vm6039_vm6, %v3814_v56, %v6868_v2  ;;  %v3834_v21 = vshll.u32 %v5558_v20, 16  ;;  %v3840_v45 = vshll.u32 %v5559_v14, 16 }
 0x1ad   : > { %5591 = vmatmul.msk.bf16.gmra.mxu3 %vm302_vm1, %v4085_v49  ;;  %5672 = vmatmul.msk.bf16.gmra.mxu0 %vm302_vm1, %v4579_v25  ;;  %v2988_v49 = vunpack.c.l.b16 %v2907_v24  ;;  %v2989_v25 = vunpack.c.l.b16 %v2910_v48  ;;  %v4060_v63 = vunpack.c.l.b16 %v3819_v36  ;;  %v4554_v42 = vunpack.c.l.b16 %v4473_v61 }
 0x1ae   : > { %v3833_v38 = vrot.slane %v3831_v31, 4  ;;  %v3836_v56 = vrot.slane %v3834_v21, 5  ;;  %v6906_v17 = vrot.slane %v3840_v45, 5  ;;  %v2913_v48 = vrot.slane %v5365_v51, 5  ;;  %v5366_v21 = vld [vmem:[%s5982_s19 + $0x68] sm:$0x1] }
 0x1af   : > { %v1583_v4 = vpop.f32.mrf.mxu2  ;;  %v4086_v24 = vpack.c.b16 %v4061_v32, %v4060_v63  ;;  %v5561_v63 = vld [vmem:[%s5982_s19 + $0x78] sm:$0xf]  ;;  %v5562_v32 = vld [vmem:[%s5982_s19 + $0x7c] sm:$0xf] }
 0x1b0   : > { %v1656_v9 = vadd.f32 %v1583_v4, %v1159_v29  ;;  %v1937_v34 = vpop.f32.mrf.mxu3  ;;  %v5624_v29 = vld [vmem:[%s5982_s19 + $0x70] sm:$0xf]  ;;  %v3014_v4 = vpack.c.b16 %v2989_v25, %v2988_v49  ;;  %v3837_v53 = vor.u32 %v3836_v56, %v3833_v38  ;;  %v3847_v61 = vor.u32 %v3846_v59, %v6906_v17  ;;  %v7360_v59 = vld [vmem:[#allocation9_spill] sm:$0xff] }
 0x1b1   : > { %v1088_v18 = vpop.f32.mrf.mxu1  ;;  %v4479_v45 = vrot.slane %v5624_v29, 5  ;;  %v2915_v25 = vrot.slane %v2913_v48, 4  ;;  %v3852_v56 = vrot.slane %v3850_v33, 5 }
 0x1b2   : > { %v2010_v62 = vadd.f32 %v1937_v34, %v1656_v9  ;;  %v2657_v2 = vpop.f32.mrf.mxu0  ;;  %v1160_v22 = vadd.f32 %v1088_v18, %v7358_v28  ;;  %v4580_v9 = vpack.c.b16 %v4555_v16, %v4554_v42  ;;  %v5364_v34 = vld [vmem:[%s5982_s19 + $0x60] sm:$0xe]  ;;  %v2916_v16 = vrot.slane %v5366_v21, 5 }
 0x1b3   : > { %v5398_v49 = vrot.slane %v5364_v34, 9  ;;  %v3838_v51 = vrot.slane %v3837_v53, 4  ;;  %v3848_v38 = vrot.slane %v3847_v61, 4  ;;  %v4481_v39 = vrot.slane %v4479_v45, 4 }
 0x1b4   : > { %v6903_v50 = vadd.f32 %v2655_v13, %v2010_v62  ;;  %v5726_v13 = vld [vmem:[%s5982_s19 + $0x60] sm:$0xff]  ;;  %v5625_v62 = vld [vmem:[%s5982_s19 + $0x74] sm:$0x1]  ;;  %v2917_v53 = vsel %vm6043_vm7, %v2915_v25, %v2916_v16 }
 0x1b5   : > { %v5563_v16 = vld [vmem:[%s5982_s19 + $0x80] sm:$0x1] }
 0x1b7   : > { %v1585_v35 = vpop.f32.mrf.mxu2 }
 0x1b8   : > { %v1657_v20 = vadd.f32 %v1585_v35, %v1160_v22  ;;  %v1939_v14 = vpop.f32.mrf.mxu3  ;;  %v5657_v22 = vrot.slane %v5623_v3, 9  ;;  %v4482_v35 = vrot.slane %v5625_v62, 5 }
 0x1b9   : > { %v1091_v36 = vpop.f32.mrf.mxu1 }
 0x1ba   : > { %v2011_v18 = vadd.f32 %v1939_v14, %v1657_v20  ;;  %v2660_v31 = vpop.f32.mrf.mxu0  ;;  %v1161_v28 = vadd.f32 %v1091_v36, %v7360_v59  ;;  %v3855_v20 = vshrl.u32 %v5561_v63, 16  ;;  %v3858_v14 = vshll.u32 %v5561_v63, 16 }
 0x1bb   : > { %v3843_v36 = vsel %vm6039_vm6, %v3838_v51, %v6906_v17  ;;  %v4480_v21 = vsel %vm6043_vm7, %v5657_v22, %v4479_v45  ;;  %v4483_v3 = vsel %vm6043_vm7, %v4481_v39, %v4482_v35  ;;  %v2991_v63 = vunpack.c.l.b16 %v2917_v53  ;;  %v7362_v22 = vld [vmem:[#allocation10_spill] sm:$0xff]  ;;  %v5727_v53 = vld [vmem:[%s5982_s19 + $0x6c] sm:$0xff] }
 0x1bc   : > { %5414 = vmatmul.msk.bf16.gmra.mxu1 %vm302_vm1, %v3014_v4  ;;  %5527 = vmatmul.msk.bf16.gmra.mxu2 %vm302_vm1, %v5726_v13  ;;  %v6921_v42 = vadd.f32 %v2657_v2, %v2011_v18  ;;  %v3864_v4 = vshll.u32 %v5562_v32, 16  ;;  %v3868_v13 = vshrl.u32 %v5562_v32, 16  ;;  %v3853_v18 = vsel %vm6039_vm6, %v3848_v38, %v3852_v56  ;;  %v5368_v32 = vld [vmem:[%s5982_s19 + $0x70] sm:$0xf] }
 0x1bd   : > { %5592 = vmatmul.msk.bf16.gmra.mxu3 %vm302_vm1, %v4086_v24  ;;  %5673 = vmatmul.msk.bf16.gmra.mxu0 %vm302_vm1, %v4580_v9  ;;  %v2914_v9 = vsel %vm6043_vm7, %v5398_v49, %v2913_v48  ;;  %v3857_v48 = vrot.slane %v3855_v20, 4  ;;  %v3860_v62 = vrot.slane %v3858_v14, 5  ;;  %v4062_v38 = vunpack.c.l.b16 %v3843_v36  ;;  %v5369_v20 = vld [vmem:[%s5982_s19 + $0x74] sm:$0x1] }
 0x1be   : > { %7359 = vst [vmem:[#allocation6_spill] sm:$0xff] %v6921_v42  ;;  %v6939_v49 = vrot.slane %v3864_v4, 5  ;;  %v3870_v25 = vrot.slane %v3868_v13, 4  ;;  %v2990_v17 = vunpack.c.l.b16 %v2914_v9  ;;  %v4063_v56 = vunpack.c.l.b16 %v3853_v18 }
 0x1bf   : > { %v1588_v29 = vpop.f32.mrf.mxu2  ;;  %v4556_v45 = vunpack.c.l.b16 %v4480_v21  ;;  %v4557_v59 = vunpack.c.l.b16 %v4483_v3  ;;  %v2920_v14 = vrot.slane %v5368_v32, 5  ;;  %v3861_v4 = vor.u32 %v3860_v62, %v3857_v48  ;;  %v5626_v3 = vld [vmem:[%s5982_s19 + $0x78] sm:$0xe] }
 0x1c0   : > { %v1658_v2 = vadd.f32 %v1588_v29, %v1161_v28  ;;  %v1942_v34 = vpop.f32.mrf.mxu3  ;;  %v5627_v28 = vld [vmem:[%s5982_s19 + $0x7c] sm:$0xf]  ;;  %v5367_v29 = vld [vmem:[%s5982_s19 + $0x6c] sm:$0xe]  ;;  %v3871_v13 = vor.u32 %v3870_v25, %v6939_v49  ;;  %v3015_v9 = vpack.c.b16 %v2991_v63, %v2990_v17  ;;  %v4087_v18 = vpack.c.b16 %v4063_v56, %v4062_v38 }
 0x1c1   : > { %v1093_v24 = vpop.f32.mrf.mxu1  ;;  %v4486_v36 = vrot.slane %v5627_v28, 5  ;;  %v4581_v21 = vpack.c.b16 %v4557_v59, %v4556_v45  ;;  %v5399_v42 = vrot.slane %v5367_v29, 9  ;;  %v2923_v32 = vrot.slane %v5369_v20, 5  ;;  %v7363_v45 = vld [vmem:[#allocation11_spill] sm:$0xff]  ;;  %v5564_v28 = vld [vmem:[%s5982_s19 + $0x84] sm:$0xf] }
 0x1c2   : > { %v2012_v61 = vadd.f32 %v1942_v34, %v1658_v2  ;;  %v2662_v33 = vpop.f32.mrf.mxu0  ;;  %v1162_v39 = vadd.f32 %v1093_v24, %v7362_v22  ;;  %v3874_v2 = vshll.u32 %v5563_v16, 16  ;;  %v5628_v24 = vld [vmem:[%s5982_s19 + $0x80] sm:$0x1]  ;;  %v2922_v48 = vrot.slane %v2920_v14, 4 }
 0x1c3   : > { %v3862_v62 = vrot.slane %v3861_v4, 4  ;;  %v3872_v25 = vrot.slane %v3871_v13, 4  ;;  %v5658_v17 = vrot.slane %v5626_v3, 9  ;;  %v4488_v63 = vrot.slane %v4486_v36, 4 }
 0x1c4   : > { %v6943_v51 = vadd.f32 %v2660_v31, %v2012_v61  ;;  %v3876_v16 = vrot.slane %v3874_v2, 5  ;;  %v4489_v38 = vrot.slane %v5628_v24, 5  ;;  %v2921_v29 = vsel %vm6043_vm7, %v5399_v42, %v2920_v14 }
 0x1c5   : > { %v2924_v20 = vsel %vm6043_vm7, %v2922_v48, %v2923_v32  ;;  %v3879_v14 = vshrl.u32 %v5564_v28, 16 }
 0x1c6   : > { %7361 = vst [vmem:[#allocation7_spill] sm:$0xff] %v6943_v51  ;;  %v3877_v2 = vsel %vm6039_vm6, %v3872_v25, %v3876_v16  ;;  %v2993_v3 = vunpack.c.l.b16 %v2924_v20 }
 0x1c7   : > { %v1590_v35 = vpop.f32.mrf.mxu2  ;;  %v3881_v25 = vrot.slane %v3879_v14, 4 }
 0x1c8   : > { %v1659_v31 = vadd.f32 %v1590_v35, %v1162_v39  ;;  %v1944_v34 = vpop.f32.mrf.mxu3  ;;  %v5565_v39 = vld [vmem:[%s5982_s19 + $0x88] sm:$0xf] }
 0x1c9   : > { %v1096_v61 = vpop.f32.mrf.mxu1 }
 0x1ca   : > { %v2013_v22 = vadd.f32 %v1944_v34, %v1659_v31  ;;  %v2665_v51 = vpop.f32.mrf.mxu0  ;;  %v1163_v59 = vadd.f32 %v1096_v61, %v7363_v45  ;;  %v4487_v31 = vsel %vm6043_vm7, %v5658_v17, %v4486_v36  ;;  %v4490_v34 = vsel %vm6043_vm7, %v4488_v63, %v4489_v38  ;;  %v7364_v38 = vld [vmem:[#allocation12_spill] sm:$0xff] }
 0x1cb   : > { %v3892_v61 = vshrl.u32 %v5565_v39, 16  ;;  %v4558_v32 = vunpack.c.l.b16 %v4487_v31  ;;  %v4559_v36 = vunpack.c.l.b16 %v4490_v34  ;;  %v5370_v31 = vld [vmem:[%s5982_s19 + $0x78] sm:$0xe] }
 0x1cc   : > { %5415 = vmatmul.msk.bf16.gmra.mxu1 %vm302_vm1, %v3015_v9  ;;  %5528 = vmatmul.msk.bf16.gmra.mxu2 %vm302_vm1, %v5727_v53  ;;  %v6955_v56 = vadd.f32 %v2662_v33, %v2013_v22  ;;  %v3867_v33 = vsel %vm6039_vm6, %v3862_v62, %v6939_v49  ;;  %v3882_v9 = vshll.u32 %v5564_v28, 16  ;;  %v3888_v53 = vshll.u32 %v5565_v39, 16  ;;  %v5371_v62 = vld [vmem:[%s5982_s19 + $0x7c] sm:$0xf]  ;;  %v5630_v39 = vld [vmem:[%s5982_s19 + $0x88] sm:$0xf] }
 0x1cd   : > { %5593 = vmatmul.msk.bf16.gmra.mxu3 %vm302_vm1, %v4087_v18  ;;  %5674 = vmatmul.msk.bf16.gmra.mxu0 %vm302_vm1, %v4581_v21  ;;  %v2992_v21 = vunpack.c.l.b16 %v2921_v29  ;;  %v4064_v24 = vunpack.c.l.b16 %v3867_v33  ;;  %v4065_v22 = vunpack.c.l.b16 %v3877_v2  ;;  %v3894_v63 = vrot.slane %v3892_v61, 4  ;;  %v5372_v61 = vld [vmem:[%s5982_s19 + $0x80] sm:$0x1] }
 0x1ce   : > { %v3884_v16 = vrot.slane %v3882_v9, 5  ;;  %v6978_v17 = vrot.slane %v3888_v53, 5  ;;  %v4582_v2 = vpack.c.b16 %v4559_v36, %v4558_v32  ;;  %v2930_v36 = vrot.slane %v5372_v61, 5 }
 0x1cf   : > { %v1593_v35 = vpop.f32.mrf.mxu2  ;;  %v3016_v20 = vpack.c.b16 %v2993_v3, %v2992_v21  ;;  %v4088_v33 = vpack.c.b16 %v4065_v22, %v4064_v24  ;;  %v5400_v21 = vrot.slane %v5370_v31, 9  ;;  %v5567_v24 = vld [vmem:[%s5982_s19 + $0x90] sm:$0xf]  ;;  %v5568_v22 = vld [vmem:[%s5982_s19 + $0x94] sm:$0xf] }
 0x1d0   : > { %v1660_v4 = vadd.f32 %v1593_v35, %v1163_v59  ;;  %v1947_v13 = vpop.f32.mrf.mxu3  ;;  %v5566_v59 = vld [vmem:[%s5982_s19 + $0x8c] sm:$0x1]  ;;  %v3885_v34 = vor.u32 %v3884_v16, %v3881_v25 }
 0x1d1   : > { %v1098_v42 = vpop.f32.mrf.mxu1  ;;  %v3898_v14 = vshll.u32 %v5566_v59, 16 }
 0x1d2   : > { %v2014_v18 = vadd.f32 %v1947_v13, %v1660_v4  ;;  %v2667_v49 = vpop.f32.mrf.mxu0  ;;  %v1164_v45 = vadd.f32 %v1098_v42, %v7364_v38  ;;  %v2927_v4 = vrot.slane %v5371_v62, 5  ;;  %v3895_v42 = vor.u32 %v3894_v63, %v6978_v17  ;;  %v5629_v38 = vld [vmem:[%s5982_s19 + $0x84] sm:$0xe] }
 0x1d3   : > { %v3886_v62 = vrot.slane %v3885_v34, 4  ;;  %v3900_v16 = vrot.slane %v3898_v14, 5  ;;  %v5659_v59 = vrot.slane %v5629_v38, 9  ;;  %v7011_v14 = vld [vmem:[%s7341_s2] ss:$0 sm:$0xff] }
 0x1d4   : > { %v6975_v48 = vadd.f32 %v2665_v51, %v2014_v18  ;;  %v5728_v51 = vld [vmem:[%s5982_s19 + $0x78] sm:$0xff]  ;;  %v4493_v18 = vrot.slane %v5630_v39, 5  ;;  %v2929_v3 = vrot.slane %v2927_v4, 4  ;;  %v3896_v25 = vrot.slane %v3895_v42, 4  ;;  %v5374_v38 = vld [vmem:[%s5982_s19 + $0x88] sm:$0xf] }
 0x1d5   : > { %v2928_v34 = vsel %vm6043_vm7, %v5400_v21, %v2927_v4 }
 0x1d6   : > { %v3901_v4 = vsel %vm6039_vm6, %v3896_v25, %v3900_v16  ;;  %v4494_v61 = vsel %vm6043_vm7, %v5659_v59, %v4493_v18 }
 0x1d7   : > { %v1595_v28 = vpop.f32.mrf.mxu2  ;;  %v4067_v25 = vunpack.c.l.b16 %v3901_v4  ;;  %v4560_v16 = vunpack.c.l.b16 %v4494_v61 }
 0x1d8   : > { %v1661_v35 = vadd.f32 %v1595_v28, %v1164_v45  ;;  %v1949_v29 = vpop.f32.mrf.mxu3  ;;  %v5631_v45 = vld [vmem:[%s5982_s19 + $0x8c] sm:$0x1]  ;;  %v4495_v28 = vrot.slane %v4493_v18, 4  ;;  %v5633_v18 = vld [vmem:[%s5982_s19 + $0x94] sm:$0xf] }
 0x1d9   : > { %v3084_v13 = vpop.f32.mrf.mxu1  ;;  %v4496_v39 = vrot.slane %v5631_v45, 5  ;;  %v4500_v4 = vrot.slane %v5633_v18, 5  ;;  %v5571_v18 = vld [vmem:[%s5982_s19 + $0xa0] sm:$0xf] }
 0x1da   : > { %v2015_v9 = vadd.f32 %v1949_v29, %v1661_v35  ;;  %v4650_v53 = vpop.f32.mrf.mxu0  ;;  %v3196_v63 = vadd.f32 %v3084_v13, %v6421_v11  ;;  %v3903_v29 = vshrl.u32 %v5567_v24, 16  ;;  %v2931_v11 = vsel %vm6043_vm7, %v2929_v3, %v2930_v36 }
 0x1db   : > { %v3891_v13 = vsel %vm6039_vm6, %v3886_v62, %v6978_v17  ;;  %v4497_v17 = vsel %vm6043_vm7, %v4495_v28, %v4496_v39  ;;  %v2994_v36 = vunpack.c.l.b16 %v2928_v34  ;;  %v2995_v62 = vunpack.c.l.b16 %v2931_v11 }
 0x1dc   : > { %5416 = vmatmul.msk.bf16.gmra.mxu1 %vm302_vm1, %v3016_v20  ;;  %5529 = vmatmul.msk.bf16.gmra.mxu2 %vm302_vm1, %v5728_v51  ;;  %v6993_v32 = vadd.f32 %v2667_v49, %v2015_v9  ;;  %v3906_v20 = vshll.u32 %v5567_v24, 16  ;;  %v3912_v49 = vshll.u32 %v5568_v22, 16  ;;  %v3916_v51 = vshrl.u32 %v5568_v22, 16 }
 0x1dd   : > { %5594 = vmatmul.msk.bf16.gmra.mxu3 %vm302_vm1, %v4088_v33  ;;  %5675 = vmatmul.msk.bf16.gmra.mxu0 %vm302_vm1, %v4582_v2  ;;  %v3905_v45 = vrot.slane %v3903_v29, 4  ;;  %v2934_v39 = vrot.slane %v5374_v38, 5  ;;  %v3017_v11 = vpack.c.b16 %v2995_v62, %v2994_v36  ;;  %v5634_v38 = vld [vmem:[%s5982_s19 + $0x98] sm:$0x1]  ;;  %v4502_v62 = vrot.slane %v4500_v4, 4 }
 0x1de   : > { %7365 = vst [vmem:[#allocation8_spill] sm:$0xff] %v6993_v32  ;;  %v3908_v21 = vrot.slane %v3906_v20, 5  ;;  %v7020_v3 = vrot.slane %v3912_v49, 5  ;;  %v3918_v24 = vrot.slane %v3916_v51, 4  ;;  %v5373_v20 = vld [vmem:[%s5982_s19 + $0x84] sm:$0xe] }
 0x1df   : > { %v3438_v35 = vpop.f32.mrf.mxu2 }
 0x1e0   : > { %v3550_v33 = vadd.f32 %v3438_v35, %v3196_v63  ;;  %v4156_v31 = vpop.f32.mrf.mxu3  ;;  %v5569_v63 = vld [vmem:[%s5982_s19 + $0x98] sm:$0x1]  ;;  %v4066_v35 = vunpack.c.l.b16 %v3891_v13  ;;  %v3919_v49 = vor.u32 %v3918_v24, %v7020_v3  ;;  %v5729_v13 = vld [vmem:[%s5982_s19 + $0x84] sm:$0xff]  ;;  %v2936_v24 = vrot.slane %v2934_v39, 4 }
 0x1e1   : > { %v3086_v2 = vpop.f32.mrf.mxu1  ;;  %v3922_v51 = vshll.u32 %v5569_v63, 16 }
 0x1e2   : > { %v4268_v42 = vadd.f32 %v4156_v31, %v3550_v33  ;;  %v4652_v9 = vpop.f32.mrf.mxu0  ;;  %v4561_v33 = vunpack.c.l.b16 %v4497_v17  ;;  %v3197_v28 = vadd.f32 %v3086_v2, %v6423_v47  ;;  %v4089_v2 = vpack.c.b16 %v4067_v25, %v4066_v35  ;;  %v5632_v17 = vld [vmem:[%s5982_s19 + $0x90] sm:$0xe] }
 0x1e3   : > { %v5660_v36 = vrot.slane %v5632_v17, 9  ;;  %v4503_v35 = vrot.slane %v5634_v38, 5 }
 0x1e4   : > { %v4762_v22 = vadd.f32 %v4650_v53, %v4268_v42  ;;  %v3909_v53 = vor.u32 %v3908_v21, %v3905_v45  ;;  %v5375_v42 = vld [vmem:[%s5982_s19 + $0x8c] sm:$0x1]  ;;  %v4583_v61 = vpack.c.b16 %v4561_v33, %v4560_v16  ;;  %v5401_v21 = vrot.slane %v5373_v20, 9  ;;  %v5570_v33 = vld [vmem:[%s5982_s19 + $0x9c] sm:$0xf] }
 0x1e5   : > { %v2937_v63 = vrot.slane %v5375_v42, 5  ;;  %v3930_v42 = vshll.u32 %v5570_v33, 16 }
 0x1e6   : > { %v4862_v59 = vadd.f32 %v7011_v14, %v4762_v22  ;;  %v3910_v32 = vrot.slane %v3909_v53, 4 }
 0x1e7   : > { %v3440_v29 = vpop.f32.mrf.mxu2  ;;  %v2938_v53 = vsel %vm6043_vm7, %v2936_v24, %v2937_v63  ;;  %v5377_v63 = vld [vmem:[%s5982_s19 + $0x94] sm:$0xf] }
 0x1e8   : > { %4894 = vst [vmem:[%s7028_s9] sm:$0xff] %v4862_v59  ;;  %v3551_v31 = vadd.f32 %v3440_v29, %v3197_v28  ;;  %v4158_v34 = vpop.f32.mrf.mxu3  ;;  %v3920_v59 = vrot.slane %v3919_v49, 4  ;;  %v3924_v28 = vrot.slane %v3922_v51, 5  ;;  %v3915_v49 = vsel %vm6039_vm6, %v3910_v32, %v7020_v3 }
 0x1e9   : > { %v3089_v47 = vpop.f32.mrf.mxu1  ;;  %v2997_v17 = vunpack.c.l.b16 %v2938_v53  ;;  %v4068_v38 = vunpack.c.l.b16 %v3915_v49  ;;  %v5376_v49 = vld [vmem:[%s5982_s19 + $0x90] sm:$0xe] }
 0x1ea   : > { %v4269_v22 = vadd.f32 %v4158_v34, %v3551_v31  ;;  %v4655_v45 = vpop.f32.mrf.mxu0  ;;  %v3198_v16 = vadd.f32 %v3089_v47, %v6465_v37  ;;  %v3925_v34 = vsel %vm6039_vm6, %v3920_v59, %v3924_v28  ;;  %v4501_v37 = vsel %vm6043_vm7, %v5660_v36, %v4500_v4 }
 0x1eb   : > { %v3936_v47 = vshll.u32 %v5571_v18, 16  ;;  %v4562_v4 = vunpack.c.l.b16 %v4501_v37  ;;  %v3932_v28 = vrot.slane %v3930_v42, 5  ;;  %v5378_v37 = vld [vmem:[%s5982_s19 + $0x98] sm:$0x1] }
 0x1ec   : > { %v4763_v29 = vadd.f32 %v4652_v9, %v4269_v22  ;;  %5417 = vmatmul.msk.bf16.gmra.mxu1 %vm302_vm1, %v3017_v11  ;;  %5530 = vmatmul.msk.bf16.gmra.mxu2 %vm302_vm1, %v5729_v13  ;;  %v2935_v9 = vsel %vm6043_vm7, %v5401_v21, %v2934_v39  ;;  %v4504_v39 = vsel %vm6043_vm7, %v4502_v62, %v4503_v35  ;;  %v3927_v13 = vshrl.u32 %v5570_v33, 16  ;;  %v5636_v33 = vld [vmem:[%s5982_s19 + $0xa0] sm:$0xf] }
 0x1ed   : > { %5595 = vmatmul.msk.bf16.gmra.mxu3 %vm302_vm1, %v4089_v2  ;;  %5676 = vmatmul.msk.bf16.gmra.mxu0 %vm302_vm1, %v4583_v61  ;;  %v3940_v2 = vshrl.u32 %v5571_v18, 16  ;;  %v2996_v3 = vunpack.c.l.b16 %v2935_v9  ;;  %v4069_v21 = vunpack.c.l.b16 %v3925_v34  ;;  %v4563_v24 = vunpack.c.l.b16 %v4504_v39  ;;  %v5730_v9 = vld [vmem:[%s5982_s19 + $0x90] sm:$0xff] }
 0x1ee   : > { %v4863_v25 = vadd.f32 %v7011_v14, %v4763_v29  ;;  %v3929_v59 = vrot.slane %v3927_v13, 4  ;;  %v7058_v29 = vrot.slane %v3936_v47, 5  ;;  %v5635_v47 = vld [vmem:[%s5982_s19 + $0x9c] sm:$0xe] }
 0x1ef   : > { %v3443_v20 = vpop.f32.mrf.mxu2  ;;  %v3942_v36 = vrot.slane %v3940_v2, 4  ;;  %v4090_v53 = vpack.c.b16 %v4069_v21, %v4068_v38  ;;  %v4584_v34 = vpack.c.b16 %v4563_v24, %v4562_v4  ;;  %v4507_v2 = vrot.slane %v5636_v33, 5  ;;  %v5573_v21 = vld [vmem:[%s5982_s19 + $0xa8] sm:$0xf]  ;;  %v5574_v4 = vld [vmem:[%s5982_s19 + $0xac] sm:$0xf] }
 0x1f0   : > { %4895 = vst [vmem:[%s7028_s9 + $0x8] sm:$0xff] %v4863_v25  ;;  %v3552_v51 = vadd.f32 %v3443_v20, %v3198_v16  ;;  %v4161_v31 = vpop.f32.mrf.mxu3  ;;  %v5572_v25 = vld [vmem:[%s5982_s19 + $0xa4] sm:$0x1]  ;;  %v3018_v20 = vpack.c.b16 %v2997_v17, %v2996_v3  ;;  %v3933_v39 = vor.u32 %v3932_v28, %v3929_v59  ;;  %v5661_v28 = vrot.slane %v5635_v47, 9 }
 0x1f1   : > { %v3091_v11 = vpop.f32.mrf.mxu1  ;;  %v5637_v3 = vld [vmem:[%s5982_s19 + $0xa4] sm:$0x1]  ;;  %v3954_v33 = vshll.u32 %v5573_v21, 16 }
 0x1f2   : > { %v4270_v61 = vadd.f32 %v4161_v31, %v3552_v51  ;;  %v4657_v32 = vpop.f32.mrf.mxu0  ;;  %v3199_v35 = vadd.f32 %v3091_v11, %v6467_v52  ;;  %v2941_v51 = vrot.slane %v5377_v63, 5  ;;  %v3943_v52 = vor.u32 %v3942_v36, %v7058_v29 }
 0x1f3   : > { %v3946_v11 = vshll.u32 %v5572_v25, 16  ;;  %v3934_v24 = vrot.slane %v3933_v39, 4  ;;  %v3956_v47 = vrot.slane %v3954_v33, 5 }
 0x1f4   : > { %v4764_v22 = vadd.f32 %v4655_v45, %v4270_v61  ;;  %v5402_v61 = vrot.slane %v5376_v49, 9  ;;  %v2943_v38 = vrot.slane %v2941_v51, 4  ;;  %v3944_v63 = vrot.slane %v3943_v52, 4 }
 0x1f5   : > { %v3948_v59 = vrot.slane %v3946_v11, 5  ;;  %v4508_v52 = vsel %vm6043_vm7, %v5661_v28, %v4507_v2  ;;  %v5380_v11 = vld [vmem:[%s5982_s19 + $0xa0] sm:$0xf] }
 0x1f6   : > { %v4864_v62 = vadd.f32 %v7011_v14, %v4764_v22  ;;  %v2944_v22 = vrot.slane %v5378_v37, 5  ;;  %v2942_v49 = vsel %vm6043_vm7, %v5402_v61, %v2941_v51 }
 0x1f7   : > { %v3445_v16 = vpop.f32.mrf.mxu2  ;;  %v3949_v39 = vsel %vm6039_vm6, %v3944_v63, %v3948_v59  ;;  %v5639_v63 = vld [vmem:[%s5982_s19 + $0xac] sm:$0xf] }
 0x1f8   : > { %4896 = vst [vmem:[%s7028_s9 + $0x10] sm:$0xff] %v4864_v62  ;;  %v3553_v45 = vadd.f32 %v3445_v16, %v3199_v35  ;;  %v4163_v18 = vpop.f32.mrf.mxu3  ;;  %v4509_v62 = vrot.slane %v4507_v2, 4  ;;  %v4510_v35 = vrot.slane %v5637_v3, 5  ;;  %v3951_v16 = vshrl.u32 %v5573_v21, 16 }
 0x1f9   : > { %v3094_v31 = vpop.f32.mrf.mxu1 }
 0x1fa   : > { %v4271_v13 = vadd.f32 %v4163_v18, %v3553_v45  ;;  %v4660_v42 = vpop.f32.mrf.mxu0  ;;  %v3960_v45 = vshll.u32 %v5574_v4, 16  ;;  %v3964_v18 = vshrl.u32 %v5574_v4, 16  ;;  %v4511_v51 = vsel %vm6043_vm7, %v4509_v62, %v4510_v35 }
 0x1fb   : > { %v4071_v4 = vunpack.c.l.b16 %v3949_v39  ;;  %v4565_v2 = vunpack.c.l.b16 %v4511_v51 }
 0x1fc   : > { %v4765_v17 = vadd.f32 %v4657_v32, %v4271_v13  ;;  %5418 = vmatmul.msk.bf16.gmra.mxu1 %vm302_vm1, %v3018_v20  ;;  %5531 = vmatmul.msk.bf16.gmra.mxu2 %vm302_vm1, %v5730_v9  ;;  %v3200_v32 = vadd.f32 %v3094_v31, %v6506_v23  ;;  %v3939_v23 = vsel %vm6039_vm6, %v3934_v24, %v7058_v29  ;;  %v3953_v13 = vrot.slane %v3951_v16, 4 }
 0x1fd   : > { %5596 = vmatmul.msk.bf16.gmra.mxu3 %vm302_vm1, %v4090_v53  ;;  %5677 = vmatmul.msk.bf16.gmra.mxu0 %vm302_vm1, %v4584_v34  ;;  %v2945_v34 = vsel %vm6043_vm7, %v2943_v38, %v2944_v22  ;;  %v7094_v61 = vrot.slane %v3960_v45, 5  ;;  %v3966_v3 = vrot.slane %v3964_v18, 4  ;;  %v5575_v22 = vld [vmem:[%s5982_s19 + $0xb0] sm:$0x1]  ;;  %v4070_v21 = vunpack.c.l.b16 %v3939_v23  ;;  %v5731_v18 = vld [vmem:[%s5982_s19 + $0x9c] sm:$0xff] }
 0x1fe   : > { %v4865_v36 = vadd.f32 %v7011_v14, %v4765_v17  ;;  %v2998_v17 = vunpack.c.l.b16 %v2942_v49  ;;  %v2999_v38 = vunpack.c.l.b16 %v2945_v34  ;;  %v4564_v24 = vunpack.c.l.b16 %v4508_v52 }
 0x1ff   : > { %v3448_v25 = vpop.f32.mrf.mxu2  ;;  %v3957_v62 = vor.u32 %v3956_v47, %v3953_v13  ;;  %v3967_v35 = vor.u32 %v3966_v3, %v7094_v61  ;;  %v4091_v34 = vpack.c.b16 %v4071_v4, %v4070_v21 }
 0x200   : > { %4897 = vst [vmem:[%s7028_s9 + $0x18] sm:$0xff] %v4865_v36  ;;  %v3554_v20 = vadd.f32 %v3448_v25, %v3200_v32  ;;  %v4166_v9 = vpop.f32.mrf.mxu3  ;;  %v2948_v36 = vrot.slane %v5380_v11, 5  ;;  %v3970_v25 = vshll.u32 %v5575_v22, 16  ;;  %v3019_v45 = vpack.c.b16 %v2999_v38, %v2998_v17 }
 0x201   : > { %v3096_v53 = vpop.f32.mrf.mxu1  ;;  %v4585_v23 = vpack.c.b16 %v4565_v2, %v4564_v24  ;;  %v3958_v13 = vrot.slane %v3957_v62, 4  ;;  %v3968_v47 = vrot.slane %v3967_v35, 4  ;;  %v5576_v24 = vld [vmem:[%s5982_s19 + $0xb4] sm:$0xf]  ;;  %v5577_v2 = vld [vmem:[%s5982_s19 + $0xb8] sm:$0xf] }
 0x202   : > { %v4272_v31 = vadd.f32 %v4166_v9, %v3554_v20  ;;  %v4662_v37 = vpop.f32.mrf.mxu0  ;;  %v3201_v28 = vadd.f32 %v3096_v53, %v6508_v57  ;;  %v5381_v20 = vld [vmem:[%s5982_s19 + $0xa4] sm:$0x1]  ;;  %v4514_v9 = vrot.slane %v5639_v63, 5  ;;  %v5638_v57 = vld [vmem:[%s5982_s19 + $0xa8] sm:$0xe]  ;;  %v2950_v51 = vrot.slane %v2948_v36, 4 }
 0x203   : > { %v5640_v53 = vld [vmem:[%s5982_s19 + $0xb0] sm:$0x1]  ;;  %v2951_v11 = vrot.slane %v5381_v20, 5  ;;  %v3972_v3 = vrot.slane %v3970_v25, 5  ;;  %v5662_v17 = vrot.slane %v5638_v57, 9  ;;  %v3975_v25 = vshrl.u32 %v5576_v24, 16 }
 0x204   : > { %v4766_v29 = vadd.f32 %v4660_v42, %v4272_v31  ;;  %v5379_v42 = vld [vmem:[%s5982_s19 + $0x9c] sm:$0xe]  ;;  %v4516_v38 = vrot.slane %v4514_v9, 4  ;;  %v4517_v22 = vrot.slane %v5640_v53, 5 }
 0x205   : > { %v5403_v52 = vrot.slane %v5379_v42, 9  ;;  %v3973_v62 = vsel %vm6039_vm6, %v3968_v47, %v3972_v3 }
 0x206   : > { %v4866_v59 = vadd.f32 %v7011_v14, %v4766_v29  ;;  %v4073_v57 = vunpack.c.l.b16 %v3973_v62 }
 0x207   : > { %v3450_v32 = vpop.f32.mrf.mxu2 }
 0x208   : > { %4898 = vst [vmem:[%s7028_s9 + $0x20] sm:$0xff] %v4866_v59  ;;  %v3555_v16 = vadd.f32 %v3450_v32, %v3201_v28  ;;  %v4168_v33 = vpop.f32.mrf.mxu3  ;;  %v2952_v59 = vsel %vm6043_vm7, %v2950_v51, %v2951_v11  ;;  %v3963_v28 = vsel %vm6039_vm6, %v3958_v13, %v7094_v61 }
 0x209   : > { %v3099_v49 = vpop.f32.mrf.mxu1 }
 0x20a   : > { %v4273_v31 = vadd.f32 %v4168_v33, %v3555_v16  ;;  %v4665_v39 = vpop.f32.mrf.mxu0  ;;  %v3202_v4 = vadd.f32 %v3099_v49, %v6549_v55  ;;  %v4515_v55 = vsel %vm6043_vm7, %v5662_v17, %v4514_v9  ;;  %v3978_v16 = vshll.u32 %v5576_v24, 16 }
 0x20b   : > { %v3984_v33 = vshll.u32 %v5577_v2, 16  ;;  %v3001_v49 = vunpack.c.l.b16 %v2952_v59  ;;  %v4566_v9 = vunpack.c.l.b16 %v4515_v55 }
 0x20c   : > { %v4767_v29 = vadd.f32 %v4662_v37, %v4273_v31  ;;  %5419 = vmatmul.msk.bf16.gmra.mxu1 %vm302_vm1, %v3019_v45  ;;  %5532 = vmatmul.msk.bf16.gmra.mxu2 %vm302_vm1, %v5731_v18  ;;  %v2949_v37 = vsel %vm6043_vm7, %v5403_v52, %v2948_v36  ;;  %v4518_v36 = vsel %vm6043_vm7, %v4516_v38, %v4517_v22  ;;  %v3988_v45 = vshrl.u32 %v5577_v2, 16  ;;  %v5383_v31 = vld [vmem:[%s5982_s19 + $0xac] sm:$0xf]  ;;  %v5642_v38 = vld [vmem:[%s5982_s19 + $0xb8] sm:$0xf] }
 0x20d   : > { %5597 = vmatmul.msk.bf16.gmra.mxu3 %vm302_vm1, %v4091_v34  ;;  %5678 = vmatmul.msk.bf16.gmra.mxu0 %vm302_vm1, %v4585_v23  ;;  %v3000_v20 = vunpack.c.l.b16 %v2949_v37  ;;  %v4072_v34 = vunpack.c.l.b16 %v3963_v28  ;;  %v4567_v53 = vunpack.c.l.b16 %v4518_v36  ;;  %v3977_v52 = vrot.slane %v3975_v25, 4  ;;  %v5382_v2 = vld [vmem:[%s5982_s19 + $0xa8] sm:$0xe]  ;;  %v5384_v28 = vld [vmem:[%s5982_s19 + $0xb0] sm:$0x1] }
 0x20e   : > { %v4867_v21 = vadd.f32 %v7011_v14, %v4767_v29  ;;  %v3980_v51 = vrot.slane %v3978_v16, 5  ;;  %v7130_v11 = vrot.slane %v3984_v33, 5  ;;  %v3990_v13 = vrot.slane %v3988_v45, 4  ;;  %v5578_v29 = vld [vmem:[%s5982_s19 + $0xbc] sm:$0x1] }
 0x20f   : > { %v3453_v63 = vpop.f32.mrf.mxu2  ;;  %v4092_v24 = vpack.c.b16 %v4073_v57, %v4072_v34  ;;  %v4586_v59 = vpack.c.b16 %v4567_v53, %v4566_v9  ;;  %v5641_v36 = vld [vmem:[%s5982_s19 + $0xb4] sm:$0xe]  ;;  %v5404_v25 = vrot.slane %v5382_v2, 9  ;;  %v5643_v16 = vld [vmem:[%s5982_s19 + $0xbc] sm:$0x1] }
 0x210   : > { %4899 = vst [vmem:[%s7028_s9 + $0x28] sm:$0xff] %v4867_v21  ;;  %v3556_v32 = vadd.f32 %v3453_v63, %v3202_v4  ;;  %v4171_v42 = vpop.f32.mrf.mxu3  ;;  %v3020_v21 = vpack.c.b16 %v3001_v49, %v3000_v20  ;;  %v5732_v4 = vld [vmem:[%s5982_s19 + $0xa8] sm:$0xff]  ;;  %v2955_v63 = vrot.slane %v5383_v31, 5  ;;  %v5579_v20 = vld [vmem:[%s5982_s19 + $0xc0] sm:$0xf]  ;;  %v5663_v9 = vrot.slane %v5641_v36, 9 }
 0x211   : > { %v3101_v35 = vpop.f32.mrf.mxu1  ;;  %v5580_v49 = vld [vmem:[%s5982_s19 + $0xc4] sm:$0xf] }
 0x212   : > { %v4274_v18 = vadd.f32 %v4171_v42, %v3556_v32  ;;  %v4667_v61 = vpop.f32.mrf.mxu0  ;;  %v3203_v3 = vadd.f32 %v3101_v35, %v6551_v12  ;;  %v3981_v32 = vor.u32 %v3980_v51, %v3977_v52  ;;  %v3991_v12 = vor.u32 %v3990_v13, %v7130_v11 }
 0x213   : > { %v3994_v42 = vshll.u32 %v5578_v29, 16  ;;  %v4521_v35 = vrot.slane %v5642_v38, 5  ;;  %v2957_v45 = vrot.slane %v2955_v63, 4  ;;  %v4524_v52 = vrot.slane %v5643_v16, 5 }
 0x214   : > { %v4768_v23 = vadd.f32 %v4665_v39, %v4274_v18  ;;  %v2958_v18 = vrot.slane %v5384_v28, 5  ;;  %v3982_v34 = vrot.slane %v3981_v32, 4  ;;  %v3999_v13 = vshrl.u32 %v5579_v20, 16 }
 0x215   : > { %v3996_v57 = vrot.slane %v3994_v42, 5  ;;  %v4523_v31 = vrot.slane %v4521_v35, 4  ;;  %v4012_v29 = vshrl.u32 %v5580_v49, 16 }
 0x216   : > { %v4868_v47 = vadd.f32 %v7011_v14, %v4768_v23  ;;  %v3992_v23 = vrot.slane %v3991_v12, 4  ;;  %v4001_v28 = vrot.slane %v3999_v13, 4  ;;  %v5387_v13 = vld [vmem:[%s5982_s19 + $0xbc] sm:$0x1] }
 0x217   : > { %v3455_v17 = vpop.f32.mrf.mxu2  ;;  %v4014_v42 = vrot.slane %v4012_v29, 4 }
 0x218   : > { %4900 = vst [vmem:[%s7028_s9 + $0x30] sm:$0xff] %v4868_v47  ;;  %v3557_v39 = vadd.f32 %v3455_v17, %v3203_v3  ;;  %v4173_v22 = vpop.f32.mrf.mxu3  ;;  %v4002_v47 = vshll.u32 %v5579_v20, 16  ;;  %v4008_v3 = vshll.u32 %v5580_v49, 16  ;;  %v3997_v2 = vsel %vm6039_vm6, %v3992_v23, %v3996_v57 }
 0x219   : > { %v3104_v37 = vpop.f32.mrf.mxu1 }
 0x21a   : > { %v4275_v62 = vadd.f32 %v4173_v22, %v3557_v39  ;;  %v4670_v55 = vpop.f32.mrf.mxu0  ;;  %v2956_v22 = vsel %vm6043_vm7, %v5404_v25, %v2955_v63  ;;  %v4525_v63 = vsel %vm6043_vm7, %v4523_v31, %v4524_v52  ;;  %v4004_v32 = vrot.slane %v4002_v47, 5  ;;  %v5581_v25 = vld [vmem:[%s5982_s19 + $0xc8] sm:$0x1] }
 0x21b   : > { %v7166_v12 = vrot.slane %v4008_v3, 5 }
 0x21c   : > { %v4769_v33 = vadd.f32 %v4667_v61, %v4275_v62  ;;  %5420 = vmatmul.msk.bf16.gmra.mxu1 %vm302_vm1, %v3020_v21  ;;  %5533 = vmatmul.msk.bf16.gmra.mxu2 %vm302_vm1, %v5732_v4  ;;  %v3204_v61 = vadd.f32 %v3104_v37, %v6588_v46  ;;  %v2959_v21 = vsel %vm6043_vm7, %v2957_v45, %v2958_v18  ;;  %v3002_v62 = vunpack.c.l.b16 %v2956_v22  ;;  %v5645_v18 = vld [vmem:[%s5982_s19 + $0xc4] sm:$0xf] }
 0x21d   : > { %5598 = vmatmul.msk.bf16.gmra.mxu3 %vm302_vm1, %v4092_v24  ;;  %5679 = vmatmul.msk.bf16.gmra.mxu0 %vm302_vm1, %v4586_v59  ;;  %v3987_v46 = vsel %vm6039_vm6, %v3982_v34, %v7130_v11  ;;  %v4522_v37 = vsel %vm6043_vm7, %v5663_v9, %v4521_v35  ;;  %v5386_v59 = vld [vmem:[%s5982_s19 + $0xb8] sm:$0xf]  ;;  %v3003_v36 = vunpack.c.l.b16 %v2959_v21  ;;  %v4569_v35 = vunpack.c.l.b16 %v4525_v63 }
 0x21e   : > { %v4869_v53 = vadd.f32 %v7011_v14, %v4769_v33  ;;  %v4074_v16 = vunpack.c.l.b16 %v3987_v46  ;;  %v4075_v33 = vunpack.c.l.b16 %v3997_v2  ;;  %v4568_v45 = vunpack.c.l.b16 %v4522_v37 }
 0x21f   : > { %v3458_v51 = vpop.f32.mrf.mxu2  ;;  %v2962_v34 = vrot.slane %v5386_v59, 5  ;;  %v4005_v57 = vor.u32 %v4004_v32, %v4001_v28  ;;  %v4015_v9 = vor.u32 %v4014_v42, %v7166_v12  ;;  %v3021_v52 = vpack.c.b16 %v3003_v36, %v3002_v62  ;;  %v5582_v36 = vld [vmem:[%s5982_s19 + $0xcc] sm:$0xf] }
 0x220   : > { %4901 = vst [vmem:[%s7028_s9 + $0x38] sm:$0xff] %v4869_v53  ;;  %v3558_v17 = vadd.f32 %v3458_v51, %v3204_v61  ;;  %v4176_v38 = vpop.f32.mrf.mxu3  ;;  %v4018_v53 = vshll.u32 %v5581_v25, 16  ;;  %v5733_v51 = vld [vmem:[%s5982_s19 + $0xb4] sm:$0xff]  ;;  %v4528_v47 = vrot.slane %v5645_v18, 5  ;;  %v4093_v29 = vpack.c.b16 %v4075_v33, %v4074_v16  ;;  %v5583_v25 = vld [vmem:[%s5982_s19 + $0xd0] sm:$0xf] }
 0x221   : > { %v3106_v39 = vpop.f32.mrf.mxu1  ;;  %v2964_v46 = vrot.slane %v2962_v34, 4  ;;  %v4006_v2 = vrot.slane %v4005_v57, 4  ;;  %v4016_v37 = vrot.slane %v4015_v9, 4  ;;  %v4032_v57 = vshll.u32 %v5583_v25, 16 }
 0x222   : > { %v4276_v4 = vadd.f32 %v4176_v38, %v3558_v17  ;;  %v4672_v24 = vpop.f32.mrf.mxu0  ;;  %v3205_v49 = vadd.f32 %v3106_v39, %v6590_v27  ;;  %v4587_v17 = vpack.c.b16 %v4569_v35, %v4568_v45  ;;  %v5644_v27 = vld [vmem:[%s5982_s19 + $0xc0] sm:$0xe]  ;;  %v5646_v38 = vld [vmem:[%s5982_s19 + $0xc8] sm:$0x1]  ;;  %v4020_v63 = vrot.slane %v4018_v53, 5 }
 0x223   : > { %v5664_v28 = vrot.slane %v5644_v27, 9  ;;  %v4530_v32 = vrot.slane %v4528_v47, 4  ;;  %v4531_v42 = vrot.slane %v5646_v38, 5  ;;  %v4011_v45 = vsel %vm6039_vm6, %v4006_v2, %v7166_v12 }
 0x224   : > { %v4770_v11 = vadd.f32 %v4670_v55, %v4276_v4  ;;  %v5385_v55 = vld [vmem:[%s5982_s19 + $0xb4] sm:$0xe]  ;;  %v2965_v4 = vrot.slane %v5387_v13, 5  ;;  %v4036_v9 = vshrl.u32 %v5583_v25, 16  ;;  %v4034_v38 = vrot.slane %v4032_v57, 5 }
 0x225   : > { %v5405_v21 = vrot.slane %v5385_v55, 9  ;;  %v4026_v55 = vshll.u32 %v5582_v36, 16  ;;  %v5390_v25 = vld [vmem:[%s5982_s19 + $0xc8] sm:$0x1] }
 0x226   : > { %v4870_v20 = vadd.f32 %v7011_v14, %v4770_v11  ;;  %v2966_v33 = vsel %vm6043_vm7, %v2964_v46, %v2965_v4  ;;  %v5584_v4 = vld [vmem:[%s5982_s19 + $0xd4] sm:$0x1] }
 0x227   : > { %v3460_v23 = vpop.f32.mrf.mxu2  ;;  %v4028_v27 = vrot.slane %v4026_v55, 5 }
 0x228   : > { %4902 = vst [vmem:[%s7028_s9 + $0x40] sm:$0xff] %v4870_v20  ;;  %v3559_v61 = vadd.f32 %v3460_v23, %v3205_v49  ;;  %v4178_v31 = vpop.f32.mrf.mxu3  ;;  %v4021_v20 = vsel %vm6039_vm6, %v4016_v37, %v4020_v63  ;;  %v4532_v49 = vsel %vm6043_vm7, %v4530_v32, %v4531_v42  ;;  %v4023_v23 = vshrl.u32 %v5582_v36, 16  ;;  %v5648_v37 = vld [vmem:[%s5982_s19 + $0xd0] sm:$0xf]  ;;  %v5388_v36 = vld [vmem:[%s5982_s19 + $0xc0] sm:$0xe] }
 0x229   : > { %v3109_v3 = vpop.f32.mrf.mxu1  ;;  %v4077_v13 = vunpack.c.l.b16 %v4021_v20  ;;  %v5649_v20 = vld [vmem:[%s5982_s19 + $0xd4] sm:$0x1] }
 0x22a   : > { %v4277_v39 = vadd.f32 %v4178_v31, %v3559_v61  ;;  %v4675_v22 = vpop.f32.mrf.mxu0  ;;  %v3206_v62 = vadd.f32 %v3109_v3, %v6617_v41  ;;  %v4529_v41 = vsel %vm6043_vm7, %v5664_v28, %v4528_v47  ;;  %v3005_v31 = vunpack.c.l.b16 %v2966_v33  ;;  %v5734_v28 = vld [vmem:[%s5982_s19 + $0xc0] sm:$0xff] }
 0x22b   : > { %v4570_v47 = vunpack.c.l.b16 %v4529_v41  ;;  %v4571_v3 = vunpack.c.l.b16 %v4532_v49  ;;  %v4042_v33 = vshll.u32 %v5584_v4, 16  ;;  %v5406_v49 = vrot.slane %v5388_v36, 9 }
 0x22c   : > { %v4771_v59 = vadd.f32 %v4672_v24, %v4277_v39  ;;  %5421 = vmatmul.msk.bf16.gmra.mxu1 %vm302_vm1, %v3021_v52  ;;  %5534 = vmatmul.msk.bf16.gmra.mxu2 %vm302_vm1, %v5733_v51  ;;  %v2963_v24 = vsel %vm6043_vm7, %v5405_v21, %v2962_v34  ;;  %v4076_v52 = vunpack.c.l.b16 %v4011_v45  ;;  %v4038_v39 = vrot.slane %v4036_v9, 4 }
 0x22d   : > { %5599 = vmatmul.msk.bf16.gmra.mxu3 %vm302_vm1, %v4093_v29  ;;  %5680 = vmatmul.msk.bf16.gmra.mxu0 %vm302_vm1, %v4587_v17  ;;  %v3004_v61 = vunpack.c.l.b16 %v2963_v24  ;;  %v5389_v29 = vld [vmem:[%s5982_s19 + $0xc4] sm:$0xf]  ;;  %v4025_v17 = vrot.slane %v4023_v23, 4  ;;  %v2972_v23 = vrot.slane %v5390_v25, 5  ;;  %v4044_v9 = vrot.slane %v4042_v33, 5 }
 0x22e   : > { %v4871_v11 = vadd.f32 %v7011_v14, %v4771_v59  ;;  %v4094_v32 = vpack.c.b16 %v4077_v13, %v4076_v52  ;;  %v2969_v42 = vrot.slane %v5389_v29, 5  ;;  %v4039_v24 = vor.u32 %v4038_v39, %v4034_v38 }
 0x22f   : > { %v3463_v16 = vpop.f32.mrf.mxu2  ;;  %v3022_v59 = vpack.c.b16 %v3005_v31, %v3004_v61  ;;  %v4538_v52 = vrot.slane %v5649_v20, 5 }
 0x230   : > { %4903 = vst [vmem:[%s7028_s9 + $0x48] sm:$0xff] %v4871_v11  ;;  %v3560_v35 = vadd.f32 %v3463_v16, %v3206_v62  ;;  %v4181_v18 = vpop.f32.mrf.mxu3  ;;  %v4588_v62 = vpack.c.b16 %v4571_v3, %v4570_v47  ;;  %v4029_v16 = vor.u32 %v4028_v27, %v4025_v17  ;;  %v4040_v57 = vrot.slane %v4039_v24, 4 }
 0x231   : > { %v3111_v34 = vpop.f32.mrf.mxu1  ;;  %v2970_v29 = vsel %vm6043_vm7, %v5406_v49, %v2969_v42 }
 0x232   : > { %v4278_v53 = vadd.f32 %v4181_v18, %v3560_v35  ;;  %v4677_v12 = vpop.f32.mrf.mxu0  ;;  %v3207_v46 = vadd.f32 %v3111_v34, %v6632_v44  ;;  %v5647_v35 = vld [vmem:[%s5982_s19 + $0xcc] sm:$0xe]  ;;  %v4535_v18 = vrot.slane %v5648_v37, 5  ;;  %v2971_v34 = vrot.slane %v2969_v42, 4 }
 0x233   : > { %v4030_v55 = vrot.slane %v4029_v16, 4  ;;  %v3006_v37 = vunpack.c.l.b16 %v2970_v29 }
 0x234   : > { %v4772_v51 = vadd.f32 %v4675_v22, %v4278_v53  ;;  %v5665_v53 = vrot.slane %v5647_v35, 9  ;;  %v4537_v31 = vrot.slane %v4535_v18, 4  ;;  %v2973_v17 = vsel %vm6043_vm7, %v2971_v34, %v2972_v23 }
 0x235   : > { %v4035_v27 = vsel %vm6039_vm6, %v4030_v55, %v4034_v38 }
 0x236   : > { %v4872_v21 = vadd.f32 %v7011_v14, %v4772_v51  ;;  %v4539_v4 = vsel %vm6043_vm7, %v4537_v31, %v4538_v52 }
 0x237   : > { %v3465_v2 = vpop.f32.mrf.mxu2  ;;  %v4573_v38 = vunpack.c.l.b16 %v4539_v4 }
 0x238   : > { %4904 = vst [vmem:[%s7028_s9 + $0x50] sm:$0xff] %v4872_v21  ;;  %v3561_v22 = vadd.f32 %v3465_v2, %v3207_v46  ;;  %v4183_v63 = vpop.f32.mrf.mxu3  ;;  %v4536_v46 = vsel %vm6043_vm7, %v5665_v53, %v4535_v18 }
 0x239   : > { %v3114_v11 = vpop.f32.mrf.mxu1 }
 0x23a   : > { %v4279_v44 = vadd.f32 %v4183_v63, %v3561_v22  ;;  %v4680_v45 = vpop.f32.mrf.mxu0  ;;  %v3007_v22 = vunpack.c.l.b16 %v2973_v17  ;;  %v4078_v63 = vunpack.c.l.b16 %v4035_v27 }
 0x23c   : > { %v4773_v41 = vadd.f32 %v4677_v12, %v4279_v44  ;;  %5422 = vmatmul.msk.bf16.gmra.mxu1 %vm302_vm1, %v3022_v59  ;;  %5535 = vmatmul.msk.bf16.gmra.mxu2 %vm302_vm1, %v5734_v28  ;;  %v3208_v12 = vadd.f32 %v3114_v11, %v6655_v15  ;;  %v4045_v15 = vsel %vm6039_vm6, %v4040_v57, %v4044_v9  ;;  %v4572_v28 = vunpack.c.l.b16 %v4536_v46 }
 0x23d   : > { %5600 = vmatmul.msk.bf16.gmra.mxu3 %vm302_vm1, %v4094_v32  ;;  %5681 = vmatmul.msk.bf16.gmra.mxu0 %vm302_vm1, %v4588_v62  ;;  %v4079_v59 = vunpack.c.l.b16 %v4045_v15  ;;  %v3023_v36 = vpack.c.b16 %v3007_v22, %v3006_v37 }
 0x23e   : > { %v4873_v61 = vadd.f32 %v7011_v14, %v4773_v41  ;;  %v4589_v24 = vpack.c.b16 %v4573_v38, %v4572_v28 }
 0x23f   : > { %v3468_v51 = vpop.f32.mrf.mxu2  ;;  %v4095_v16 = vpack.c.b16 %v4079_v59, %v4078_v63 }
 0x240   : > { %4905 = vst [vmem:[%s7028_s9 + $0x58] sm:$0xff] %v4873_v61  ;;  %v3562_v13 = vadd.f32 %v3468_v51, %v3208_v12  ;;  %v4186_v47 = vpop.f32.mrf.mxu3 }
 0x241   : > { %v3116_v3 = vpop.f32.mrf.mxu1 }
 0x242   : > { %v4280_v39 = vadd.f32 %v4186_v47, %v3562_v13  ;;  %v4682_v21 = vpop.f32.mrf.mxu0  ;;  %v3209_v42 = vadd.f32 %v3116_v3, %v6667_v7 }
 0x244   : > { %v4774_v2 = vadd.f32 %v4680_v45, %v4280_v39 }
 0x246   : > { %v4874_v32 = vadd.f32 %v7011_v14, %v4774_v2 }
 0x247   : > { %v3470_v0 = vpop.f32.mrf.mxu2 }
 0x248   : > { %4906 = vst [vmem:[%s7028_s9 + $0x60] sm:$0xff] %v4874_v32  ;;  %v3563_v11 = vadd.f32 %v3470_v0, %v3209_v42  ;;  %v4188_v62 = vpop.f32.mrf.mxu3 }
 0x249   : > { %v3119_v25 = vpop.f32.mrf.mxu1 }
 0x24a   : > { %v4281_v33 = vadd.f32 %v4188_v62, %v3563_v11  ;;  %v4685_v44 = vpop.f32.mrf.mxu0  ;;  %v3210_v35 = vadd.f32 %v3119_v25, %v6687_v40 }
 0x24c   : > { %v4775_v45 = vadd.f32 %v4682_v21, %v4281_v33  ;;  %5423 = vmatmul.msk.bf16.gmra.mxu1 %vm302_vm1, %v3023_v36  ;;  %5536 = vmatmul.msk.bf16.gmra.mxu2 %vm302_vm1, %v5735_v5 }
 0x24d   : > { %5601 = vmatmul.msk.bf16.gmra.mxu3 %vm302_vm1, %v4095_v16  ;;  %5682 = vmatmul.msk.bf16.gmra.mxu0 %vm302_vm1, %v4589_v24 }
 0x24e   : > { %v4875_v7 = vadd.f32 %v7011_v14, %v4775_v45 }
 0x24f   : > { %v3473_v18 = vpop.f32.mrf.mxu2 }
 0x250   : > { %4907 = vst [vmem:[%s7028_s9 + $0x68] sm:$0xff] %v4875_v7  ;;  %v3564_v20 = vadd.f32 %v3473_v18, %v3210_v35  ;;  %v4191_v41 = vpop.f32.mrf.mxu3 }
 0x251   : > { %v3121_v49 = vpop.f32.mrf.mxu1 }
 0x252   : > { %v4282_v34 = vadd.f32 %v4191_v41, %v3564_v20  ;;  %v4687_v23 = vpop.f32.mrf.mxu0  ;;  %v3211_v9 = vadd.f32 %v3121_v49, %v6705_v19 }
 0x254   : > { %v4776_v55 = vadd.f32 %v4685_v44, %v4282_v34 }
 0x256   : > { %v4876_v57 = vadd.f32 %v7011_v14, %v4776_v55 }
 0x257   : > { %v3475_v53 = vpop.f32.mrf.mxu2 }
 0x258   : > { %4908 = vst [vmem:[%s7028_s9 + $0x70] sm:$0xff] %v4876_v57  ;;  %v3565_v61 = vadd.f32 %v3475_v53, %v3211_v9  ;;  %v4193_v12 = vpop.f32.mrf.mxu3  ;;  %v7263_v57 = vld [vmem:[%s7341_s2] ss:$0 sm:$0xff] }
 0x259   : > { %v3124_v31 = vpop.f32.mrf.mxu1 }
 0x25a   : > { %v4283_v52 = vadd.f32 %v4193_v12, %v3565_v61  ;;  %v4690_v40 = vpop.f32.mrf.mxu0  ;;  %v3212_v47 = vadd.f32 %v3124_v31, %v6727_v30 }
 0x25c   : > { %v4777_v51 = vadd.f32 %v4687_v23, %v4283_v52 }
 0x25e   : > { %v4877_v13 = vadd.f32 %v7011_v14, %v4777_v51 }
 0x25f   : > { %v3478_v3 = vpop.f32.mrf.mxu2 }
 0x260   : > { %4909 = vst [vmem:[%s7028_s9 + $0x78] sm:$0xff] %v4877_v13  ;;  %v3566_v29 = vadd.f32 %v3478_v3, %v3212_v47  ;;  %v4196_v17 = vpop.f32.mrf.mxu3 }
 0x261   : > { %v3126_v27 = vpop.f32.mrf.mxu1 }
 0x262   : > { %v4284_v39 = vadd.f32 %v4196_v17, %v3566_v29  ;;  %v4692_v19 = vpop.f32.mrf.mxu0  ;;  %v3213_v46 = vadd.f32 %v3126_v27, %v6739_v43 }
 0x264   : > { %v4778_v21 = vadd.f32 %v4690_v40, %v4284_v39 }
 0x266   : > { %v4878_v15 = vadd.f32 %v7011_v14, %v4778_v21 }
 0x267   : > { %v3480_v4 = vpop.f32.mrf.mxu2 }
 0x268   : > { %4910 = vst [vmem:[%s7028_s9 + $0x80] sm:$0xff] %v4878_v15  ;;  %v3567_v2 = vadd.f32 %v3480_v4, %v3213_v46  ;;  %v4198_v37 = vpop.f32.mrf.mxu3 }
 0x269   : > { %v3129_v22 = vpop.f32.mrf.mxu1 }
 0x26a   : > { %v4285_v63 = vadd.f32 %v4198_v37, %v3567_v2  ;;  %v4695_v30 = vpop.f32.mrf.mxu0  ;;  %v3214_v38 = vadd.f32 %v3129_v22, %v6759_v54 }
 0x26c   : > { %v4779_v59 = vadd.f32 %v4692_v19, %v4285_v63 }
 0x26e   : > { %v4879_v28 = vadd.f32 %v7011_v14, %v4779_v59 }
 0x26f   : > { %v3483_v32 = vpop.f32.mrf.mxu2 }
 0x270   : > { %4911 = vst [vmem:[%s7028_s9 + $0x88] sm:$0xff] %v4879_v28  ;;  %v3568_v42 = vadd.f32 %v3483_v32, %v3214_v38  ;;  %v4201_v0 = vpop.f32.mrf.mxu3 }
 0x271   : > { %v3131_v11 = vpop.f32.mrf.mxu1 }
 0x272   : > { %v4286_v62 = vadd.f32 %v4201_v0, %v3568_v42  ;;  %v4697_v43 = vpop.f32.mrf.mxu0  ;;  %v3215_v25 = vadd.f32 %v3131_v11, %v6777_v10 }
 0x274   : > { %v4780_v36 = vadd.f32 %v4695_v30, %v4286_v62 }
 0x276   : > { %v4880_v5 = vadd.f32 %v7011_v14, %v4780_v36 }
 0x277   : > { %v3485_v16 = vpop.f32.mrf.mxu2 }
 0x278   : > { %4912 = vst [vmem:[%s7028_s9 + $0x90] sm:$0xff] %v4880_v5  ;;  %v3569_v24 = vadd.f32 %v3485_v16, %v3215_v25  ;;  %v4203_v33 = vpop.f32.mrf.mxu3 }
 0x279   : > { %v3134_v44 = vpop.f32.mrf.mxu1 }
 0x27a   : > { %v4287_v45 = vadd.f32 %v4203_v33, %v3569_v24  ;;  %v4700_v54 = vpop.f32.mrf.mxu0  ;;  %v3216_v18 = vadd.f32 %v3134_v44, %v6799_v60 }
 0x27c   : > { %v4781_v7 = vadd.f32 %v4697_v43, %v4287_v45 }
 0x27e   : > { %v4881_v35 = vadd.f32 %v7011_v14, %v4781_v7 }
 0x27f   : > { %v3488_v20 = vpop.f32.mrf.mxu2 }
 0x280   : > { %4913 = vst [vmem:[%s7028_s9 + $0x98] sm:$0xff] %v4881_v35  ;;  %v3570_v41 = vadd.f32 %v3488_v20, %v3216_v18  ;;  %v4206_v49 = vpop.f32.mrf.mxu3 }
 0x281   : > { %v3136_v34 = vpop.f32.mrf.mxu1 }
 0x282   : > { %v4288_v23 = vadd.f32 %v4206_v49, %v3570_v41  ;;  %v4702_v10 = vpop.f32.mrf.mxu0  ;;  %v3217_v14 = vadd.f32 %v3136_v34, %v6811_v26  ;;  %v7366_v49 = vld [vmem:[#allocation6_spill] sm:$0xff] }
 0x284   : > { %v4782_v55 = vadd.f32 %v4700_v54, %v4288_v23 }
 0x286   : > { %v4882_v9 = vadd.f32 %v7263_v57, %v4782_v55 }
 0x287   : > { %v3490_v53 = vpop.f32.mrf.mxu2 }
 0x288   : > { %4914 = vst [vmem:[%s7028_s9 + $0xa0] sm:$0xff] %v4882_v9  ;;  %v3571_v60 = vadd.f32 %v3490_v53, %v3217_v14  ;;  %v4208_v61 = vpop.f32.mrf.mxu3 }
 0x289   : > { %v3139_v12 = vpop.f32.mrf.mxu1 }
 0x28a   : > { %v4289_v31 = vadd.f32 %v4208_v61, %v3571_v60  ;;  %v4705_v52 = vpop.f32.mrf.mxu0  ;;  %v3218_v13 = vadd.f32 %v3139_v12, %v6831_v58  ;;  %v7367_v61 = vld [vmem:[#allocation7_spill] sm:$0xff] }
 0x28c   : > { %v4783_v40 = vadd.f32 %v4702_v10, %v4289_v31 }
 0x28e   : > { %v4883_v51 = vadd.f32 %v7263_v57, %v4783_v40 }
 0x28f   : > { %v3493_v47 = vpop.f32.mrf.mxu2 }
 0x290   : > { %4915 = vst [vmem:[%s7028_s9 + $0xa8] sm:$0xff] %v4883_v51  ;;  %v3572_v3 = vadd.f32 %v3493_v47, %v3218_v13  ;;  %v4211_v29 = vpop.f32.mrf.mxu3 }
 0x291   : > { %v3141_v17 = vpop.f32.mrf.mxu1 }
 0x292   : > { %v4290_v27 = vadd.f32 %v4211_v29, %v3572_v3  ;;  %v4707_v26 = vpop.f32.mrf.mxu0  ;;  %v3219_v21 = vadd.f32 %v3141_v17, %v6849_v8 }
 0x294   : > { %v4784_v39 = vadd.f32 %v4705_v52, %v4290_v27 }
 0x296   : > { %v4884_v19 = vadd.f32 %v7263_v57, %v4784_v39 }
 0x297   : > { %v3495_v15 = vpop.f32.mrf.mxu2 }
 0x298   : > { %4916 = vst [vmem:[%s7028_s9 + $0xb0] sm:$0xff] %v4884_v19  ;;  %v3573_v46 = vadd.f32 %v3495_v15, %v3219_v21  ;;  %v4213_v4 = vpop.f32.mrf.mxu3 }
 0x299   : > { %v3144_v2 = vpop.f32.mrf.mxu1 }
 0x29a   : > { %v4291_v37 = vadd.f32 %v4213_v4, %v3573_v46  ;;  %v4710_v58 = vpop.f32.mrf.mxu0  ;;  %v3220_v30 = vadd.f32 %v3144_v2, %v6871_v6 }
 0x29c   : > { %v4785_v22 = vadd.f32 %v4707_v26, %v4291_v37 }
 0x29e   : > { %v4885_v63 = vadd.f32 %v7263_v57, %v4785_v22 }
 0x29f   : > { %v3498_v59 = vpop.f32.mrf.mxu2 }
 0x2a0   : > { %4917 = vst [vmem:[%s7028_s9 + $0xb8] sm:$0xff] %v4885_v63  ;;  %v3574_v28 = vadd.f32 %v3498_v59, %v3220_v30  ;;  %v4216_v38 = vpop.f32.mrf.mxu3 }
 0x2a1   : > { %v3146_v32 = vpop.f32.mrf.mxu1 }
 0x2a2   : > { %v4292_v42 = vadd.f32 %v4216_v38, %v3574_v28  ;;  %v4712_v8 = vpop.f32.mrf.mxu0  ;;  %v3221_v62 = vadd.f32 %v3146_v32, %v6883_v1  ;;  %v7368_v28 = vld [vmem:[#allocation8_spill] sm:$0xff] }
 0x2a4   : > { %v4786_v0 = vadd.f32 %v4710_v58, %v4292_v42 }
 0x2a6   : > { %v4886_v11 = vadd.f32 %v7263_v57, %v4786_v0 }
 0x2a7   : > { %v3500_v43 = vpop.f32.mrf.mxu2 }
 0x2a8   : > { %4918 = vst [vmem:[%s7028_s9 + $0xc0] sm:$0xff] %v4886_v11  ;;  %v3575_v36 = vadd.f32 %v3500_v43, %v3221_v62  ;;  %v4218_v5 = vpop.f32.mrf.mxu3 }
 0x2a9   : > { %v3149_v25 = vpop.f32.mrf.mxu1 }
 0x2aa   : > { %v4293_v16 = vadd.f32 %v4218_v5, %v3575_v36  ;;  %v4715_v6 = vpop.f32.mrf.mxu0  ;;  %v3222_v44 = vadd.f32 %v3149_v25, %v6903_v50 }
 0x2ac   : > { %v4787_v24 = vadd.f32 %v4712_v8, %v4293_v16 }
 0x2ae   : > { %v4887_v33 = vadd.f32 %v7263_v57, %v4787_v24 }
 0x2af   : > { %v3503_v45 = vpop.f32.mrf.mxu2 }
 0x2b0   : > { %4919 = vst [vmem:[%s7028_s9 + $0xc8] sm:$0xff] %v4887_v33  ;;  %v3576_v54 = vadd.f32 %v3503_v45, %v3222_v44  ;;  %v4221_v7 = vpop.f32.mrf.mxu3 }
 0x2b1   : > { %v3151_v35 = vpop.f32.mrf.mxu1 }
 0x2b2   : > { %v4294_v18 = vadd.f32 %v4221_v7, %v3576_v54  ;;  %v4717_v1 = vpop.f32.mrf.mxu0  ;;  %v3223_v34 = vadd.f32 %v3151_v35, %v7366_v49 }
 0x2b4   : > { %v4788_v20 = vadd.f32 %v4715_v6, %v4294_v18 }
 0x2b6   : > { %v4888_v41 = vadd.f32 %v7263_v57, %v4788_v20 }
 0x2b7   : > { %v3505_v23 = vpop.f32.mrf.mxu2 }
 0x2b8   : > { %4920 = vst [vmem:[%s7028_s9 + $0xd0] sm:$0xff] %v4888_v41  ;;  %v3577_v10 = vadd.f32 %v3505_v23, %v3223_v34  ;;  %v4223_v55 = vpop.f32.mrf.mxu3 }
 0x2b9   : > { %v3154_v9 = vpop.f32.mrf.mxu1 }
 0x2ba   : > { %v4295_v14 = vadd.f32 %v4223_v55, %v3577_v10  ;;  %v4720_v53 = vpop.f32.mrf.mxu0  ;;  %v3224_v12 = vadd.f32 %v3154_v9, %v7367_v61 }
 0x2bc   : > { %v4789_v50 = vadd.f32 %v4717_v1, %v4295_v14 }
 0x2be   : > { %v4889_v60 = vadd.f32 %v7263_v57, %v4789_v50 }
 0x2bf   : > { %v3508_v31 = vpop.f32.mrf.mxu2 }
 0x2c0   : > { %4921 = vst [vmem:[%s7028_s9 + $0xd8] sm:$0xff] %v4889_v60  ;;  %v3578_v52 = vadd.f32 %v3508_v31, %v3224_v12  ;;  %v4226_v40 = vpop.f32.mrf.mxu3 }
 0x2c1   : > { %v3156_v51 = vpop.f32.mrf.mxu1 }
 0x2c2   : > { %v4296_v13 = vadd.f32 %v4226_v40, %v3578_v52  ;;  %v3225_v29 = vadd.f32 %v3156_v51, %v6955_v56  ;;  %v4722_v17 = vpop.f32.mrf.mxu0 }
 0x2c4   : > { %v4790_v47 = vadd.f32 %v4720_v53, %v4296_v13 }
 0x2c6   : > { %v4890_v3 = vadd.f32 %v7263_v57, %v4790_v47 }
 0x2c7   : > { %v3510_v27 = vpop.f32.mrf.mxu2 }
 0x2c8   : > { %4922 = vst [vmem:[%s7028_s9 + $0xe0] sm:$0xff] %v4890_v3  ;;  %v3579_v26 = vadd.f32 %v3510_v27, %v3225_v29  ;;  %v4228_v39 = vpop.f32.mrf.mxu3 }
 0x2c9   : > { %v3159_v19 = vpop.f32.mrf.mxu1 }
 0x2ca   : > { %v4297_v21 = vadd.f32 %v4228_v39, %v3579_v26  ;;  %v3226_v4 = vadd.f32 %v3159_v19, %v6975_v48  ;;  %v4725_v56 = vpop.f32.mrf.mxu0 }
 0x2cc   : > { %v4791_v15 = vadd.f32 %v4722_v17, %v4297_v21 }
 0x2ce   : > { %v4891_v46 = vadd.f32 %v7263_v57, %v4791_v15 }
 0x2cf   : > { %v3513_v2 = vpop.f32.mrf.mxu2 }
 0x2d0   : > { %4923 = vst [vmem:[%s7028_s9 + $0xe8] sm:$0xff] %v4891_v46  ;;  %v3580_v37 = vadd.f32 %v3513_v2, %v3226_v4  ;;  %v4231_v58 = vpop.f32.mrf.mxu3 }
 0x2d1   : > { %v3161_v63 = vpop.f32.mrf.mxu1 }
 0x2d2   : > { %v4298_v22 = vadd.f32 %v4231_v58, %v3580_v37  ;;  %v3227_v38 = vadd.f32 %v3161_v63, %v7368_v28  ;;  %v4727_v0 = vpop.f32.mrf.mxu0 }
 0x2d4   : > { %v4792_v30 = vadd.f32 %v4725_v56, %v4298_v22 }
 0x2d6   : > { %v4892_v59 = vadd.f32 %v7263_v57, %v4792_v30 }
 0x2d7   : > { %v3515_v32 = vpop.f32.mrf.mxu2 }
 0x2d8   : > { %4924 = vst [vmem:[%s7028_s9 + $0xf0] sm:$0xff] %v4892_v59  ;;  %v3581_v48 = vadd.f32 %v3515_v32, %v3227_v38  ;;  %v4233_v42 = vpop.f32.mrf.mxu3 }
 0x2da   : > { %v4299_v8 = vadd.f32 %v4233_v42, %v3581_v48 }
 0x2dc   : > { %v4793_v11 = vadd.f32 %v4727_v0, %v4299_v8 }
 0x2de   : > { %v4893_v62 = vadd.f32 %v7263_v57, %v4793_v11 }
 0x2e0   : > { %4925 = vst [vmem:[%s7028_s9 + $0xf8] sm:$0xff] %v4893_v62 }
 0x2e1   : > { %5827 = shalt.err (!%p5824_p5)
}
 0x2e2   : > { %s5880_s5 = smov 128   ;;  %s5881_s9 = smov 8  }
 0x2e3   : > { %5741 = dma.vmem_to_hbm [thread:$0]  (%p5942_p4), %s4943_s26, 4096, %s4945_s27, %s4927_s15, %s5880_s5, %s5880_s5, %s5881_s9  }
 0x2e4 PF: > { %p5747_p6 = scmp.ge.s32.totalorder %s5878_s17, 2  ;;  %s4959_s10 = sand.u32 1, %s5858_s12  }
 0x2e5   : > { %s4960_s11 = scalar_lea.sflag [#allocation4], %s4959_s10 }
 0x2e6   : > { %p5744_p7 = pnand %p5747_p6, %p5949_p8 }
 0x2e8   : > { %p5745_p9 = pneg %p5744_p7 }
 0x2ea   : > { %5853 = dma.done.wait (%p5745_p9), %s4960_s11, 4096  }
 0x2eb   : > { %5855 = vsyncadd (%p5745_p9), %s4960_s11, 4294963200  ;;  %s16_s17 = sadd.s32 1, %s5878_s17   ;;  %s7369_s12 = smov %s5862_s13 }
 0x2ec   : > { %p13_p10 = scmp.ge.s32.totalorder %s16_s17, 4   ;;  %s7370_s13 = smov %s5866_s14 }
 0x2ed   : > { %s7371_s14 = smov %s5955_s25  ;;  %s7372_s15 = smov %s5874_s16 }
 0x2ee   : > { %s7373_s16 = smov %s7375_s20  ;;  %15 = sbr.rel (!%p13_p10) target bundleno = 4 (0x4), region = 78 }
 0x2f3   :  { %4966 = vsyncpa [#allocation4], 1 }
 0x2f4   :  { %4968 = vsyncpa [#allocation4 + $0x1], 1 }

</bundles_post_ra>
